<compile_context>
chip_gen: v7x
topology: tpu7x:2x2x1
jax: 0.10.0
libtpu: 0.0.40
codegen_flags: <defaults>
</compile_context>

<pallas_src>
import functools
import numpy as np

import jax
import jax.numpy as jnp
from jax.experimental import pallas as pl
from jax.experimental.pallas import tpu as pltpu


def _round_up(n, m):
    return ((n + m - 1) // m) * m


# ---------------------------------------------------------------------------
# Fused whole-encoder kernel.  One grid step == TB images.
#
# In-kernel activation layout (per tile of TB images):
#   x_ref : (8, 8*TB, 192)  group k = h0 % 8, rows t*TB + b, lanes (w0, c0)
#   conv1 : 4 groups a1_j, rows t*TB + b  <->  h1 = 4*t + j        (8*TB, 256)
#   conv2 : a2e rows s*TB + b <-> h2 = 2*s ; a2o <-> h2 = 2*s + 1  (8*TB, 256)
#   conv3 : rows h3*TB + b, lanes (w3, c3) padded 224 -> 256       (7*TB, 256)
# All slices below are contiguous and start at multiples of TB (>= 16), so
# they are free sublane-aligned views.
# ---------------------------------------------------------------------------
def _encoder_kernel(x_ref, w1_ref, b1_ref, w2_ref, b2_ref, w3_ref, b3_ref,
                    wl1_ref, bl1_ref, wl2_ref, bl2_ref, out_ref,
                    a2e_ref, a2o_ref, a3_ref):
    f32 = jnp.float32
    bf16 = jnp.bfloat16
    TB = out_ref.shape[0]

    w1_0, w1_1 = w1_ref[0], w1_ref[1]          # (192, 256) bf16
    w2_0, w2_1 = w2_ref[0], w2_ref[1]          # (256, 256) bf16

    def conv1_group(j):
        # input row groups k = 2j, 2j+1  ->  conv1 output rows h1 = 4*t + j
        acc = jnp.dot(x_ref[2 * j], w1_0, preferred_element_type=f32)
        acc = acc + jnp.dot(x_ref[2 * j + 1], w1_1, preferred_element_type=f32)
        return jnp.maximum(acc + b1_ref[...], 0.0).astype(bf16)   # (8*TB, 256)

    # ---- conv1 + conv2 (producer/consumer; conv1 never hits scratch) -------
    a1_0 = conv1_group(0)
    a1_1 = conv1_group(1)
    acc = jnp.dot(a1_0, w2_0, preferred_element_type=f32)
    acc = acc + jnp.dot(a1_1, w2_1, preferred_element_type=f32)
    a2e_ref[...] = jnp.maximum(acc + b2_ref[...], 0.0).astype(bf16)  # h2 even

    a1_2 = conv1_group(2)
    a1_3 = conv1_group(3)
    acc = jnp.dot(a1_2, w2_0, preferred_element_type=f32)
    acc = acc + jnp.dot(a1_3, w2_1, preferred_element_type=f32)
    a2o_ref[...] = jnp.maximum(acc + b2_ref[...], 0.0).astype(bf16)  # h2 odd

    # ---- conv3: h2 = 2*h3 + kh  ->  (even, odd, even-shifted-by-one-slab) ---
    acc = jnp.dot(a2e_ref[0:7 * TB], w3_ref[0], preferred_element_type=f32)
    acc = acc + jnp.dot(a2o_ref[0:7 * TB], w3_ref[1], preferred_element_type=f32)
    acc = acc + jnp.dot(a2e_ref[TB:8 * TB], w3_ref[2], preferred_element_type=f32)
    a3_ref[...] = jnp.maximum(acc + b3_ref[...], 0.0).astype(bf16)   # (7*TB, 256)

    # ---- flatten + linear1: 7 contiguous (TB, 256) x (256, 128) matmuls -----
    y1 = jnp.dot(a3_ref[0:TB], wl1_ref[0], preferred_element_type=f32)
    for r in range(1, 7):
        y1 = y1 + jnp.dot(a3_ref[r * TB:(r + 1) * TB], wl1_ref[r],
                          preferred_element_type=f32)
    y1 = jnp.maximum(y1 + bl1_ref[...], 0.0).astype(bf16)            # (TB, 128)

    # ---- linear2: zero-padded to 128 lanes => lane-dense store --------------
    out_ref[...] = (jnp.dot(y1, wl2_ref[...], preferred_element_type=f32)
                    + bl2_ref[...])


# ---------------------------------------------------------------------------
# One-time offline weight re-layout (block-Toeplitz conv slabs, permuted wl1,
# lane padding 224->256 for conv3/linear1, 4->128 for the final output).
# ---------------------------------------------------------------------------
def prepare_params(params, dtype=jnp.bfloat16):
    w1 = np.asarray(params["w1"], np.float32)    # [8, 3, 2, 2]   (OIHW)
    w2 = np.asarray(params["w2"], np.float32)    # [16, 8, 2, 2]
    w3 = np.asarray(params["w3"], np.float32)    # [32, 16, 3, 3]
    wl1 = np.asarray(params["wl1"], np.float32)  # [128, 1568]
    wl2 = np.asarray(params["wl2"], np.float32)  # [D, 128]
    D = wl2.shape[0]
    assert D <= 128

    # conv1: (w0,c0)[192] -> (w1,c1)[256], one slab per kernel row kh
    w1_big = np.zeros((2, 192, 256), np.float32)
    for kh in range(2):
        for kw in range(2):
            blk = w1[:, :, kh, kw].T                       # [3(c0), 8(c1)]
            for w in range(32):
                wi = 2 * w + kw
                w1_big[kh, wi * 3:(wi + 1) * 3, w * 8:(w + 1) * 8] = blk

    # conv2: (w1,c1)[256] -> (w2,c2)[256]
    w2_big = np.zeros((2, 256, 256), np.float32)
    for kh in range(2):
        for kw in range(2):
            blk = w2[:, :, kh, kw].T                       # [8(c1), 16(c2)]
            for w in range(16):
                wi = 2 * w + kw
                w2_big[kh, wi * 8:(wi + 1) * 8, w * 16:(w + 1) * 16] = blk

    # conv3: (w2,c2)[256] -> (w3,c3)[224, zero-padded to 256]
    w3_big = np.zeros((3, 256, 256), np.float32)
    for kh in range(3):
        for kw in range(3):
            blk = w3[:, :, kh, kw].T                       # [16(c2), 32(c3)]
            for w in range(7):
                wi = 2 * w + kw
                w3_big[kh, wi * 16:(wi + 1) * 16, w * 32:(w + 1) * 32] = blk

    # linear1: fold torch's NCHW flatten (c3,h3,w3) into our (h3, (w3,c3)) layout
    wl1_blk = wl1.reshape(128, 32, 7, 7).transpose(2, 3, 1, 0).reshape(7, 224, 128)
    wl1_pad = np.zeros((7, 256, 128), np.float32)
    wl1_pad[:, :224, :] = wl1_blk

    # linear2: transpose + zero-pad output lanes 4 -> 128 (lane-dense store)
    wl2_pad = np.zeros((128, 128), np.float32)
    wl2_pad[:, :D] = wl2.T
    bl2_pad = np.zeros((1, 128), np.float32)
    bl2_pad[0, :D] = np.asarray(params["bl2"], np.float32)

    b1 = np.tile(np.asarray(params["b1"], np.float32), 32)[None, :]   # (1, 256)
    b2 = np.tile(np.asarray(params["b2"], np.float32), 16)[None, :]   # (1, 256)
    b3 = np.zeros((1, 256), np.float32)
    b3[0, :224] = np.tile(np.asarray(params["b3"], np.float32), 7)

    return {
        "w1": jnp.asarray(w1_big, dtype),
        "b1": jnp.asarray(b1),
        "w2": jnp.asarray(w2_big, dtype),
        "b2": jnp.asarray(b2),
        "w3": jnp.asarray(w3_big, dtype),
        "b3": jnp.asarray(b3),
        "wl1": jnp.asarray(wl1_pad, dtype),
        "bl1": jnp.asarray(np.asarray(params["bl1"], np.float32)[None, :]),
        "wl2": jnp.asarray(wl2_pad, dtype),
        "bl2": jnp.asarray(bl2_pad),
    }


# ---------------------------------------------------------------------------
# Forward pass: one fused pallas_call, grid over batch tiles of TB images.
# ---------------------------------------------------------------------------
@functools.partial(jax.jit, static_argnames=("tile_b", "out_dim"))
def encoder_forward(x, prep, tile_b=128, out_dim=4):
    B = x.shape[0]
    assert x.shape[1:] == (3, 64, 64), x.shape

    # Tile of images per grid step (multiple of 16 keeps every bf16 slice
    # offset sublane-aligned).  Pad the batch to a whole number of tiles.
    TB = _round_up(min(int(tile_b), _round_up(B, 16)), 16)
    B_pad = _round_up(B, TB)
    nb = B_pad // TB
    if B_pad != B:
        x = jnp.pad(x, ((0, B_pad - B), (0, 0), (0, 0), (0, 0)))

    # Per-forward host glue: single transpose that regroups input rows by
    # (h0 mod 8) with the image index as the minor row dim, lanes = (w0, c0).
    xr = x.reshape(nb, TB, 3, 8, 8, 64)                 # (nb, b, c, t, k, w)
    xr = jnp.transpose(xr, (0, 4, 3, 1, 5, 2))          # (nb, k, t, b, w, c)
    xr = xr.reshape(nb, 8, 8 * TB, 192).astype(jnp.bfloat16)

    out = pl.pallas_call(
        _encoder_kernel,
        out_shape=jax.ShapeDtypeStruct((B_pad, 128), jnp.float32),
        grid=(nb,),
        in_specs=[
            pl.BlockSpec((None, 8, 8 * TB, 192), lambda b: (b, 0, 0, 0)),  # x tile
            pl.BlockSpec((2, 192, 256), lambda b: (0, 0, 0)),              # w1 slabs
            pl.BlockSpec((1, 256), lambda b: (0, 0)),                      # b1
            pl.BlockSpec((2, 256, 256), lambda b: (0, 0, 0)),              # w2 slabs
            pl.BlockSpec((1, 256), lambda b: (0, 0)),                      # b2
            pl.BlockSpec((3, 256, 256), lambda b: (0, 0, 0)),              # w3 slabs
            pl.BlockSpec((1, 256), lambda b: (0, 0)),                      # b3
            pl.BlockSpec((7, 256, 128), lambda b: (0, 0, 0)),              # wl1 blocks
            pl.BlockSpec((1, 128), lambda b: (0, 0)),                      # bl1
            pl.BlockSpec((128, 128), lambda b: (0, 0)),                    # wl2 (padded)
            pl.BlockSpec((1, 128), lambda b: (0, 0)),                      # bl2 (padded)
        ],
        out_specs=pl.BlockSpec((TB, 128), lambda b: (b, 0)),
        scratch_shapes=[
            pltpu.VMEM((8 * TB, 256), jnp.bfloat16),   # a2 even rows
            pltpu.VMEM((8 * TB, 256), jnp.bfloat16),   # a2 odd rows
            pltpu.VMEM((7 * TB, 256), jnp.bfloat16),   # conv3 output
        ],
        compiler_params=pltpu.CompilerParams(
            dimension_semantics=("parallel",),         # v7x: tiles over 2 TCs
            vmem_limit_bytes=32 * 1024 * 1024),
    )(xr, prep["w1"], prep["b1"], prep["w2"], prep["b2"], prep["w3"],
      prep["b3"], prep["wl1"], prep["bl1"], prep["wl2"], prep["bl2"])

    return out[:B, :out_dim]


# ---------------------------------------------------------------------------
# Parameter init (PyTorch layouts) and pure-JAX f32 reference for the check.
# ---------------------------------------------------------------------------
def init_params(key, encoded_space_dim=4):
    ks = jax.random.split(key, 10)

    def u(k, shape, fan_in):
        bound = 1.0 / jnp.sqrt(fan_in)
        return jax.random.uniform(k, shape, jnp.float32, -bound, bound)

    return {
        "w1": u(ks[0], (8, 3, 2, 2), 3 * 2 * 2),
        "b1": u(ks[1], (8,), 3 * 2 * 2),
        "w2": u(ks[2], (16, 8, 2, 2), 8 * 2 * 2),
        "b2": u(ks[3], (16,), 8 * 2 * 2),
        "w3": u(ks[4], (32, 16, 3, 3), 16 * 3 * 3),
        "b3": u(ks[5], (32,), 16 * 3 * 3),
        "wl1": u(ks[6], (128, 7 * 7 * 32), 7 * 7 * 32),
        "bl1": u(ks[7], (128,), 7 * 7 * 32),
        "wl2": u(ks[8], (encoded_space_dim, 128), 128),
        "bl2": u(ks[9], (encoded_space_dim,), 128),
    }


def encoder_reference(x, params):
    dn = ("NCHW", "OIHW", "NCHW")
    y = jax.lax.conv_general_dilated(x, params["w1"], (2, 2), "VALID", dimension_numbers=dn)
    y = jnp.maximum(y + params["b1"][None, :, None, None], 0.0)
    y = jax.lax.conv_general_dilated(y, params["w2"], (2, 2), "VALID", dimension_numbers=dn)
    y = jnp.maximum(y + params["b2"][None, :, None, None], 0.0)
    y = jax.lax.conv_general_dilated(y, params["w3"], (2, 2), "VALID", dimension_numbers=dn)
    y = jnp.maximum(y + params["b3"][None, :, None, None], 0.0)
    y = y.reshape(y.shape[0], -1)
    y = jnp.maximum(y @ params["wl1"].T + params["bl1"], 0.0)
    y = y @ params["wl2"].T + params["bl2"]
    return y


if __name__ == "__main__":
    key = jax.random.PRNGKey(0)
    kx, kp = jax.random.split(key)

    # 64x64 input -> 32 -> 16 -> 7 spatial: 7*7*32 = 1568 flatten for Linear.
    x = jax.random.normal(kx, (2, 3, 64, 64), jnp.float32)   # NCHW, like PyTorch
    params = init_params(kp, encoded_space_dim=4)
    prep = prepare_params(params)                            # one-time offline prep

    out = jax.block_until_ready(encoder_forward(x, prep))
    assert out.shape == (2, 4), out.shape

    ref = jax.block_until_ready(encoder_reference(x, params))
    max_err = float(jnp.max(jnp.abs(out - ref)))
    # bf16 MXU operands with f32 accumulation: comfortably within 3e-2.
    assert jnp.allclose(out, ref, atol=3e-2, rtol=3e-2), max_err

    print("KERNEL_OK")
</pallas_src>

<mosaic_0001>
module attributes {stable_mosaic.version = 11 : i64} {
  func.func @_encoder_kernel(%arg0: i32, %arg1: memref<1x8x128x192xbf16, #tpu.memory_space<vmem>>, %arg2: memref<2x192x256xbf16, #tpu.memory_space<vmem>>, %arg3: memref<1x256xf32, #tpu.memory_space<vmem>>, %arg4: memref<2x256x256xbf16, #tpu.memory_space<vmem>>, %arg5: memref<1x256xf32, #tpu.memory_space<vmem>>, %arg6: memref<3x256x256xbf16, #tpu.memory_space<vmem>>, %arg7: memref<1x256xf32, #tpu.memory_space<vmem>>, %arg8: memref<7x256x128xbf16, #tpu.memory_space<vmem>>, %arg9: memref<1x128xf32, #tpu.memory_space<vmem>>, %arg10: memref<128x128xbf16, #tpu.memory_space<vmem>>, %arg11: memref<1x128xf32, #tpu.memory_space<vmem>>, %arg12: memref<16x128xf32, #tpu.memory_space<vmem>>, %arg13: memref<128x256xbf16, #tpu.memory_space<vmem>>, %arg14: memref<128x256xbf16, #tpu.memory_space<vmem>>, %arg15: memref<112x256xbf16, #tpu.memory_space<vmem>>) attributes {dimension_semantics = [#tpu.dimension_semantics<parallel>], iteration_bounds = array<i64: 1>, scalar_prefetch = 0 : i64, scratch_operands = 3 : i64, tpu.core_type = #tpu.core_type<tc>, window_params = [{transform_indices = @transform_0, window_bounds = array<i64: 1, 8, 128, 192>}, {pipeline_mode = #tpu.pipeline_mode<synchronous>, transform_indices = @transform_1, window_bounds = array<i64: 2, 192, 256>}, {pipeline_mode = #tpu.pipeline_mode<synchronous>, transform_indices = @transform_2, window_bounds = array<i64: 1, 256>}, {pipeline_mode = #tpu.pipeline_mode<synchronous>, transform_indices = @transform_3, window_bounds = array<i64: 2, 256, 256>}, {pipeline_mode = #tpu.pipeline_mode<synchronous>, transform_indices = @transform_4, window_bounds = array<i64: 1, 256>}, {pipeline_mode = #tpu.pipeline_mode<synchronous>, transform_indices = @transform_5, window_bounds = array<i64: 3, 256, 256>}, {pipeline_mode = #tpu.pipeline_mode<synchronous>, transform_indices = @transform_6, window_bounds = array<i64: 1, 256>}, {pipeline_mode = #tpu.pipeline_mode<synchronous>, transform_indices = @transform_7, window_bounds = array<i64: 7, 256, 128>}, {pipeline_mode = #tpu.pipeline_mode<synchronous>, transform_indices = @transform_8, window_bounds = array<i64: 1, 128>}, {pipeline_mode = #tpu.pipeline_mode<synchronous>, transform_indices = @transform_9, window_bounds = array<i64: 128, 128>}, {pipeline_mode = #tpu.pipeline_mode<synchronous>, transform_indices = @transform_10, window_bounds = array<i64: 1, 128>}, {transform_indices = @transform_11, window_bounds = array<i64: 16, 128>}]} {
    %c0 = arith.constant 0 : index
    %c0_0 = arith.constant 0 : index
    %c0_1 = arith.constant 0 : index
    %0 = vector.load %arg2[%c0, %c0_0, %c0_1] : memref<2x192x256xbf16, #tpu.memory_space<vmem>>, vector<1x192x256xbf16>
    %1 = vector.shape_cast %0 : vector<1x192x256xbf16> to vector<192x256xbf16>
    %c1 = arith.constant 1 : index
    %c0_2 = arith.constant 0 : index
    %c0_3 = arith.constant 0 : index
    %2 = vector.load %arg2[%c1, %c0_2, %c0_3] : memref<2x192x256xbf16, #tpu.memory_space<vmem>>, vector<1x192x256xbf16>
    %3 = vector.shape_cast %2 : vector<1x192x256xbf16> to vector<192x256xbf16>
    %c0_4 = arith.constant 0 : index
    %c0_5 = arith.constant 0 : index
    %c0_6 = arith.constant 0 : index
    %4 = vector.load %arg4[%c0_4, %c0_5, %c0_6] : memref<2x256x256xbf16, #tpu.memory_space<vmem>>, vector<1x256x256xbf16>
    %5 = vector.shape_cast %4 : vector<1x256x256xbf16> to vector<256x256xbf16>
    %c1_7 = arith.constant 1 : index
    %c0_8 = arith.constant 0 : index
    %c0_9 = arith.constant 0 : index
    %6 = vector.load %arg4[%c1_7, %c0_8, %c0_9] : memref<2x256x256xbf16, #tpu.memory_space<vmem>>, vector<1x256x256xbf16>
    %7 = vector.shape_cast %6 : vector<1x256x256xbf16> to vector<256x256xbf16>
    %c0_10 = arith.constant 0 : index
    %c0_11 = arith.constant 0 : index
    %c0_12 = arith.constant 0 : index
    %c0_13 = arith.constant 0 : index
    %8 = vector.load %arg1[%c0_10, %c0_11, %c0_12, %c0_13] : memref<1x8x128x192xbf16, #tpu.memory_space<vmem>>, vector<1x1x128x192xbf16>
    %9 = vector.shape_cast %8 : vector<1x1x128x192xbf16> to vector<128x192xbf16>
    %cst = arith.constant dense<0.000000e+00> : vector<128x256xf32>
    %10 = tpu.matmul %9, %1, %cst {dimension_numbers = #tpu.dot_dimension_numbers<[1], [0], [0], [1], [0, 0, 1, 1], [], []>} : vector<128x192xbf16>, vector<192x256xbf16>, vector<128x256xf32> -> vector<128x256xf32>
    %c0_14 = arith.constant 0 : index
    %c1_15 = arith.constant 1 : index
    %c0_16 = arith.constant 0 : index
    %c0_17 = arith.constant 0 : index
    %11 = vector.load %arg1[%c0_14, %c1_15, %c0_16, %c0_17] : memref<1x8x128x192xbf16, #tpu.memory_space<vmem>>, vector<1x1x128x192xbf16>
    %12 = vector.shape_cast %11 : vector<1x1x128x192xbf16> to vector<128x192xbf16>
    %cst_18 = arith.constant dense<0.000000e+00> : vector<128x256xf32>
    %13 = tpu.matmul %12, %3, %cst_18 {dimension_numbers = #tpu.dot_dimension_numbers<[1], [0], [0], [1], [0, 0, 1, 1], [], []>} : vector<128x192xbf16>, vector<192x256xbf16>, vector<128x256xf32> -> vector<128x256xf32>
    %14 = arith.addf %10, %13 : vector<128x256xf32>
    %c0_19 = arith.constant 0 : index
    %c0_20 = arith.constant 0 : index
    %15 = vector.load %arg3[%c0_19, %c0_20] : memref<1x256xf32, #tpu.memory_space<vmem>>, vector<1x256xf32>
    %16 = vector.broadcast %15 : vector<1x256xf32> to vector<128x256xf32>
    %17 = arith.addf %14, %16 : vector<128x256xf32>
    %cst_21 = arith.constant 0.000000e+00 : f32
    %18 = vector.broadcast %cst_21 : f32 to vector<128x256xf32>
    %19 = arith.maximumf %17, %18 : vector<128x256xf32>
    %20 = arith.truncf %19 : vector<128x256xf32> to vector<128x256xbf16>
    %c0_22 = arith.constant 0 : index
    %c2 = arith.constant 2 : index
    %c0_23 = arith.constant 0 : index
    %c0_24 = arith.constant 0 : index
    %21 = vector.load %arg1[%c0_22, %c2, %c0_23, %c0_24] : memref<1x8x128x192xbf16, #tpu.memory_space<vmem>>, vector<1x1x128x192xbf16>
    %22 = vector.shape_cast %21 : vector<1x1x128x192xbf16> to vector<128x192xbf16>
    %cst_25 = arith.constant dense<0.000000e+00> : vector<128x256xf32>
    %23 = tpu.matmul %22, %1, %cst_25 {dimension_numbers = #tpu.dot_dimension_numbers<[1], [0], [0], [1], [0, 0, 1, 1], [], []>} : vector<128x192xbf16>, vector<192x256xbf16>, vector<128x256xf32> -> vector<128x256xf32>
    %c0_26 = arith.constant 0 : index
    %c3 = arith.constant 3 : index
    %c0_27 = arith.constant 0 : index
    %c0_28 = arith.constant 0 : index
    %24 = vector.load %arg1[%c0_26, %c3, %c0_27, %c0_28] : memref<1x8x128x192xbf16, #tpu.memory_space<vmem>>, vector<1x1x128x192xbf16>
    %25 = vector.shape_cast %24 : vector<1x1x128x192xbf16> to vector<128x192xbf16>
    %cst_29 = arith.constant dense<0.000000e+00> : vector<128x256xf32>
    %26 = tpu.matmul %25, %3, %cst_29 {dimension_numbers = #tpu.dot_dimension_numbers<[1], [0], [0], [1], [0, 0, 1, 1], [], []>} : vector<128x192xbf16>, vector<192x256xbf16>, vector<128x256xf32> -> vector<128x256xf32>
    %27 = arith.addf %23, %26 : vector<128x256xf32>
    %c0_30 = arith.constant 0 : index
    %c0_31 = arith.constant 0 : index
    %28 = vector.load %arg3[%c0_30, %c0_31] : memref<1x256xf32, #tpu.memory_space<vmem>>, vector<1x256xf32>
    %29 = vector.broadcast %28 : vector<1x256xf32> to vector<128x256xf32>
    %30 = arith.addf %27, %29 : vector<128x256xf32>
    %cst_32 = arith.constant 0.000000e+00 : f32
    %31 = vector.broadcast %cst_32 : f32 to vector<128x256xf32>
    %32 = arith.maximumf %30, %31 : vector<128x256xf32>
    %33 = arith.truncf %32 : vector<128x256xf32> to vector<128x256xbf16>
    %cst_33 = arith.constant dense<0.000000e+00> : vector<128x256xf32>
    %34 = tpu.matmul %20, %5, %cst_33 {dimension_numbers = #tpu.dot_dimension_numbers<[1], [0], [0], [1], [0, 0, 1, 1], [], []>} : vector<128x256xbf16>, vector<256x256xbf16>, vector<128x256xf32> -> vector<128x256xf32>
    %cst_34 = arith.constant dense<0.000000e+00> : vector<128x256xf32>
    %35 = tpu.matmul %33, %7, %cst_34 {dimension_numbers = #tpu.dot_dimension_numbers<[1], [0], [0], [1], [0, 0, 1, 1], [], []>} : vector<128x256xbf16>, vector<256x256xbf16>, vector<128x256xf32> -> vector<128x256xf32>
    %36 = arith.addf %34, %35 : vector<128x256xf32>
    %c0_35 = arith.constant 0 : index
    %c0_36 = arith.constant 0 : index
    %37 = vector.load %arg5[%c0_35, %c0_36] : memref<1x256xf32, #tpu.memory_space<vmem>>, vector<1x256xf32>
    %38 = vector.broadcast %37 : vector<1x256xf32> to vector<128x256xf32>
    %39 = arith.addf %36, %38 : vector<128x256xf32>
    %cst_37 = arith.constant 0.000000e+00 : f32
    %40 = vector.broadcast %cst_37 : f32 to vector<128x256xf32>
    %41 = arith.maximumf %39, %40 : vector<128x256xf32>
    %42 = arith.truncf %41 : vector<128x256xf32> to vector<128x256xbf16>
    %c0_38 = arith.constant 0 : index
    %c0_39 = arith.constant 0 : index
    %43 = vector.load %arg13[%c0_38, %c0_39] : memref<128x256xbf16, #tpu.memory_space<vmem>>, vector<128x256xbf16>
    tpu.vector_store %arg13[%c0_38, %c0_39], %42 {strides = array<i32>} : memref<128x256xbf16, #tpu.memory_space<vmem>>, vector<128x256xbf16>,
    %c0_40 = arith.constant 0 : index
    %c4 = arith.constant 4 : index
    %c0_41 = arith.constant 0 : index
    %c0_42 = arith.constant 0 : index
    %44 = vector.load %arg1[%c0_40, %c4, %c0_41, %c0_42] : memref<1x8x128x192xbf16, #tpu.memory_space<vmem>>, vector<1x1x128x192xbf16>
    %45 = vector.shape_cast %44 : vector<1x1x128x192xbf16> to vector<128x192xbf16>
    %cst_43 = arith.constant dense<0.000000e+00> : vector<128x256xf32>
    %46 = tpu.matmul %45, %1, %cst_43 {dimension_numbers = #tpu.dot_dimension_numbers<[1], [0], [0], [1], [0, 0, 1, 1], [], []>} : vector<128x192xbf16>, vector<192x256xbf16>, vector<128x256xf32> -> vector<128x256xf32>
    %c0_44 = arith.constant 0 : index
    %c5 = arith.constant 5 : index
    %c0_45 = arith.constant 0 : index
    %c0_46 = arith.constant 0 : index
    %47 = vector.load %arg1[%c0_44, %c5, %c0_45, %c0_46] : memref<1x8x128x192xbf16, #tpu.memory_space<vmem>>, vector<1x1x128x192xbf16>
    %48 = vector.shape_cast %47 : vector<1x1x128x192xbf16> to vector<128x192xbf16>
    %cst_47 = arith.constant dense<0.000000e+00> : vector<128x256xf32>
    %49 = tpu.matmul %48, %3, %cst_47 {dimension_numbers = #tpu.dot_dimension_numbers<[1], [0], [0], [1], [0, 0, 1, 1], [], []>} : vector<128x192xbf16>, vector<192x256xbf16>, vector<128x256xf32> -> vector<128x256xf32>
    %50 = arith.addf %46, %49 : vector<128x256xf32>
    %c0_48 = arith.constant 0 : index
    %c0_49 = arith.constant 0 : index
    %51 = vector.load %arg3[%c0_48, %c0_49] : memref<1x256xf32, #tpu.memory_space<vmem>>, vector<1x256xf32>
    %52 = vector.broadcast %51 : vector<1x256xf32> to vector<128x256xf32>
    %53 = arith.addf %50, %52 : vector<128x256xf32>
    %cst_50 = arith.constant 0.000000e+00 : f32
    %54 = vector.broadcast %cst_50 : f32 to vector<128x256xf32>
    %55 = arith.maximumf %53, %54 : vector<128x256xf32>
    %56 = arith.truncf %55 : vector<128x256xf32> to vector<128x256xbf16>
    %c0_51 = arith.constant 0 : index
    %c6 = arith.constant 6 : index
    %c0_52 = arith.constant 0 : index
    %c0_53 = arith.constant 0 : index
    %57 = vector.load %arg1[%c0_51, %c6, %c0_52, %c0_53] : memref<1x8x128x192xbf16, #tpu.memory_space<vmem>>, vector<1x1x128x192xbf16>
    %58 = vector.shape_cast %57 : vector<1x1x128x192xbf16> to vector<128x192xbf16>
    %cst_54 = arith.constant dense<0.000000e+00> : vector<128x256xf32>
    %59 = tpu.matmul %58, %1, %cst_54 {dimension_numbers = #tpu.dot_dimension_numbers<[1], [0], [0], [1], [0, 0, 1, 1], [], []>} : vector<128x192xbf16>, vector<192x256xbf16>, vector<128x256xf32> -> vector<128x256xf32>
    %c0_55 = arith.constant 0 : index
    %c7 = arith.constant 7 : index
    %c0_56 = arith.constant 0 : index
    %c0_57 = arith.constant 0 : index
    %60 = vector.load %arg1[%c0_55, %c7, %c0_56, %c0_57] : memref<1x8x128x192xbf16, #tpu.memory_space<vmem>>, vector<1x1x128x192xbf16>
    %61 = vector.shape_cast %60 : vector<1x1x128x192xbf16> to vector<128x192xbf16>
    %cst_58 = arith.constant dense<0.000000e+00> : vector<128x256xf32>
    %62 = tpu.matmul %61, %3, %cst_58 {dimension_numbers = #tpu.dot_dimension_numbers<[1], [0], [0], [1], [0, 0, 1, 1], [], []>} : vector<128x192xbf16>, vector<192x256xbf16>, vector<128x256xf32> -> vector<128x256xf32>
    %63 = arith.addf %59, %62 : vector<128x256xf32>
    %c0_59 = arith.constant 0 : index
    %c0_60 = arith.constant 0 : index
    %64 = vector.load %arg3[%c0_59, %c0_60] : memref<1x256xf32, #tpu.memory_space<vmem>>, vector<1x256xf32>
    %65 = vector.broadcast %64 : vector<1x256xf32> to vector<128x256xf32>
    %66 = arith.addf %63, %65 : vector<128x256xf32>
    %cst_61 = arith.constant 0.000000e+00 : f32
    %67 = vector.broadcast %cst_61 : f32 to vector<128x256xf32>
    %68 = arith.maximumf %66, %67 : vector<128x256xf32>
    %69 = arith.truncf %68 : vector<128x256xf32> to vector<128x256xbf16>
    %cst_62 = arith.constant dense<0.000000e+00> : vector<128x256xf32>
    %70 = tpu.matmul %56, %5, %cst_62 {dimension_numbers = #tpu.dot_dimension_numbers<[1], [0], [0], [1], [0, 0, 1, 1], [], []>} : vector<128x256xbf16>, vector<256x256xbf16>, vector<128x256xf32> -> vector<128x256xf32>
    %cst_63 = arith.constant dense<0.000000e+00> : vector<128x256xf32>
    %71 = tpu.matmul %69, %7, %cst_63 {dimension_numbers = #tpu.dot_dimension_numbers<[1], [0], [0], [1], [0, 0, 1, 1], [], []>} : vector<128x256xbf16>, vector<256x256xbf16>, vector<128x256xf32> -> vector<128x256xf32>
    %72 = arith.addf %70, %71 : vector<128x256xf32>
    %c0_64 = arith.constant 0 : index
    %c0_65 = arith.constant 0 : index
    %73 = vector.load %arg5[%c0_64, %c0_65] : memref<1x256xf32, #tpu.memory_space<vmem>>, vector<1x256xf32>
    %74 = vector.broadcast %73 : vector<1x256xf32> to vector<128x256xf32>
    %75 = arith.addf %72, %74 : vector<128x256xf32>
    %cst_66 = arith.constant 0.000000e+00 : f32
    %76 = vector.broadcast %cst_66 : f32 to vector<128x256xf32>
    %77 = arith.maximumf %75, %76 : vector<128x256xf32>
    %78 = arith.truncf %77 : vector<128x256xf32> to vector<128x256xbf16>
    %c0_67 = arith.constant 0 : index
    %c0_68 = arith.constant 0 : index
    %79 = vector.load %arg14[%c0_67, %c0_68] : memref<128x256xbf16, #tpu.memory_space<vmem>>, vector<128x256xbf16>
    tpu.vector_store %arg14[%c0_67, %c0_68], %78 {strides = array<i32>} : memref<128x256xbf16, #tpu.memory_space<vmem>>, vector<128x256xbf16>,
    %c0_69 = arith.constant 0 : index
    %c0_70 = arith.constant 0 : index
    %80 = vector.load %arg13[%c0_69, %c0_70] : memref<128x256xbf16, #tpu.memory_space<vmem>>, vector<112x256xbf16>
    %c0_71 = arith.constant 0 : index
    %c0_72 = arith.constant 0 : index
    %c0_73 = arith.constant 0 : index
    %81 = vector.load %arg6[%c0_71, %c0_72, %c0_73] : memref<3x256x256xbf16, #tpu.memory_space<vmem>>, vector<1x256x256xbf16>
    %82 = vector.shape_cast %81 : vector<1x256x256xbf16> to vector<256x256xbf16>
    %cst_74 = arith.constant dense<0.000000e+00> : vector<112x256xf32>
    %83 = tpu.matmul %80, %82, %cst_74 {dimension_numbers = #tpu.dot_dimension_numbers<[1], [0], [0], [1], [0, 0, 1, 1], [], []>} : vector<112x256xbf16>, vector<256x256xbf16>, vector<112x256xf32> -> vector<112x256xf32>
    %c0_75 = arith.constant 0 : index
    %c0_76 = arith.constant 0 : index
    %84 = vector.load %arg14[%c0_75, %c0_76] : memref<128x256xbf16, #tpu.memory_space<vmem>>, vector<112x256xbf16>
    %c1_77 = arith.constant 1 : index
    %c0_78 = arith.constant 0 : index
    %c0_79 = arith.constant 0 : index
    %85 = vector.load %arg6[%c1_77, %c0_78, %c0_79] : memref<3x256x256xbf16, #tpu.memory_space<vmem>>, vector<1x256x256xbf16>
    %86 = vector.shape_cast %85 : vector<1x256x256xbf16> to vector<256x256xbf16>
    %cst_80 = arith.constant dense<0.000000e+00> : vector<112x256xf32>
    %87 = tpu.matmul %84, %86, %cst_80 {dimension_numbers = #tpu.dot_dimension_numbers<[1], [0], [0], [1], [0, 0, 1, 1], [], []>} : vector<112x256xbf16>, vector<256x256xbf16>, vector<112x256xf32> -> vector<112x256xf32>
    %88 = arith.addf %83, %87 : vector<112x256xf32>
    %c16 = arith.constant 16 : index
    %c0_81 = arith.constant 0 : index
    %89 = vector.load %arg13[%c16, %c0_81] : memref<128x256xbf16, #tpu.memory_space<vmem>>, vector<112x256xbf16>
    %c2_82 = arith.constant 2 : index
    %c0_83 = arith.constant 0 : index
    %c0_84 = arith.constant 0 : index
    %90 = vector.load %arg6[%c2_82, %c0_83, %c0_84] : memref<3x256x256xbf16, #tpu.memory_space<vmem>>, vector<1x256x256xbf16>
    %91 = vector.shape_cast %90 : vector<1x256x256xbf16> to vector<256x256xbf16>
    %cst_85 = arith.constant dense<0.000000e+00> : vector<112x256xf32>
    %92 = tpu.matmul %89, %91, %cst_85 {dimension_numbers = #tpu.dot_dimension_numbers<[1], [0], [0], [1], [0, 0, 1, 1], [], []>} : vector<112x256xbf16>, vector<256x256xbf16>, vector<112x256xf32> -> vector<112x256xf32>
    %93 = arith.addf %88, %92 : vector<112x256xf32>
    %c0_86 = arith.constant 0 : index
    %c0_87 = arith.constant 0 : index
    %94 = vector.load %arg7[%c0_86, %c0_87] : memref<1x256xf32, #tpu.memory_space<vmem>>, vector<1x256xf32>
    %95 = vector.broadcast %94 : vector<1x256xf32> to vector<112x256xf32>
    %96 = arith.addf %93, %95 : vector<112x256xf32>
    %cst_88 = arith.constant 0.000000e+00 : f32
    %97 = vector.broadcast %cst_88 : f32 to vector<112x256xf32>
    %98 = arith.maximumf %96, %97 : vector<112x256xf32>
    %99 = arith.truncf %98 : vector<112x256xf32> to vector<112x256xbf16>
    %c0_89 = arith.constant 0 : index
    %c0_90 = arith.constant 0 : index
    %100 = vector.load %arg15[%c0_89, %c0_90] : memref<112x256xbf16, #tpu.memory_space<vmem>>, vector<112x256xbf16>
    tpu.vector_store %arg15[%c0_89, %c0_90], %99 {strides = array<i32>} : memref<112x256xbf16, #tpu.memory_space<vmem>>, vector<112x256xbf16>,
    %c0_91 = arith.constant 0 : index
    %c0_92 = arith.constant 0 : index
    %101 = vector.load %arg15[%c0_91, %c0_92] : memref<112x256xbf16, #tpu.memory_space<vmem>>, vector<16x256xbf16>
    %c0_93 = arith.constant 0 : index
    %c0_94 = arith.constant 0 : index
    %c0_95 = arith.constant 0 : index
    %102 = vector.load %arg8[%c0_93, %c0_94, %c0_95] : memref<7x256x128xbf16, #tpu.memory_space<vmem>>, vector<1x256x128xbf16>
    %103 = vector.shape_cast %102 : vector<1x256x128xbf16> to vector<256x128xbf16>
    %cst_96 = arith.constant dense<0.000000e+00> : vector<16x128xf32>
    %104 = tpu.matmul %101, %103, %cst_96 {dimension_numbers = #tpu.dot_dimension_numbers<[1], [0], [0], [1], [0, 0, 1, 1], [], []>} : vector<16x256xbf16>, vector<256x128xbf16>, vector<16x128xf32> -> vector<16x128xf32>
    %c16_97 = arith.constant 16 : index
    %c0_98 = arith.constant 0 : index
    %105 = vector.load %arg15[%c16_97, %c0_98] : memref<112x256xbf16, #tpu.memory_space<vmem>>, vector<16x256xbf16>
    %c1_99 = arith.constant 1 : index
    %c0_100 = arith.constant 0 : index
    %c0_101 = arith.constant 0 : index
    %106 = vector.load %arg8[%c1_99, %c0_100, %c0_101] : memref<7x256x128xbf16, #tpu.memory_space<vmem>>, vector<1x256x128xbf16>
    %107 = vector.shape_cast %106 : vector<1x256x128xbf16> to vector<256x128xbf16>
    %cst_102 = arith.constant dense<0.000000e+00> : vector<16x128xf32>
    %108 = tpu.matmul %105, %107, %cst_102 {dimension_numbers = #tpu.dot_dimension_numbers<[1], [0], [0], [1], [0, 0, 1, 1], [], []>} : vector<16x256xbf16>, vector<256x128xbf16>, vector<16x128xf32> -> vector<16x128xf32>
    %109 = arith.addf %104, %108 : vector<16x128xf32>
    %c32 = arith.constant 32 : index
    %c0_103 = arith.constant 0 : index
    %110 = vector.load %arg15[%c32, %c0_103] : memref<112x256xbf16, #tpu.memory_space<vmem>>, vector<16x256xbf16>
    %c2_104 = arith.constant 2 : index
    %c0_105 = arith.constant 0 : index
    %c0_106 = arith.constant 0 : index
    %111 = vector.load %arg8[%c2_104, %c0_105, %c0_106] : memref<7x256x128xbf16, #tpu.memory_space<vmem>>, vector<1x256x128xbf16>
    %112 = vector.shape_cast %111 : vector<1x256x128xbf16> to vector<256x128xbf16>
    %cst_107 = arith.constant dense<0.000000e+00> : vector<16x128xf32>
    %113 = tpu.matmul %110, %112, %cst_107 {dimension_numbers = #tpu.dot_dimension_numbers<[1], [0], [0], [1], [0, 0, 1, 1], [], []>} : vector<16x256xbf16>, vector<256x128xbf16>, vector<16x128xf32> -> vector<16x128xf32>
    %114 = arith.addf %109, %113 : vector<16x128xf32>
    %c48 = arith.constant 48 : index
    %c0_108 = arith.constant 0 : index
    %115 = vector.load %arg15[%c48, %c0_108] : memref<112x256xbf16, #tpu.memory_space<vmem>>, vector<16x256xbf16>
    %c3_109 = arith.constant 3 : index
    %c0_110 = arith.constant 0 : index
    %c0_111 = arith.constant 0 : index
    %116 = vector.load %arg8[%c3_109, %c0_110, %c0_111] : memref<7x256x128xbf16, #tpu.memory_space<vmem>>, vector<1x256x128xbf16>
    %117 = vector.shape_cast %116 : vector<1x256x128xbf16> to vector<256x128xbf16>
    %cst_112 = arith.constant dense<0.000000e+00> : vector<16x128xf32>
    %118 = tpu.matmul %115, %117, %cst_112 {dimension_numbers = #tpu.dot_dimension_numbers<[1], [0], [0], [1], [0, 0, 1, 1], [], []>} : vector<16x256xbf16>, vector<256x128xbf16>, vector<16x128xf32> -> vector<16x128xf32>
    %119 = arith.addf %114, %118 : vector<16x128xf32>
    %c64 = arith.constant 64 : index
    %c0_113 = arith.constant 0 : index
    %120 = vector.load %arg15[%c64, %c0_113] : memref<112x256xbf16, #tpu.memory_space<vmem>>, vector<16x256xbf16>
    %c4_114 = arith.constant 4 : index
    %c0_115 = arith.constant 0 : index
    %c0_116 = arith.constant 0 : index
    %121 = vector.load %arg8[%c4_114, %c0_115, %c0_116] : memref<7x256x128xbf16, #tpu.memory_space<vmem>>, vector<1x256x128xbf16>
    %122 = vector.shape_cast %121 : vector<1x256x128xbf16> to vector<256x128xbf16>
    %cst_117 = arith.constant dense<0.000000e+00> : vector<16x128xf32>
    %123 = tpu.matmul %120, %122, %cst_117 {dimension_numbers = #tpu.dot_dimension_numbers<[1], [0], [0], [1], [0, 0, 1, 1], [], []>} : vector<16x256xbf16>, vector<256x128xbf16>, vector<16x128xf32> -> vector<16x128xf32>
    %124 = arith.addf %119, %123 : vector<16x128xf32>
    %c80 = arith.constant 80 : index
    %c0_118 = arith.constant 0 : index
    %125 = vector.load %arg15[%c80, %c0_118] : memref<112x256xbf16, #tpu.memory_space<vmem>>, vector<16x256xbf16>
    %c5_119 = arith.constant 5 : index
    %c0_120 = arith.constant 0 : index
    %c0_121 = arith.constant 0 : index
    %126 = vector.load %arg8[%c5_119, %c0_120, %c0_121] : memref<7x256x128xbf16, #tpu.memory_space<vmem>>, vector<1x256x128xbf16>
    %127 = vector.shape_cast %126 : vector<1x256x128xbf16> to vector<256x128xbf16>
    %cst_122 = arith.constant dense<0.000000e+00> : vector<16x128xf32>
    %128 = tpu.matmul %125, %127, %cst_122 {dimension_numbers = #tpu.dot_dimension_numbers<[1], [0], [0], [1], [0, 0, 1, 1], [], []>} : vector<16x256xbf16>, vector<256x128xbf16>, vector<16x128xf32> -> vector<16x128xf32>
    %129 = arith.addf %124, %128 : vector<16x128xf32>
    %c96 = arith.constant 96 : index
    %c0_123 = arith.constant 0 : index
    %130 = vector.load %arg15[%c96, %c0_123] : memref<112x256xbf16, #tpu.memory_space<vmem>>, vector<16x256xbf16>
    %c6_124 = arith.constant 6 : index
    %c0_125 = arith.constant 0 : index
    %c0_126 = arith.constant 0 : index
    %131 = vector.load %arg8[%c6_124, %c0_125, %c0_126] : memref<7x256x128xbf16, #tpu.memory_space<vmem>>, vector<1x256x128xbf16>
    %132 = vector.shape_cast %131 : vector<1x256x128xbf16> to vector<256x128xbf16>
    %cst_127 = arith.constant dense<0.000000e+00> : vector<16x128xf32>
    %133 = tpu.matmul %130, %132, %cst_127 {dimension_numbers = #tpu.dot_dimension_numbers<[1], [0], [0], [1], [0, 0, 1, 1], [], []>} : vector<16x256xbf16>, vector<256x128xbf16>, vector<16x128xf32> -> vector<16x128xf32>
    %134 = arith.addf %129, %133 : vector<16x128xf32>
    %c0_128 = arith.constant 0 : index
    %c0_129 = arith.constant 0 : index
    %135 = vector.load %arg9[%c0_128, %c0_129] : memref<1x128xf32, #tpu.memory_space<vmem>>, vector<1x128xf32>
    %136 = vector.broadcast %135 : vector<1x128xf32> to vector<16x128xf32>
    %137 = arith.addf %134, %136 : vector<16x128xf32>
    %cst_130 = arith.constant 0.000000e+00 : f32
    %138 = vector.broadcast %cst_130 : f32 to vector<16x128xf32>
    %139 = arith.maximumf %137, %138 : vector<16x128xf32>
    %140 = arith.truncf %139 : vector<16x128xf32> to vector<16x128xbf16>
    %c0_131 = arith.constant 0 : index
    %c0_132 = arith.constant 0 : index
    %141 = vector.load %arg10[%c0_131, %c0_132] : memref<128x128xbf16, #tpu.memory_space<vmem>>, vector<128x128xbf16>
    %cst_133 = arith.constant dense<0.000000e+00> : vector<16x128xf32>
    %142 = tpu.matmul %140, %141, %cst_133 {dimension_numbers = #tpu.dot_dimension_numbers<[1], [0], [0], [1], [0, 0, 1, 1], [], []>} : vector<16x128xbf16>, vector<128x128xbf16>, vector<16x128xf32> -> vector<16x128xf32>
    %c0_134 = arith.constant 0 : index
    %c0_135 = arith.constant 0 : index
    %143 = vector.load %arg11[%c0_134, %c0_135] : memref<1x128xf32, #tpu.memory_space<vmem>>, vector<1x128xf32>
    %144 = vector.broadcast %143 : vector<1x128xf32> to vector<16x128xf32>
    %145 = arith.addf %142, %144 : vector<16x128xf32>
    %c0_136 = arith.constant 0 : index
    %c0_137 = arith.constant 0 : index
    %146 = vector.load %arg12[%c0_136, %c0_137] : memref<16x128xf32, #tpu.memory_space<vmem>>, vector<16x128xf32>
    tpu.vector_store %arg12[%c0_136, %c0_137], %145 {strides = array<i32>} : memref<16x128xf32, #tpu.memory_space<vmem>>, vector<16x128xf32>,
    return
  }
  func.func @transform_0(%arg0: i32) -> (i32, i32, i32, i32) {
    %c0_i32 = arith.constant 0 : i32
    %c0_i32_0 = arith.constant 0 : i32
    %c0_i32_1 = arith.constant 0 : i32
    %c0_i32_2 = arith.constant 0 : i32
    return %arg0, %c0_i32, %c0_i32_0, %c0_i32_1 : i32, i32, i32, i32
  }
  func.func @transform_1(%arg0: i32) -> (i32, i32, i32) {
    %c0_i32 = arith.constant 0 : i32
    %c0_i32_0 = arith.constant 0 : i32
    %c0_i32_1 = arith.constant 0 : i32
    %c0_i32_2 = arith.constant 0 : i32
    return %c0_i32, %c0_i32_0, %c0_i32_1 : i32, i32, i32
  }
  func.func @transform_2(%arg0: i32) -> (i32, i32) {
    %c0_i32 = arith.constant 0 : i32
    %c0_i32_0 = arith.constant 0 : i32
    %c0_i32_1 = arith.constant 0 : i32
    return %c0_i32, %c0_i32_0 : i32, i32
  }
  func.func @transform_3(%arg0: i32) -> (i32, i32, i32) {
    %c0_i32 = arith.constant 0 : i32
    %c0_i32_0 = arith.constant 0 : i32
    %c0_i32_1 = arith.constant 0 : i32
    %c0_i32_2 = arith.constant 0 : i32
    return %c0_i32, %c0_i32_0, %c0_i32_1 : i32, i32, i32
  }
  func.func @transform_4(%arg0: i32) -> (i32, i32) {
    %c0_i32 = arith.constant 0 : i32
    %c0_i32_0 = arith.constant 0 : i32
    %c0_i32_1 = arith.constant 0 : i32
    return %c0_i32, %c0_i32_0 : i32, i32
  }
  func.func @transform_5(%arg0: i32) -> (i32, i32, i32) {
    %c0_i32 = arith.constant 0 : i32
    %c0_i32_0 = arith.constant 0 : i32
    %c0_i32_1 = arith.constant 0 : i32
    %c0_i32_2 = arith.constant 0 : i32
    return %c0_i32, %c0_i32_0, %c0_i32_1 : i32, i32, i32
  }
  func.func @transform_6(%arg0: i32) -> (i32, i32) {
    %c0_i32 = arith.constant 0 : i32
    %c0_i32_0 = arith.constant 0 : i32
    %c0_i32_1 = arith.constant 0 : i32
    return %c0_i32, %c0_i32_0 : i32, i32
  }
  func.func @transform_7(%arg0: i32) -> (i32, i32, i32) {
    %c0_i32 = arith.constant 0 : i32
    %c0_i32_0 = arith.constant 0 : i32
    %c0_i32_1 = arith.constant 0 : i32
    %c0_i32_2 = arith.constant 0 : i32
    return %c0_i32, %c0_i32_0, %c0_i32_1 : i32, i32, i32
  }
  func.func @transform_8(%arg0: i32) -> (i32, i32) {
    %c0_i32 = arith.constant 0 : i32
    %c0_i32_0 = arith.constant 0 : i32
    %c0_i32_1 = arith.constant 0 : i32
    return %c0_i32, %c0_i32_0 : i32, i32
  }
  func.func @transform_9(%arg0: i32) -> (i32, i32) {
    %c0_i32 = arith.constant 0 : i32
    %c0_i32_0 = arith.constant 0 : i32
    %c0_i32_1 = arith.constant 0 : i32
    return %c0_i32, %c0_i32_0 : i32, i32
  }
  func.func @transform_10(%arg0: i32) -> (i32, i32) {
    %c0_i32 = arith.constant 0 : i32
    %c0_i32_0 = arith.constant 0 : i32
    %c0_i32_1 = arith.constant 0 : i32
    return %c0_i32, %c0_i32_0 : i32, i32
  }
  func.func @transform_11(%arg0: i32) -> (i32, i32) {
    %c0_i32 = arith.constant 0 : i32
    %c0_i32_0 = arith.constant 0 : i32
    return %arg0, %c0_i32 : i32, i32
  }
}

</mosaic_0001>

<bundles_post_ra>
// kernel: encoder_forward.1
= control target key start
LH: loop header
LB: loop body
LE: loop exit
PB: predicated region body
PF: predicated region fallthrough
CT: control target
= control target key end

     0   :  { %vm378_vm0 = vcmask 523264   ;;  %vm8017_vm1 = vmmov 0   ;;  %s10551_s1 = inlined_call_operand.vmem [shape: bf16[2,192,256], index: 1, kind: input, shape index: {}]   ;;  %s10552_s0 = inlined_call_operand.vmem [shape: bf16[1,8,128,192], index: 0, kind: input, shape index: {}]   ;;  %s10553_s3 = inlined_call_operand.vmem [shape: bf16[2,256,256], index: 3, kind: input, shape index: {}]   ;;  %s10554_s2 = inlined_call_operand.vmem [shape: f32[1,256], index: 2, kind: input, shape index: {}]   ;;  %s10555_s4 = inlined_call_operand.vmem [shape: f32[1,256], index: 4, kind: input, shape index: {}]   ;;  %s10556_s5 = inlined_call_operand.vmem [shape: bf16[3,256,256], index: 5, kind: input, shape index: {}]   ;;  %s10557_s7 = inlined_call_operand.vmem [shape: bf16[7,256,128], index: 7, kind: input, shape index: {}]   ;;  %s10558_s6 = inlined_call_operand.vmem [shape: f32[1,256], index: 6, kind: input, shape index: {}]   ;;  %s10559_s9 = inlined_call_operand.vmem [shape: bf16[128,128], index: 9, kind: input, shape index: {}]   ;;  %s10560_s8 = inlined_call_operand.vmem [shape: f32[1,128], index: 8, kind: input, shape index: {}]   ;;  %s10561_s10 = inlined_call_operand.vmem [shape: f32[1,128], index: 10, kind: input, shape index: {}]   ;;  %s10562_s11 = inlined_call_operand.vmem [shape: f32[16,128], index: 11, kind: output, shape index: {}]  }
   0x1   :  { %v8081_v0 = vld [vmem:[%s10551_s1 + $0xc4] ss:$8 sps:$4 sm:$0xff]   ;;  %v8086_v1 = vld [vmem:[%s10551_s1 + $0xc0] ss:$8 sps:$4 sm:$0xff]   ;;  %v8093_v2 = vld [vmem:[%s10551_s1 + $0xd4] ss:$8 sps:$4 sm:$0xff]  }
   0x2   :  { %403 = vmatprep.subr.bf16.mxu0 %v8081_v0  ;;  %1067 = vmatprep.subr.bf16.mxu1 %v8081_v0  ;;  %v8100_v3 = vld [vmem:[%s10551_s1 + $0xd0] ss:$8 sps:$4 sm:$0xff]   ;;  %v8107_v4 = vld [vmem:[%s10551_s1 + $0xe4] ss:$8 sps:$4 sm:$0xff]   ;;  %v8114_v5 = vld [vmem:[%s10551_s1 + $0xe0] ss:$8 sps:$4 sm:$0xff]  }
   0x3   :  { %404 = vmatpush1.bf16.msra.mxu0 %v8086_v1  ;;  %1068 = vmatpush1.bf16.msra.mxu1 %v8086_v1  ;;  %v8121_v6 = vld [vmem:[%s10551_s1 + $0xf4] ss:$8 sps:$4 sm:$0xff]   ;;  %v8128_v7 = vld [vmem:[%s10551_s1 + $0xf0] ss:$8 sps:$4 sm:$0xff]   ;;  %v8135_v8 = vld [vmem:[%s10551_s1 + $0x104] ss:$8 sps:$4 sm:$0xff]  }
   0x4   :  { %405 = vmatprep.subr.bf16.mxu0 %v8093_v2  ;;  %1069 = vmatprep.subr.bf16.mxu1 %v8093_v2  ;;  %v8142_v9 = vld [vmem:[%s10551_s1 + $0x100] ss:$8 sps:$4 sm:$0xff]   ;;  %v8149_v10 = vld [vmem:[%s10551_s1 + $0x114] ss:$8 sps:$4 sm:$0xff]   ;;  %v7342_v11 = vld [vmem:[%s10552_s0 + $0x84] ss:$8 sps:$4 sm:$0xff]  }
   0x5   :  { %v7345_v12 = vld [vmem:[%s10552_s0 + $0x184] ss:$8 sps:$4 sm:$0xff]   ;;  %v8162_v13 = vld [vmem:[%s10551_s1 + $0x110] ss:$8 sps:$4 sm:$0xff]   ;;  %6041 = vmatprep.mubr.msk.bf16.mxu0 %vm378_vm0, %v7342_v11  ;;  %v8178_v15 = vld [vmem:[%s10551_s1 + $0x120] ss:$8 sps:$4 sm:$0xff]  }
   0x6   :  { %v8169_v14 = vld [vmem:[%s10551_s1 + $0x124] ss:$8 sps:$4 sm:$0xff]   ;;  %6145 = vmatprep.mubr.msk.bf16.mxu1 %vm378_vm0, %v7345_v12  ;;  %v8185_v16 = vld [vmem:[%s10551_s1 + $0x134] ss:$8 sps:$4 sm:$0xff]   ;;  %v8192_v17 = vld [vmem:[%s10551_s1 + $0x130] ss:$8 sps:$4 sm:$0xff]  }
   0x7   :  { %406 = vmatpush1.bf16.msra.mxu0 %v8100_v3  ;;  %1070 = vmatpush1.bf16.msra.mxu1 %v8100_v3  ;;  %v8199_v18 = vld [vmem:[%s10551_s1 + $0x144] ss:$8 sps:$4 sm:$0xff]   ;;  %v8206_v19 = vld [vmem:[%s10551_s1 + $0x140] ss:$8 sps:$4 sm:$0xff]   ;;  %v8213_v20 = vld [vmem:[%s10551_s1 + $0x154] ss:$8 sps:$4 sm:$0xff]  }
   0x8   :  { %407 = vmatprep.subr.bf16.mxu0 %v8107_v4  ;;  %1071 = vmatprep.subr.bf16.mxu1 %v8107_v4  ;;  %v8220_v21 = vld [vmem:[%s10551_s1 + $0x150] ss:$8 sps:$4 sm:$0xff]   ;;  %v8227_v22 = vld [vmem:[%s10551_s1 + $0x164] ss:$8 sps:$4 sm:$0xff]   ;;  %v8234_v23 = vld [vmem:[%s10551_s1 + $0x160] ss:$8 sps:$4 sm:$0xff]  }
   0x9   :  { %v8241_v24 = vld [vmem:[%s10551_s1 + $0x174] ss:$8 sps:$4 sm:$0xff]   ;;  %v8248_v25 = vld [vmem:[%s10551_s1 + $0x170] ss:$8 sps:$4 sm:$0xff]   ;;  %v8255_v26 = vld [vmem:[%s10551_s1 + $0x4] ss:$8 sps:$4 sm:$0xff]  }
   0xa   :  { %v7340_v27 = vld [vmem:[%s10552_s0 + $0x80] ss:$8 sps:$4 sm:$0xff]   ;;  %v8273_v30 = vld [vmem:[%s10551_s1 + $0x14] ss:$8 sps:$4 sm:$0xff]   ;;  %v8288_v33 = vld [vmem:[%s10551_s1 + $0x10] ss:$8 sps:$4 sm:$0xff]  }
   0xb   :  { %408 = vmatpush1.bf16.msra.mxu0 %v8114_v5  ;;  %1072 = vmatpush1.bf16.msra.mxu1 %v8114_v5  ;;  %v7343_v28 = vld [vmem:[%s10552_s0 + $0x180] ss:$8 sps:$4 sm:$0xff]   ;;  %v7351_v31 = vld [vmem:[%s10552_s0 + $0x94] ss:$8 sps:$4 sm:$0xff]   ;;  %v8295_v34 = vld [vmem:[%s10551_s1 + $0x24] ss:$8 sps:$4 sm:$0xff]  }
   0xc   :  { %409 = vmatprep.subr.bf16.mxu0 %v8121_v6  ;;  %1073 = vmatprep.subr.bf16.mxu1 %v8121_v6  ;;  %v8266_v29 = vld [vmem:[%s10551_s1] ss:$8 sps:$4 sm:$0xff]   ;;  %v7353_v32 = vld [vmem:[%s10552_s0 + $0x194] ss:$8 sps:$4 sm:$0xff]   ;;  %v7356_v35 = vld [vmem:[%s10552_s0 + $0x90] ss:$8 sps:$4 sm:$0xff]  }
   0xd   :  { %v7357_v36 = vld [vmem:[%s10552_s0 + $0x190] ss:$8 sps:$4 sm:$0xff]   ;;  %v7360_v37 = vld [vmem:[%s10551_s1 + $0x20] ss:$8 sps:$4 sm:$0xff]   ;;  %v7361_v38 = vld [vmem:[%s10552_s0 + $0xa4] ss:$8 sps:$4 sm:$0xff]  }
   0xe   :  { %v7363_v39 = vld [vmem:[%s10552_s0 + $0x1a4] ss:$8 sps:$4 sm:$0xff]   ;;  %v7367_v40 = vld [vmem:[%s10551_s1 + $0x34] ss:$8 sps:$4 sm:$0xff]   ;;  %v7369_v41 = vld [vmem:[%s10551_s1 + $0x30] ss:$8 sps:$4 sm:$0xff]  }
   0xf   :  { %410 = vmatpush1.bf16.msra.mxu0 %v8128_v7  ;;  %1074 = vmatpush1.bf16.msra.mxu1 %v8128_v7  ;;  %v7370_v42 = vld [vmem:[%s10551_s1 + $0x44] ss:$8 sps:$4 sm:$0xff]   ;;  %v7365_v43 = vld [vmem:[%s10552_s0 + $0xa0] ss:$8 sps:$4 sm:$0xff]   ;;  %v7372_v45 = vld [vmem:[%s10552_s0 + $0xb4] ss:$8 sps:$4 sm:$0xff]  }
  0x10   :  { %411 = vmatprep.subr.bf16.mxu0 %v8135_v8  ;;  %1075 = vmatprep.subr.bf16.mxu1 %v8135_v8  ;;  %v7366_v44 = vld [vmem:[%s10552_s0 + $0x1a0] ss:$8 sps:$4 sm:$0xff]   ;;  %v7374_v46 = vld [vmem:[%s10552_s0 + $0x1b4] ss:$8 sps:$4 sm:$0xff]   ;;  %v7377_v49 = vld [vmem:[%s10552_s0 + $0xb0] ss:$8 sps:$4 sm:$0xff]  }
  0x11   :  { %v7376_v47 = vld [vmem:[%s10551_s1 + $0x40] ss:$8 sps:$4 sm:$0xff]   ;;  %v7379_v48 = vld [vmem:[%s10551_s1 + $0x54] ss:$8 sps:$4 sm:$0xff]   ;;  %v7381_v50 = vld [vmem:[%s10551_s1 + $0x50] ss:$8 sps:$4 sm:$0xff]  }
  0x12   :  { %v7388_v51 = vld [vmem:[%s10551_s1 + $0x64] ss:$8 sps:$4 sm:$0xff]   ;;  %v7378_v52 = vld [vmem:[%s10552_s0 + $0x1b0] ss:$8 sps:$4 sm:$0xff]   ;;  %v7390_v55 = vld [vmem:[%s10551_s1 + $0x60] ss:$8 sps:$4 sm:$0xff]  }
  0x13   :  { %412 = vmatpush1.bf16.msra.mxu0 %v8142_v9  ;;  %1076 = vmatpush1.bf16.msra.mxu1 %v8142_v9  ;;  %v7382_v53 = vld [vmem:[%s10552_s0 + $0xc4] ss:$8 sps:$4 sm:$0xff]   ;;  %v7391_v56 = vld [vmem:[%s10551_s1 + $0x74] ss:$8 sps:$4 sm:$0xff]   ;;  %v7397_v57 = vld [vmem:[%s10551_s1 + $0x70] ss:$8 sps:$4 sm:$0xff]  }
  0x14   :  { %413 = vmatprep.subr.bf16.mxu0 %v8149_v10  ;;  %1077 = vmatprep.subr.bf16.mxu1 %v8149_v10  ;;  %v7384_v54 = vld [vmem:[%s10552_s0 + $0x1c4] ss:$8 sps:$4 sm:$0xff]   ;;  %v7386_v59 = vld [vmem:[%s10552_s0 + $0xc0] ss:$8 sps:$4 sm:$0xff]   ;;  %v7393_v61 = vld [vmem:[%s10552_s0 + $0xd4] ss:$8 sps:$4 sm:$0xff]  }
  0x15   :  { %v7400_v58 = vld [vmem:[%s10551_s1 + $0x84] ss:$8 sps:$4 sm:$0xff]   ;;  %v7387_v60 = vld [vmem:[%s10552_s0 + $0x1c0] ss:$8 sps:$4 sm:$0xff]   ;;  %v7395_v62 = vld [vmem:[%s10552_s0 + $0x1d4] ss:$8 sps:$4 sm:$0xff]  }
  0x16   :  { %v7402_v63 = vld [vmem:[%s10551_s1 + $0x80] ss:$8 sps:$4 sm:$0xff]   ;;  %v7409_v11 = vld [vmem:[%s10551_s1 + $0x94] ss:$8 sps:$4 sm:$0xff]   ;;  %v7411_v12 = vld [vmem:[%s10551_s1 + $0x90] ss:$8 sps:$4 sm:$0xff]  }
  0x17   :  { %414 = vmatpush1.bf16.msra.mxu0 %v8162_v13  ;;  %1078 = vmatpush1.bf16.msra.mxu1 %v8162_v13 }
  0x18   :  { %415 = vmatprep.subr.bf16.mxu0 %v8169_v14  ;;  %1079 = vmatprep.subr.bf16.mxu1 %v8169_v14 }
  0x1b   :  { %416 = vmatpush1.bf16.msra.mxu0 %v8178_v15  ;;  %1080 = vmatpush1.bf16.msra.mxu1 %v8178_v15 }
  0x1c   :  { %417 = vmatprep.subr.bf16.mxu0 %v8185_v16  ;;  %1081 = vmatprep.subr.bf16.mxu1 %v8185_v16 }
  0x1f   :  { %418 = vmatpush1.bf16.msra.mxu0 %v8192_v17  ;;  %1082 = vmatpush1.bf16.msra.mxu1 %v8192_v17 }
  0x20   :  { %419 = vmatprep.subr.bf16.mxu0 %v8199_v18  ;;  %1083 = vmatprep.subr.bf16.mxu1 %v8199_v18 }
  0x23   :  { %420 = vmatpush1.bf16.msra.mxu0 %v8206_v19  ;;  %1084 = vmatpush1.bf16.msra.mxu1 %v8206_v19 }
  0x24   :  { %421 = vmatprep.subr.bf16.mxu0 %v8213_v20  ;;  %1085 = vmatprep.subr.bf16.mxu1 %v8213_v20 }
  0x27   :  { %422 = vmatpush1.bf16.msra.mxu0 %v8220_v21  ;;  %1086 = vmatpush1.bf16.msra.mxu1 %v8220_v21 }
  0x28   :  { %423 = vmatprep.subr.bf16.mxu0 %v8227_v22  ;;  %1087 = vmatprep.subr.bf16.mxu1 %v8227_v22 }
  0x2b   :  { %424 = vmatpush1.bf16.msra.mxu0 %v8234_v23  ;;  %1088 = vmatpush1.bf16.msra.mxu1 %v8234_v23 }
  0x2c   :  { %425 = vmatprep.subr.bf16.mxu0 %v8241_v24  ;;  %1089 = vmatprep.subr.bf16.mxu1 %v8241_v24 }
  0x2f   :  { %426 = vmatpush1.bf16.msra.mxu0 %v8248_v25  ;;  %1090 = vmatpush1.bf16.msra.mxu1 %v8248_v25 }
  0x30   :  { %1276 = vmatprep.subr.bf16.mxu1 %v8255_v26  ;;  %732 = vmatprep.subr.bf16.mxu0 %v8255_v26 }
  0x32   :  { %436 = vmatmul.mubr.bf16.vlgmr.msra.gmra.mrb[0].mxu0 %v7340_v27  ;;  %1100 = vmatmul.mubr.bf16.vlgmr.msra.gmra.mrb[0].mxu1 %v7343_v28  ;;  %v7412_v27 = vld [vmem:[%s10551_s1 + $0xa4] ss:$8 sps:$4 sm:$0xff]   ;;  %v7398_v28 = vld [vmem:[%s10552_s0 + $0xd0] ss:$8 sps:$4 sm:$0xff]  }
  0x33   :  { %1277 = vmatpush1.bf16.msra.mxu1 %v8266_v29  ;;  %6042 = vmatprep.mubr.msk.bf16.mxu0 %vm378_vm0, %v7351_v31  ;;  %v7399_v31 = vld [vmem:[%s10552_s0 + $0x1d0] ss:$8 sps:$4 sm:$0xff]  }
  0x34   :  { %1278 = vmatprep.subr.bf16.mxu1 %v8273_v30  ;;  %6146 = vmatprep.mubr.msk.bf16.mxu1 %vm378_vm0, %v7353_v32  ;;  %v7403_v32 = vld [vmem:[%s10552_s0 + $0xe4] ss:$8 sps:$4 sm:$0xff]  }
  0x35   :  { %733 = vmatpush1.bf16.msra.mxu0 %v8266_v29 }
  0x36   :  { %734 = vmatprep.subr.bf16.mxu0 %v8273_v30 }
  0x37   :  { %1279 = vmatpush1.bf16.msra.mxu1 %v8288_v33 }
  0x38   :  { %1280 = vmatprep.subr.bf16.mxu1 %v8295_v34 }
  0x39   :  { %735 = vmatpush1.bf16.msra.mxu0 %v8288_v33 }
  0x3a   :  { %446 = vmatmul.mubr.bf16.gmra.mrb[4].mxu0 %v7356_v35  ;;  %1110 = vmatmul.mubr.bf16.gmra.mrb[4].mxu1 %v7357_v36  ;;  %v7405_v35 = vld [vmem:[%s10552_s0 + $0x1e4] ss:$8 sps:$4 sm:$0xff]   ;;  %v7418_v36 = vld [vmem:[%s10551_s1 + $0xa0] ss:$8 sps:$4 sm:$0xff]  }
  0x3b   :  { %1281 = vmatpush1.bf16.msra.mxu1 %v7360_v37  ;;  %6043 = vmatprep.mubr.msk.bf16.mxu0 %vm378_vm0, %v7361_v38  ;;  %v7407_v38 = vld [vmem:[%s10552_s0 + $0xe0] ss:$8 sps:$4 sm:$0xff]  }
  0x3c   :  { %6147 = vmatprep.mubr.msk.bf16.mxu1 %vm378_vm0, %v7363_v39  ;;  %1282 = vmatprep.subr.bf16.mxu1 %v7367_v40  ;;  %v7408_v39 = vld [vmem:[%s10552_s0 + $0x1e0] ss:$8 sps:$4 sm:$0xff]  }
  0x3d   :  { %736 = vmatprep.subr.bf16.mxu0 %v8295_v34 }
  0x3e   :  { %737 = vmatpush1.bf16.msra.mxu0 %v7360_v37  ;;  %v7421_v37 = vld [vmem:[%s10551_s1 + $0xb4] ss:$8 sps:$4 sm:$0xff]  }
  0x3f   :  { %1283 = vmatpush1.bf16.msra.mxu1 %v7369_v41  ;;  %738 = vmatprep.subr.bf16.mxu0 %v7367_v40  ;;  %v7423_v40 = vld [vmem:[%s10551_s1 + $0xb0] ss:$8 sps:$4 sm:$0xff]  }
  0x40   :  { %1284 = vmatprep.subr.bf16.mxu1 %v7370_v42 }
  0x42   :  { %456 = vmatmul.mubr.bf16.gmra.mrb[8].mxu0 %v7365_v43  ;;  %1120 = vmatmul.mubr.bf16.gmra.mrb[8].mxu1 %v7366_v44  ;;  %v7474_v43 = vld [vmem:[%s10553_s3 + $0x104] ss:$8 sps:$4 sm:$0xff]   ;;  %v7419_v44 = vld [vmem:[%s10552_s0 + $0xf0] ss:$8 sps:$4 sm:$0xff]  }
  0x43   :  { %6044 = vmatprep.mubr.msk.bf16.mxu0 %vm378_vm0, %v7372_v45  ;;  %6148 = vmatprep.mubr.msk.bf16.mxu1 %vm378_vm0, %v7374_v46  ;;  %v7420_v45 = vld [vmem:[%s10552_s0 + $0x1f0] ss:$8 sps:$4 sm:$0xff]   ;;  %v7426_v46 = vld [vmem:[%s10552_s0 + $0x4] ss:$8 sps:$4 sm:$0xff]  }
  0x44   :  { %1285 = vmatpush1.bf16.msra.mxu1 %v7376_v47  ;;  %739 = vmatpush1.bf16.msra.mxu0 %v7369_v41  ;;  %v7414_v41 = vld [vmem:[%s10552_s0 + $0xf4] ss:$8 sps:$4 sm:$0xff]  }
  0x45   :  { %1286 = vmatprep.subr.bf16.mxu1 %v7379_v48  ;;  %740 = vmatprep.subr.bf16.mxu0 %v7370_v42  ;;  %v7416_v42 = vld [vmem:[%s10552_s0 + $0x1f4] ss:$8 sps:$4 sm:$0xff]  }
  0x48   :  { %1287 = vmatpush1.bf16.msra.mxu1 %v7381_v50  ;;  %741 = vmatpush1.bf16.msra.mxu0 %v7376_v47  ;;  %v7424_v47 = vld [vmem:[%s10552_s0] ss:$8 sps:$4 sm:$0xff]  }
  0x49   :  { %1288 = vmatprep.subr.bf16.mxu1 %v7388_v51  ;;  %742 = vmatprep.subr.bf16.mxu0 %v7379_v48  ;;  %v7427_v48 = vld [vmem:[%s10552_s0 + $0x100] ss:$8 sps:$4 sm:$0xff]  }
  0x4a   :  { %466 = vmatmul.mubr.bf16.gmra.mrb[12].mxu0 %v7377_v49  ;;  %1130 = vmatmul.mubr.bf16.gmra.mrb[12].mxu1 %v7378_v52  ;;  %v7430_v49 = vld [vmem:[%s10552_s0 + $0x14] ss:$8 sps:$4 sm:$0xff]  }
  0x4b   :  { %6045 = vmatprep.mubr.msk.bf16.mxu0 %vm378_vm0, %v7382_v53  ;;  %6149 = vmatprep.mubr.msk.bf16.mxu1 %vm378_vm0, %v7384_v54  ;;  %v7477_v52 = vld [vmem:[%s10553_s3 + $0x114] ss:$8 sps:$4 sm:$0xff]   ;;  %v7475_v53 = vld [vmem:[%s10553_s3 + $0x110] ss:$8 sps:$4 sm:$0xff]   ;;  %v7480_v54 = vld [vmem:[%s10553_s3 + $0x124] ss:$8 sps:$4 sm:$0xff]  }
  0x4c   :  { %1289 = vmatpush1.bf16.msra.mxu1 %v7390_v55  ;;  %743 = vmatpush1.bf16.msra.mxu0 %v7381_v50  ;;  %v7432_v50 = vld [vmem:[%s10552_s0 + $0x114] ss:$8 sps:$4 sm:$0xff]  }
  0x4d   :  { %1290 = vmatprep.subr.bf16.mxu1 %v7391_v56  ;;  %744 = vmatprep.subr.bf16.mxu0 %v7388_v51  ;;  %v7472_v51 = vld [vmem:[%s10553_s3 + $0x100] ss:$8 sps:$4 sm:$0xff]  }
  0x50   :  { %1291 = vmatpush1.bf16.msra.mxu1 %v7397_v57  ;;  %745 = vmatpush1.bf16.msra.mxu0 %v7390_v55  ;;  %v7434_v55 = vld [vmem:[%s10552_s0 + $0x10] ss:$8 sps:$4 sm:$0xff]  }
  0x51   :  { %1292 = vmatprep.subr.bf16.mxu1 %v7400_v58  ;;  %746 = vmatprep.subr.bf16.mxu0 %v7391_v56  ;;  %v7435_v56 = vld [vmem:[%s10552_s0 + $0x110] ss:$8 sps:$4 sm:$0xff]  }
  0x52   :  { %476 = vmatmul.mubr.bf16.gmra.mrb[16].mxu0 %v7386_v59  ;;  %1140 = vmatmul.mubr.bf16.gmra.mrb[16].mxu1 %v7387_v60  ;;  %v7478_v59 = vld [vmem:[%s10553_s3 + $0x120] ss:$8 sps:$4 sm:$0xff]   ;;  %v7483_v60 = vld [vmem:[%s10553_s3 + $0x134] ss:$8 sps:$4 sm:$0xff]  }
  0x53   :  { %6046 = vmatprep.mubr.msk.bf16.mxu0 %vm378_vm0, %v7393_v61  ;;  %6150 = vmatprep.mubr.msk.bf16.mxu1 %vm378_vm0, %v7395_v62  ;;  %v7442_v61 = vld [vmem:[%s10552_s0 + $0x34] ss:$8 sps:$4 sm:$0xff]  }
  0x54   :  { %1293 = vmatpush1.bf16.msra.mxu1 %v7402_v63  ;;  %747 = vmatpush1.bf16.msra.mxu0 %v7397_v57  ;;  %v7436_v57 = vld [vmem:[%s10552_s0 + $0x24] ss:$8 sps:$4 sm:$0xff]   ;;  %v7444_v62 = vld [vmem:[%s10552_s0 + $0x134] ss:$8 sps:$4 sm:$0xff]  }
  0x55   :  { %748 = vmatprep.subr.bf16.mxu0 %v7400_v58  ;;  %1294 = vmatprep.subr.bf16.mxu1 %v7409_v11  ;;  %v7438_v58 = vld [vmem:[%s10552_s0 + $0x124] ss:$8 sps:$4 sm:$0xff]  }
  0x58   :  { %749 = vmatpush1.bf16.msra.mxu0 %v7402_v63  ;;  %1295 = vmatpush1.bf16.msra.mxu1 %v7411_v12  ;;  %v7446_v63 = vld [vmem:[%s10552_s0 + $0x30] ss:$8 sps:$4 sm:$0xff]  }
  0x59   :  { %750 = vmatprep.subr.bf16.mxu0 %v7409_v11  ;;  %1296 = vmatprep.subr.bf16.mxu1 %v7412_v27  ;;  %v7447_v11 = vld [vmem:[%s10552_s0 + $0x130] ss:$8 sps:$4 sm:$0xff]  }
  0x5a   :  { %486 = vmatmul.mubr.bf16.gmra.mrb[20].mxu0 %v7398_v28  ;;  %1150 = vmatmul.mubr.bf16.gmra.mrb[20].mxu1 %v7399_v31  ;;  %v7452_v28 = vld [vmem:[%s10552_s0 + $0x40] ss:$8 sps:$4 sm:$0xff]  }
  0x5b   :  { %6047 = vmatprep.mubr.msk.bf16.mxu0 %vm378_vm0, %v7403_v32  ;;  %6151 = vmatprep.mubr.msk.bf16.mxu1 %vm378_vm0, %v7405_v35  ;;  %v7453_v31 = vld [vmem:[%s10552_s0 + $0x140] ss:$8 sps:$4 sm:$0xff]   ;;  %v7456_v32 = vld [vmem:[%s10552_s0 + $0x154] ss:$8 sps:$4 sm:$0xff]  }
  0x5c   :  { %751 = vmatpush1.bf16.msra.mxu0 %v7411_v12  ;;  %1297 = vmatpush1.bf16.msra.mxu1 %v7418_v36  ;;  %v7450_v12 = vld [vmem:[%s10552_s0 + $0x144] ss:$8 sps:$4 sm:$0xff]   ;;  %v8625_v35 = vld [vmem:[%s10553_s3 + $0x194] ss:$8 sps:$4 sm:$0xff]  }
  0x5d   :  { %752 = vmatprep.subr.bf16.mxu0 %v7412_v27  ;;  %1298 = vmatprep.subr.bf16.mxu1 %v7421_v37  ;;  %v8583_v27 = vld [vmem:[%s10553_s3 + $0x174] ss:$8 sps:$4 sm:$0xff]  }
  0x60   :  { %753 = vmatpush1.bf16.msra.mxu0 %v7418_v36  ;;  %1299 = vmatpush1.bf16.msra.mxu1 %v7423_v40  ;;  %v7458_v36 = vld [vmem:[%s10552_s0 + $0x50] ss:$8 sps:$4 sm:$0xff]  }
  0x61   :  { %754 = vmatprep.subr.bf16.mxu0 %v7421_v37  ;;  %2253 = vmatprep.subr.bf16.mxu1 %v8081_v0  ;;  %v7429_v0 = vld [vmem:[%s10552_s0 + $0x104] ss:$8 sps:$4 sm:$0xff]   ;;  %v7459_v37 = vld [vmem:[%s10552_s0 + $0x150] ss:$8 sps:$4 sm:$0xff]  }
  0x62   :  { %496 = vmatmul.mubr.bf16.gmra.mrb[24].mxu0 %v7407_v38  ;;  %1160 = vmatmul.mubr.bf16.gmra.mrb[24].mxu1 %v7408_v39  ;;  %v7462_v38 = vld [vmem:[%s10552_s0 + $0x164] ss:$8 sps:$4 sm:$0xff]   ;;  %v8667_v39 = vld [vmem:[%s10553_s3 + $0x1b4] ss:$8 sps:$4 sm:$0xff]  }
  0x63   :  { %6048 = vmatprep.mubr.msk.bf16.mxu0 %vm378_vm0, %v7414_v41  ;;  %6152 = vmatprep.mubr.msk.bf16.mxu1 %vm378_vm0, %v7416_v42  ;;  %v7465_v41 = vld [vmem:[%s10552_s0 + $0x160] ss:$8 sps:$4 sm:$0xff]   ;;  %v7468_v42 = vld [vmem:[%s10552_s0 + $0x174] ss:$8 sps:$4 sm:$0xff]  }
  0x64   :  { %755 = vmatpush1.bf16.msra.mxu0 %v7423_v40  ;;  %v7464_v40 = vld [vmem:[%s10552_s0 + $0x60] ss:$8 sps:$4 sm:$0xff]  }
  0x65   :  { %1629 = vmatprep.subr.bf16.mxu0 %v7474_v43  ;;  %v8709_v43 = vld [vmem:[%s10553_s3 + $0x1d4] ss:$8 sps:$4 sm:$0xff]  }
  0x6a   :  { %506 = vmatmul.mubr.bf16.gmra.mrb[28].mxu0 %v7419_v44  ;;  %1170 = vmatmul.mubr.bf16.gmra.mrb[28].mxu1 %v7420_v45  ;;  %v7470_v44 = vld [vmem:[%s10552_s0 + $0x70] ss:$8 sps:$4 sm:$0xff]   ;;  %v8731_v45 = vld [vmem:[%s10553_s3 + $0x1e4] ss:$8 sps:$4 sm:$0xff]  }
  0x6b   :  { %6089 = vmatprep.mubr.msk.bf16.mxu0 %vm378_vm0, %v7426_v46  ;;  %6169 = vmatprep.mubr.msk.bf16.mxu1 %vm378_vm0, %v7429_v0  ;;  %v8736_v46 = vld [vmem:[%s10553_s3 + $0x1e0] ss:$8 sps:$4 sm:$0xff]   ;;  %v8743_v0 = vld [vmem:[%s10553_s3 + $0x1f4] ss:$8 sps:$4 sm:$0xff]  }
  0x72   :  { %765 = vmatmul.mubr.bf16.vlgmr.msra.gmra.mrb[0].mxu0 %v7424_v47  ;;  %1309 = vmatmul.mubr.bf16.vlgmr.msra.gmra.mrb[0].mxu1 %v7427_v48  ;;  %v8748_v47 = vld [vmem:[%s10553_s3 + $0x1f0] ss:$8 sps:$4 sm:$0xff]   ;;  %v8755_v48 = vld [vmem:[%s10553_s3 + $0x4] ss:$8 sps:$4 sm:$0xff]  }
  0x73   :  { %6090 = vmatprep.mubr.msk.bf16.mxu0 %vm378_vm0, %v7430_v49  ;;  %6170 = vmatprep.mubr.msk.bf16.mxu1 %vm378_vm0, %v7432_v50  ;;  %v847_v49 = vlaneseq }
  0x74   :  { %1630 = vmatpush1.bf16.msra.mxu0 %v7472_v51  ;;  %2254 = vmatpush1.bf16.msra.mxu1 %v8086_v1  ;;  %v7481_v1 = vld [vmem:[%s10553_s3 + $0x130] ss:$8 sps:$4 sm:$0xff]  }
  0x75   :  { %1631 = vmatprep.subr.bf16.mxu0 %v7477_v52  ;;  %2255 = vmatprep.subr.bf16.mxu1 %v8093_v2  ;;  %v7486_v2 = vld [vmem:[%s10553_s3 + $0x144] ss:$8 sps:$4 sm:$0xff]   ;;  %v848_v50 = vshrl.u32 %v847_v49, 7  ;;  %v845_v52 = vld [vmem:[%s10554_s2] sm:$0x3] }
  0x77   :  { %v8758_v51 = vsub.s32 0, %v848_v50 }
  0x78   :  { %1632 = vmatpush1.bf16.msra.mxu0 %v7475_v53  ;;  %2256 = vmatpush1.bf16.msra.mxu1 %v8100_v3  ;;  %v7440_v3 = vld [vmem:[%s10552_s0 + $0x20] ss:$8 sps:$4 sm:$0xff]   ;;  %v8763_v53 = vsub.s32 1, %v848_v50 }
  0x79   :  { %1633 = vmatprep.subr.bf16.mxu0 %v7480_v54  ;;  %2257 = vmatprep.subr.bf16.mxu1 %v8107_v4  ;;  %v7441_v4 = vld [vmem:[%s10552_s0 + $0x120] ss:$8 sps:$4 sm:$0xff]   ;;  %10584 = vst [vmem:[#allocation5_spill] sm:$0xff] %v8758_v51  ;;  %v8766_v54 = vrot.slane %v845_v52, %v8758_v51 }
  0x7a   :  { %775 = vmatmul.mubr.bf16.gmra.mrb[4].mxu0 %v7434_v55  ;;  %1319 = vmatmul.mubr.bf16.gmra.mrb[4].mxu1 %v7435_v56  ;;  %10585 = vst [vmem:[#allocation6_spill] sm:$0xff] %v8763_v53  ;;  %v8769_v55 = vrot.slane %v845_v52, %v8763_v53 }
  0x7b   :  { %6091 = vmatprep.mubr.msk.bf16.mxu0 %vm378_vm0, %v7436_v57  ;;  %6171 = vmatprep.mubr.msk.bf16.mxu1 %vm378_vm0, %v7438_v58 }
  0x7c   :  { %1634 = vmatpush1.bf16.msra.mxu0 %v7478_v59  ;;  %2258 = vmatpush1.bf16.msra.mxu1 %v8114_v5  ;;  %v8535_v5 = vld [vmem:[%s10553_s3 + $0x140] ss:$8 sps:$4 sm:$0xff]  }
  0x7d   :  { %1635 = vmatprep.subr.bf16.mxu0 %v7483_v60  ;;  %2259 = vmatprep.subr.bf16.mxu1 %v8121_v6  ;;  %v8541_v6 = vld [vmem:[%s10553_s3 + $0x154] ss:$8 sps:$4 sm:$0xff]  }
  0x80   :  { %1636 = vmatpush1.bf16.msra.mxu0 %v7481_v1  ;;  %2260 = vmatpush1.bf16.msra.mxu1 %v8128_v7  ;;  %v8550_v7 = vld [vmem:[%s10553_s3 + $0x150] ss:$8 sps:$4 sm:$0xff]  }
  0x81   :  { %1637 = vmatprep.subr.bf16.mxu0 %v7486_v2  ;;  %2261 = vmatprep.subr.bf16.mxu1 %v8135_v8  ;;  %v8557_v8 = vld [vmem:[%s10553_s3 + $0x164] ss:$8 sps:$4 sm:$0xff]  }
  0x82   :  { %785 = vmatmul.mubr.bf16.gmra.mrb[8].mxu0 %v7440_v3  ;;  %1329 = vmatmul.mubr.bf16.gmra.mrb[8].mxu1 %v7441_v4 }
  0x83   :  { %6092 = vmatprep.mubr.msk.bf16.mxu0 %vm378_vm0, %v7442_v61  ;;  %6172 = vmatprep.mubr.msk.bf16.mxu1 %vm378_vm0, %v7444_v62 }
  0x84   :  { %1638 = vmatpush1.bf16.msra.mxu0 %v8535_v5  ;;  %2262 = vmatpush1.bf16.msra.mxu1 %v8142_v9  ;;  %v7448_v9 = vld [vmem:[%s10552_s0 + $0x44] ss:$8 sps:$4 sm:$0xff]  }
  0x85   :  { %1639 = vmatprep.subr.bf16.mxu0 %v8541_v6  ;;  %2263 = vmatprep.subr.bf16.mxu1 %v8149_v10  ;;  %v8576_v10 = vld [vmem:[%s10553_s3 + $0x160] ss:$8 sps:$4 sm:$0xff]  }
  0x88   :  { %1640 = vmatpush1.bf16.msra.mxu0 %v8550_v7  ;;  %2264 = vmatpush1.bf16.msra.mxu1 %v8162_v13  ;;  %v8592_v13 = vld [vmem:[%s10553_s3 + $0x170] ss:$8 sps:$4 sm:$0xff]  }
  0x89   :  { %1641 = vmatprep.subr.bf16.mxu0 %v8557_v8  ;;  %2265 = vmatprep.subr.bf16.mxu1 %v8169_v14  ;;  %v8599_v14 = vld [vmem:[%s10553_s3 + $0x184] ss:$8 sps:$4 sm:$0xff]  }
  0x8a   :  { %795 = vmatmul.mubr.bf16.gmra.mrb[12].mxu0 %v7446_v63  ;;  %1339 = vmatmul.mubr.bf16.gmra.mrb[12].mxu1 %v7447_v11 }
  0x8b   :  { %6093 = vmatprep.mubr.msk.bf16.mxu0 %vm378_vm0, %v7448_v9  ;;  %6173 = vmatprep.mubr.msk.bf16.mxu1 %vm378_vm0, %v7450_v12  ;;  %v7568_v12 = vld [vmem:[%s10552_s0 + $0x280] ss:$8 sps:$4 sm:$0xff]  }
  0x8c   :  { %1642 = vmatpush1.bf16.msra.mxu0 %v8576_v10  ;;  %2266 = vmatpush1.bf16.msra.mxu1 %v8178_v15  ;;  %v7454_v15 = vld [vmem:[%s10552_s0 + $0x54] ss:$8 sps:$4 sm:$0xff]  }
  0x8d   :  { %1643 = vmatprep.subr.bf16.mxu0 %v8583_v27  ;;  %2267 = vmatprep.subr.bf16.mxu1 %v8185_v16  ;;  %v8618_v16 = vld [vmem:[%s10553_s3 + $0x180] ss:$8 sps:$4 sm:$0xff]  }
  0x90   :  { %1644 = vmatpush1.bf16.msra.mxu0 %v8592_v13  ;;  %2268 = vmatpush1.bf16.msra.mxu1 %v8192_v17  ;;  %v8634_v17 = vld [vmem:[%s10553_s3 + $0x190] ss:$8 sps:$4 sm:$0xff]  }
  0x91   :  { %1645 = vmatprep.subr.bf16.mxu0 %v8599_v14  ;;  %2269 = vmatprep.subr.bf16.mxu1 %v8199_v18  ;;  %v8641_v18 = vld [vmem:[%s10553_s3 + $0x1a4] ss:$8 sps:$4 sm:$0xff]  }
  0x92   :  { %805 = vmatmul.mubr.bf16.gmra.mrb[16].mxu0 %v7452_v28  ;;  %1349 = vmatmul.mubr.bf16.gmra.mrb[16].mxu1 %v7453_v31 }
  0x93   :  { %6094 = vmatprep.mubr.msk.bf16.mxu0 %vm378_vm0, %v7454_v15  ;;  %6174 = vmatprep.mubr.msk.bf16.mxu1 %vm378_vm0, %v7456_v32  ;;  %v7570_v15 = vld [vmem:[%s10552_s0 + $0x284] ss:$8 sps:$4 sm:$0xff]  }
  0x94   :  { %1646 = vmatpush1.bf16.msra.mxu0 %v8618_v16  ;;  %2270 = vmatpush1.bf16.msra.mxu1 %v8206_v19  ;;  %v7460_v19 = vld [vmem:[%s10552_s0 + $0x64] ss:$8 sps:$4 sm:$0xff]  }
  0x95   :  { %1647 = vmatprep.subr.bf16.mxu0 %v8625_v35  ;;  %2271 = vmatprep.subr.bf16.mxu1 %v8213_v20  ;;  %v8660_v20 = vld [vmem:[%s10553_s3 + $0x1a0] ss:$8 sps:$4 sm:$0xff]  }
  0x98   :  { %1648 = vmatpush1.bf16.msra.mxu0 %v8634_v17  ;;  %2272 = vmatpush1.bf16.msra.mxu1 %v8220_v21  ;;  %v8676_v21 = vld [vmem:[%s10553_s3 + $0x1b0] ss:$8 sps:$4 sm:$0xff]  }
  0x99   :  { %1649 = vmatprep.subr.bf16.mxu0 %v8641_v18  ;;  %2273 = vmatprep.subr.bf16.mxu1 %v8227_v22  ;;  %v8683_v22 = vld [vmem:[%s10553_s3 + $0x1c4] ss:$8 sps:$4 sm:$0xff]  }
  0x9a   :  { %815 = vmatmul.mubr.bf16.gmra.mrb[20].mxu0 %v7458_v36  ;;  %1359 = vmatmul.mubr.bf16.gmra.mrb[20].mxu1 %v7459_v37 }
  0x9b   :  { %6095 = vmatprep.mubr.msk.bf16.mxu0 %vm378_vm0, %v7460_v19  ;;  %6175 = vmatprep.mubr.msk.bf16.mxu1 %vm378_vm0, %v7462_v38 }
  0x9c   :  { %1650 = vmatpush1.bf16.msra.mxu0 %v8660_v20  ;;  %2274 = vmatpush1.bf16.msra.mxu1 %v8234_v23  ;;  %v7466_v23 = vld [vmem:[%s10552_s0 + $0x74] ss:$8 sps:$4 sm:$0xff]  }
  0x9d   :  { %1651 = vmatprep.subr.bf16.mxu0 %v8667_v39  ;;  %2275 = vmatprep.subr.bf16.mxu1 %v8241_v24  ;;  %v8702_v24 = vld [vmem:[%s10553_s3 + $0x1c0] ss:$8 sps:$4 sm:$0xff]  }
  0xa0   :  { %1652 = vmatpush1.bf16.msra.mxu0 %v8676_v21  ;;  %2276 = vmatpush1.bf16.msra.mxu1 %v8248_v25  ;;  %v8718_v25 = vld [vmem:[%s10553_s3 + $0x1d0] ss:$8 sps:$4 sm:$0xff]  }
  0xa1   :  { %1653 = vmatprep.subr.bf16.mxu0 %v8683_v22  ;;  %2462 = vmatprep.subr.bf16.mxu1 %v8255_v26  ;;  %v7471_v26 = vld [vmem:[%s10552_s0 + $0x170] ss:$8 sps:$4 sm:$0xff]  }
  0xa2   :  { %825 = vmatmul.mubr.bf16.gmra.mrb[24].mxu0 %v7464_v40  ;;  %1369 = vmatmul.mubr.bf16.gmra.mrb[24].mxu1 %v7465_v41 }
  0xa3   :  { %6096 = vmatprep.mubr.msk.bf16.mxu0 %vm378_vm0, %v7466_v23  ;;  %6176 = vmatprep.mubr.msk.bf16.mxu1 %vm378_vm0, %v7468_v42 }
  0xa4   :  { %1654 = vmatpush1.bf16.msra.mxu0 %v8702_v24 }
  0xa5   :  { %1655 = vmatprep.subr.bf16.mxu0 %v8709_v43 }
  0xa8   :  { %1656 = vmatpush1.bf16.msra.mxu0 %v8718_v25 }
  0xa9   :  { %1657 = vmatprep.subr.bf16.mxu0 %v8731_v45 }
  0xaa   :  { %835 = vmatmul.mubr.bf16.gmra.mrb[28].mxu0 %v7470_v44  ;;  %1379 = vmatmul.mubr.bf16.gmra.mrb[28].mxu1 %v7471_v26 }
  0xab   :  { %6289 = vmatprep.mubr.msk.bf16.mxu1 %vm378_vm0, %v7570_v15 }
  0xac   :  { %1658 = vmatpush1.bf16.msra.mxu0 %v8736_v46 }
  0xad   :  { %1659 = vmatprep.subr.bf16.mxu0 %v8743_v0 }
  0xb0   :  { %1660 = vmatpush1.bf16.msra.mxu0 %v8748_v47 }
  0xb1   :  { %1902 = vmatprep.subr.bf16.mxu0 %v8755_v48 }
  0xb2   :  { %2286 = vmatmul.mubr.bf16.vlgmr.msra.gmra.mrb[32].mxu1 %v7568_v12 }
  0xb3   :  { %2463 = vmatpush1.bf16.msra.mxu1 %v8266_v29 }
  0xb4   :  { %2464 = vmatprep.subr.bf16.mxu1 %v8273_v30  ;;  %v7523_v30 = vld [vmem:[%s10553_s3 + $0x10] ss:$8 sps:$4 sm:$0xff]  }
  0xb7   :  { %2465 = vmatpush1.bf16.msra.mxu1 %v8288_v33 }
  0xb8   :  { %2466 = vmatprep.subr.bf16.mxu1 %v8295_v34  ;;  %v7526_v34 = vld [vmem:[%s10553_s3 + $0x20] ss:$8 sps:$4 sm:$0xff]  }
 0x145   :  { %v766_v56 = vpop.f32.mrb[0].mxu0  ;;  %v1310_v57 = vpop.f32.mrb[0].mxu1 }
 0x146   :  { %v857_v58 = vadd.f32 %v8766_v54, %v766_v56  ;;  %v1389_v59 = vadd.f32 %v1310_v57, %v8766_v54  ;;  %v768_v60 = vpop.f32.mrb[1].mxu0  ;;  %v1312_v1 = vpop.f32.mrb[1].mxu1  ;;  %v7520_v56 = vld [vmem:[%s10553_s3] ss:$8 sps:$4 sm:$0xff]  }
 0x147   :  { %v858_v2 = vadd.f32 %v8769_v55, %v768_v60  ;;  %v1390_v3 = vadd.f32 %v1312_v1, %v8769_v55  ;;  %v770_v4 = vpop.f32.mrb[2].mxu0  ;;  %v1314_v61 = vpop.f32.mrb[2].mxu1  ;;  %v7525_v1 = vld [vmem:[%s10553_s3 + $0x14] ss:$8 sps:$4 sm:$0xff]  }
 0x148   :  { %v859_v62 = vadd.f32 %v8766_v54, %v770_v4  ;;  %v1391_v63 = vadd.f32 %v1314_v61, %v8766_v54  ;;  %v772_v11 = vpop.f32.mrb[3].mxu0  ;;  %v1316_v9 = vpop.f32.mrb[3].mxu1  ;;  %v889_v32 = vmax.f32 %v857_v58, 0.0  ;;  %v1421_v36 = vmax.f32 %v1389_v59, 0.0 }
 0x149   :  { %v860_v28 = vadd.f32 %v8769_v55, %v772_v11  ;;  %v1392_v31 = vadd.f32 %v1316_v9, %v8769_v55  ;;  %v890_v38 = vmax.f32 %v858_v2, 0.0  ;;  %v1422_v40 = vmax.f32 %v1390_v3, 0.0 }
 0x14a   :  { %v891_v37 = vmax.f32 %v859_v62, 0.0  ;;  %v1423_v19 = vmax.f32 %v1391_v63, 0.0 }
 0x14b   :  { %v892_v41 = vmax.f32 %v860_v28, 0.0  ;;  %v1424_v23 = vmax.f32 %v1392_v31, 0.0  ;;  %v7574_v28 = vld [vmem:[%s10552_s0 + $0x294] ss:$8 sps:$4 sm:$0xff]   ;;  %v7576_v31 = vld [vmem:[%s10552_s0 + $0x290] ss:$8 sps:$4 sm:$0xff]  }
 0x14c   :  { %v8786_v42 = vpack.c.bf16 %v891_v37, %v889_v32  ;;  %v1453_v44 = vpack.c.bf16 %v1423_v19, %v1421_v36  ;;  %v7528_v19 = vld [vmem:[%s10553_s3 + $0x24] ss:$8 sps:$4 sm:$0xff]   ;;  %6290 = vmatprep.mubr.msk.bf16.mxu1 %vm378_vm0, %v7574_v28 }
 0x14d   :  { %v8788_v26 = vpack.c.bf16 %v892_v41, %v890_v38  ;;  %v1454_v49 = vpack.c.bf16 %v1424_v23, %v1422_v40  ;;  %v776_v50 = vpop.f32.mrb[4].mxu0  ;;  %v1320_v52 = vpop.f32.mrb[4].mxu1  ;;  %2296 = vmatmul.mubr.bf16.gmra.mrb[36].mxu1 %v7576_v31  ;;  %v7529_v31 = vld [vmem:[%s10553_s3 + $0x30] ss:$8 sps:$4 sm:$0xff]  }
 0x14e   :  { %v861_v57 = vadd.f32 %v8766_v54, %v776_v50  ;;  %v1393_v58 = vadd.f32 %v1320_v52, %v8766_v54  ;;  %v778_v59 = vpop.f32.mrb[5].mxu0  ;;  %v1322_v60 = vpop.f32.mrb[5].mxu1 }
 0x14f   :  { %v862_v2 = vadd.f32 %v8769_v55, %v778_v59  ;;  %v1394_v3 = vadd.f32 %v1322_v60, %v8769_v55  ;;  %v780_v4 = vpop.f32.mrb[6].mxu0  ;;  %v1324_v61 = vpop.f32.mrb[6].mxu1  ;;  %1661 = vmatprep.mubr.bf16.mxu0 %v1454_v49 }
 0x150   :  { %v863_v29 = vadd.f32 %v8766_v54, %v780_v4  ;;  %v1395_v62 = vadd.f32 %v1324_v61, %v8766_v54  ;;  %v782_v63 = vpop.f32.mrb[7].mxu0  ;;  %v1326_v11 = vpop.f32.mrb[7].mxu1  ;;  %1662 = vmatmul.mubr.bf16.vlgmr.msra.gmra.mrb[32].mxu0 %v1453_v44  ;;  %v893_v15 = vmax.f32 %v861_v57, 0.0  ;;  %v1425_v32 = vmax.f32 %v1393_v58, 0.0  ;;  %v8831_v57 = vld [vmem:[%s10551_s1 + $0x20] ss:$8 sps:$4 sm:$0xff]  }
 0x151   :  { %v864_v9 = vadd.f32 %v8769_v55, %v782_v63  ;;  %v1396_v12 = vadd.f32 %v1326_v11, %v8769_v55  ;;  %1903 = vmatpush1.bf16.msra.mxu0 %v7520_v56  ;;  %v894_v38 = vmax.f32 %v862_v2, 0.0  ;;  %v1426_v40 = vmax.f32 %v1394_v3, 0.0  ;;  %2467 = vmatpush1.bf16.msra.mxu1 %v8831_v57  ;;  %v7531_v2 = vld [vmem:[%s10553_s3 + $0x34] ss:$8 sps:$4 sm:$0xff]  }
 0x152   :  { %v895_v36 = vmax.f32 %v863_v29, 0.0  ;;  %v1427_v37 = vmax.f32 %v1395_v62, 0.0  ;;  %1904 = vmatprep.subr.bf16.mxu0 %v7525_v1  ;;  %v8842_v3 = vld [vmem:[%s10551_s1 + $0x34] ss:$8 sps:$4 sm:$0xff]  }
 0x153   :  { %v896_v41 = vmax.f32 %v864_v9, 0.0  ;;  %v1428_v23 = vmax.f32 %v1396_v12, 0.0  ;;  %2468 = vmatprep.subr.bf16.mxu1 %v8842_v3 }
 0x154   :  { %v8821_v44 = vpack.c.bf16 %v895_v36, %v893_v15  ;;  %v1455_v33 = vpack.c.bf16 %v1427_v37, %v1425_v32  ;;  %v7580_v15 = vld [vmem:[%s10552_s0 + $0x2a4] ss:$8 sps:$4 sm:$0xff]   ;;  %v7582_v32 = vld [vmem:[%s10552_s0 + $0x2a0] ss:$8 sps:$4 sm:$0xff]   ;;  %v8863_v36 = vld [vmem:[%s10551_s1 + $0x30] ss:$8 sps:$4 sm:$0xff]  }
 0x155   :  { %v8823_v49 = vpack.c.bf16 %v896_v41, %v894_v38  ;;  %v1456_v50 = vpack.c.bf16 %v1428_v23, %v1426_v40  ;;  %v786_v52 = vpop.f32.mrb[8].mxu0  ;;  %v1330_v56 = vpop.f32.mrb[8].mxu1  ;;  %1905 = vmatpush1.bf16.msra.mxu0 %v7523_v30  ;;  %10586 = vst [vmem:[#allocation7_spill] sm:$0xff] %v8863_v36  ;;  %2469 = vmatpush1.bf16.msra.mxu1 %v8863_v36  ;;  %v7534_v41 = vld [vmem:[%s10553_s3 + $0x44] ss:$8 sps:$4 sm:$0xff]  }
 0x156   :  { %v865_v58 = vadd.f32 %v8766_v54, %v786_v52  ;;  %v1397_v59 = vadd.f32 %v1330_v56, %v8766_v54  ;;  %v788_v60 = vpop.f32.mrb[9].mxu0  ;;  %v1332_v1 = vpop.f32.mrb[9].mxu1  ;;  %1906 = vmatprep.subr.bf16.mxu0 %v7528_v19  ;;  %v8872_v23 = vld [vmem:[%s10551_s1 + $0x44] ss:$8 sps:$4 sm:$0xff]   ;;  %6291 = vmatprep.mubr.msk.bf16.mxu1 %vm378_vm0, %v7580_v15 }
 0x157   :  { %v866_v4 = vadd.f32 %v8769_v55, %v788_v60  ;;  %v1398_v61 = vadd.f32 %v1332_v1, %v8769_v55  ;;  %v790_v29 = vpop.f32.mrb[10].mxu0  ;;  %v1334_v62 = vpop.f32.mrb[10].mxu1  ;;  %1671 = vmatprep.mubr.bf16.mxu0 %v1456_v50  ;;  %10587 = vst [vmem:[#allocation8_spill] sm:$0xff] %v8872_v23  ;;  %2470 = vmatprep.subr.bf16.mxu1 %v8872_v23  ;;  %v7947_v23 = vld [vmem:[%s10553_s3 + $0x104] ss:$8 sps:$4 sm:$0xff]  }
 0x158   :  { %v867_v63 = vadd.f32 %v8766_v54, %v790_v29  ;;  %v1399_v11 = vadd.f32 %v1334_v62, %v8766_v54  ;;  %v792_v9 = vpop.f32.mrb[11].mxu0  ;;  %v1336_v12 = vpop.f32.mrb[11].mxu1  ;;  %1672 = vmatmul.mubr.bf16.gmra.mrb[36].mxu0 %v1455_v33  ;;  %v897_v37 = vmax.f32 %v865_v58, 0.0  ;;  %v1429_v19 = vmax.f32 %v1397_v59, 0.0  ;;  %2306 = vmatmul.mubr.bf16.gmra.mrb[40].mxu1 %v7582_v32  ;;  %v7532_v29 = vld [vmem:[%s10553_s3 + $0x40] ss:$8 sps:$4 sm:$0xff]  }
 0x159   :  { %v868_v30 = vadd.f32 %v8769_v55, %v792_v9  ;;  %v1400_v28 = vadd.f32 %v1336_v12, %v8769_v55  ;;  %1907 = vmatpush1.bf16.msra.mxu0 %v7526_v34  ;;  %v898_v33 = vmax.f32 %v866_v4, 0.0  ;;  %v1430_v50 = vmax.f32 %v1398_v61, 0.0  ;;  %v8886_v4 = vld [vmem:[%s10551_s1 + $0x40] ss:$8 sps:$4 sm:$0xff]   ;;  %v7537_v9 = vld [vmem:[%s10553_s3 + $0x54] ss:$8 sps:$4 sm:$0xff]  }
 0x15a   :  { %v899_v38 = vmax.f32 %v867_v63, 0.0  ;;  %v1431_v40 = vmax.f32 %v1399_v11, 0.0  ;;  %1908 = vmatprep.subr.bf16.mxu0 %v7531_v2  ;;  %10588 = vst [vmem:[#allocation9_spill] sm:$0xff] %v8886_v4  ;;  %2471 = vmatpush1.bf16.msra.mxu1 %v8886_v4  ;;  %v8897_v12 = vld [vmem:[%s10551_s1 + $0x54] ss:$8 sps:$4 sm:$0xff]  }
 0x15b   :  { %v900_v52 = vmax.f32 %v868_v30, 0.0  ;;  %v1432_v56 = vmax.f32 %v1400_v28, 0.0  ;;  %10589 = vst [vmem:[#allocation10_spill] sm:$0xff] %v8897_v12  ;;  %2472 = vmatprep.subr.bf16.mxu1 %v8897_v12  ;;  %v9038_v12 = vld [vmem:[%s10551_s1 + $0xa4] ss:$8 sps:$4 sm:$0xff]  }
 0x15c   :  { %v8876_v34 = vpack.c.bf16 %v899_v38, %v897_v37  ;;  %v1457_v58 = vpack.c.bf16 %v1431_v40, %v1429_v19  ;;  %v7586_v40 = vld [vmem:[%s10552_s0 + $0x2b4] ss:$8 sps:$4 sm:$0xff]   ;;  %10599 = vst [vmem:[#allocation20_spill] sm:$0xff] %v9038_v12 }
 0x15d   :  { %v8878_v59 = vpack.c.bf16 %v900_v52, %v898_v33  ;;  %v1458_v60 = vpack.c.bf16 %v1432_v56, %v1430_v50  ;;  %v796_v1 = vpop.f32.mrb[12].mxu0  ;;  %v1340_v2 = vpop.f32.mrb[12].mxu1  ;;  %1909 = vmatpush1.bf16.msra.mxu0 %v7529_v31  ;;  %v7535_v50 = vld [vmem:[%s10553_s3 + $0x50] ss:$8 sps:$4 sm:$0xff]   ;;  %6292 = vmatprep.mubr.msk.bf16.mxu1 %vm378_vm0, %v7586_v40 }
 0x15e   :  { %v869_v61 = vadd.f32 %v8766_v54, %v796_v1  ;;  %v1401_v62 = vadd.f32 %v1340_v2, %v8766_v54  ;;  %v798_v63 = vpop.f32.mrb[13].mxu0  ;;  %v1342_v11 = vpop.f32.mrb[13].mxu1  ;;  %1910 = vmatprep.subr.bf16.mxu0 %v7534_v41  ;;  %v7588_v52 = vld [vmem:[%s10552_s0 + $0x2b0] ss:$8 sps:$4 sm:$0xff]  }
 0x15f   :  { %v870_v30 = vadd.f32 %v8769_v55, %v798_v63  ;;  %v1402_v28 = vadd.f32 %v1342_v11, %v8769_v55  ;;  %v800_v31 = vpop.f32.mrb[14].mxu0  ;;  %v1344_v15 = vpop.f32.mrb[14].mxu1  ;;  %1681 = vmatprep.mubr.bf16.mxu0 %v1458_v60  ;;  %v8918_v56 = vld [vmem:[%s10551_s1 + $0x50] ss:$8 sps:$4 sm:$0xff]  }
 0x160   :  { %v871_v32 = vadd.f32 %v8766_v54, %v800_v31  ;;  %v1403_v37 = vadd.f32 %v1344_v15, %v8766_v54  ;;  %v802_v19 = vpop.f32.mrb[15].mxu0  ;;  %v1346_v38 = vpop.f32.mrb[15].mxu1  ;;  %1682 = vmatmul.mubr.bf16.gmra.mrb[40].mxu0 %v1457_v58  ;;  %10590 = vst [vmem:[#allocation11_spill] sm:$0xff] %v8918_v56  ;;  %2473 = vmatpush1.bf16.msra.mxu1 %v8918_v56  ;;  %v901_v58 = vmax.f32 %v869_v61, 0.0  ;;  %v1433_v60 = vmax.f32 %v1401_v62, 0.0 }
 0x161   :  { %v872_v41 = vadd.f32 %v8769_v55, %v802_v19  ;;  %v1404_v33 = vadd.f32 %v1346_v38, %v8769_v55  ;;  %1911 = vmatpush1.bf16.msra.mxu0 %v7532_v29  ;;  %v7540_v29 = vld [vmem:[%s10553_s3 + $0x64] ss:$8 sps:$4 sm:$0xff]   ;;  %v902_v63 = vmax.f32 %v870_v30, 0.0  ;;  %v1434_v11 = vmax.f32 %v1402_v28, 0.0  ;;  %2316 = vmatmul.mubr.bf16.gmra.mrb[44].mxu1 %v7588_v52  ;;  %v7538_v30 = vld [vmem:[%s10553_s3 + $0x60] ss:$8 sps:$4 sm:$0xff]  }
 0x162   :  { %v903_v1 = vmax.f32 %v871_v32, 0.0  ;;  %v1435_v2 = vmax.f32 %v1403_v37, 0.0  ;;  %1912 = vmatprep.subr.bf16.mxu0 %v7537_v9  ;;  %v8928_v19 = vld [vmem:[%s10551_s1 + $0x64] ss:$8 sps:$4 sm:$0xff]   ;;  %v8941_v28 = vld [vmem:[%s10551_s1 + $0x60] ss:$8 sps:$4 sm:$0xff]  }
 0x163   :  { %v904_v31 = vmax.f32 %v872_v41, 0.0  ;;  %v1436_v15 = vmax.f32 %v1404_v33, 0.0  ;;  %10591 = vst [vmem:[#allocation12_spill] sm:$0xff] %v8928_v19  ;;  %2474 = vmatprep.subr.bf16.mxu1 %v8928_v19  ;;  %10592 = vst [vmem:[#allocation13_spill] sm:$0xff] %v8941_v28  ;;  %v8983_v19 = vld [vmem:[%s10551_s1 + $0x84] ss:$8 sps:$4 sm:$0xff]  }
 0x164   :  { %v8931_v61 = vpack.c.bf16 %v903_v1, %v901_v58  ;;  %v1459_v62 = vpack.c.bf16 %v1435_v2, %v1433_v60  ;;  %2475 = vmatpush1.bf16.msra.mxu1 %v8941_v28  ;;  %v8952_v58 = vld [vmem:[%s10551_s1 + $0x74] ss:$8 sps:$4 sm:$0xff]   ;;  %10595 = vst [vmem:[#allocation16_spill] sm:$0xff] %v8983_v19 }
 0x165   :  { %v8933_v9 = vpack.c.bf16 %v904_v31, %v902_v63  ;;  %v1460_v32 = vpack.c.bf16 %v1436_v15, %v1434_v11  ;;  %v806_v37 = vpop.f32.mrb[16].mxu0  ;;  %v1350_v38 = vpop.f32.mrb[16].mxu1  ;;  %1913 = vmatpush1.bf16.msra.mxu0 %v7535_v50  ;;  %v7543_v50 = vld [vmem:[%s10553_s3 + $0x74] ss:$8 sps:$4 sm:$0xff]   ;;  %10593 = vst [vmem:[#allocation14_spill] sm:$0xff] %v8952_v58  ;;  %2476 = vmatprep.subr.bf16.mxu1 %v8952_v58 }
 0x166   :  { %v873_v40 = vadd.f32 %v8766_v54, %v806_v37  ;;  %v1405_v41 = vadd.f32 %v1350_v38, %v8766_v54  ;;  %v808_v33 = vpop.f32.mrb[17].mxu0  ;;  %v1352_v52 = vpop.f32.mrb[17].mxu1  ;;  %1914 = vmatprep.subr.bf16.mxu0 %v7540_v29  ;;  %v7592_v37 = vld [vmem:[%s10552_s0 + $0x2c4] ss:$8 sps:$4 sm:$0xff]  }
 0x167   :  { %v874_v60 = vadd.f32 %v8769_v55, %v808_v33  ;;  %v1406_v1 = vadd.f32 %v1352_v52, %v8769_v55  ;;  %v810_v2 = vpop.f32.mrb[18].mxu0  ;;  %v1354_v63 = vpop.f32.mrb[18].mxu1  ;;  %1691 = vmatprep.mubr.bf16.mxu0 %v1460_v32  ;;  %v7541_v32 = vld [vmem:[%s10553_s3 + $0x70] ss:$8 sps:$4 sm:$0xff]   ;;  %v7594_v52 = vld [vmem:[%s10552_s0 + $0x2c0] ss:$8 sps:$4 sm:$0xff]   ;;  %6293 = vmatprep.mubr.msk.bf16.mxu1 %vm378_vm0, %v7592_v37 }
 0x168   :  { %v875_v29 = vadd.f32 %v8766_v54, %v810_v2  ;;  %v1407_v11 = vadd.f32 %v1354_v63, %v8766_v54  ;;  %v812_v31 = vpop.f32.mrb[19].mxu0  ;;  %v1356_v15 = vpop.f32.mrb[19].mxu1  ;;  %1692 = vmatmul.mubr.bf16.gmra.mrb[44].mxu0 %v1459_v62  ;;  %v8973_v62 = vld [vmem:[%s10551_s1 + $0x70] ss:$8 sps:$4 sm:$0xff]   ;;  %v905_v2 = vmax.f32 %v873_v40, 0.0  ;;  %v1437_v63 = vmax.f32 %v1405_v41, 0.0 }
 0x169   :  { %v876_v38 = vadd.f32 %v8769_v55, %v812_v31  ;;  %v1408_v33 = vadd.f32 %v1356_v15, %v8769_v55  ;;  %1915 = vmatpush1.bf16.msra.mxu0 %v7538_v30  ;;  %10594 = vst [vmem:[#allocation15_spill] sm:$0xff] %v8973_v62  ;;  %2477 = vmatpush1.bf16.msra.mxu1 %v8973_v62  ;;  %v7546_v30 = vld [vmem:[%s10553_s3 + $0x84] ss:$8 sps:$4 sm:$0xff]   ;;  %v906_v53 = vmax.f32 %v874_v60, 0.0  ;;  %v1438_v51 = vmax.f32 %v1406_v1, 0.0 }
 0x16a   :  { %v907_v31 = vmax.f32 %v875_v29, 0.0  ;;  %v1439_v15 = vmax.f32 %v1407_v11, 0.0  ;;  %1916 = vmatprep.subr.bf16.mxu0 %v7543_v50  ;;  %2478 = vmatprep.subr.bf16.mxu1 %v8983_v19  ;;  %v7544_v60 = vld [vmem:[%s10553_s3 + $0x80] ss:$8 sps:$4 sm:$0xff]  }
 0x16b   :  { %v908_v58 = vmax.f32 %v876_v38, 0.0  ;;  %v1440_v28 = vmax.f32 %v1408_v33, 0.0  ;;  %2326 = vmatmul.mubr.bf16.gmra.mrb[48].mxu1 %v7594_v52  ;;  %v8996_v1 = vld [vmem:[%s10551_s1 + $0x80] ss:$8 sps:$4 sm:$0xff]   ;;  %v9007_v33 = vld [vmem:[%s10551_s1 + $0x94] ss:$8 sps:$4 sm:$0xff]  }
 0x16c   :  { %v8986_v40 = vpack.c.bf16 %v907_v31, %v905_v2  ;;  %v1461_v41 = vpack.c.bf16 %v1439_v15, %v1437_v63  ;;  %10596 = vst [vmem:[#allocation17_spill] sm:$0xff] %v8996_v1  ;;  %10597 = vst [vmem:[#allocation18_spill] sm:$0xff] %v9007_v33 }
 0x16d   :  { %v8988_v50 = vpack.c.bf16 %v908_v58, %v906_v53  ;;  %v1462_v29 = vpack.c.bf16 %v1440_v28, %v1438_v51  ;;  %v816_v11 = vpop.f32.mrb[20].mxu0  ;;  %v1360_v37 = vpop.f32.mrb[20].mxu1  ;;  %1917 = vmatpush1.bf16.msra.mxu0 %v7541_v32  ;;  %2479 = vmatpush1.bf16.msra.mxu1 %v8996_v1  ;;  %v7549_v28 = vld [vmem:[%s10553_s3 + $0x94] ss:$8 sps:$4 sm:$0xff]  }
 0x16e   :  { %v877_v38 = vadd.f32 %v8766_v54, %v816_v11  ;;  %v1409_v53 = vadd.f32 %v1360_v37, %v8766_v54  ;;  %v818_v58 = vpop.f32.mrb[21].mxu0  ;;  %v1362_v51 = vpop.f32.mrb[21].mxu1  ;;  %1918 = vmatprep.subr.bf16.mxu0 %v7546_v30  ;;  %2480 = vmatprep.subr.bf16.mxu1 %v9007_v33  ;;  %v7598_v37 = vld [vmem:[%s10552_s0 + $0x2d4] ss:$8 sps:$4 sm:$0xff]  }
 0x16f   :  { %v878_v32 = vadd.f32 %v8769_v55, %v818_v58  ;;  %v1410_v52 = vadd.f32 %v1362_v51, %v8769_v55  ;;  %v820_v2 = vpop.f32.mrb[22].mxu0  ;;  %v1364_v63 = vpop.f32.mrb[22].mxu1  ;;  %1701 = vmatprep.mubr.bf16.mxu0 %v1462_v29  ;;  %v7547_v29 = vld [vmem:[%s10553_s3 + $0x90] ss:$8 sps:$4 sm:$0xff]   ;;  %6294 = vmatprep.mubr.msk.bf16.mxu1 %vm378_vm0, %v7598_v37 }
 0x170   :  { %v879_v31 = vadd.f32 %v8766_v54, %v820_v2  ;;  %v1411_v15 = vadd.f32 %v1364_v63, %v8766_v54  ;;  %v822_v30 = vpop.f32.mrb[23].mxu0  ;;  %v1366_v11 = vpop.f32.mrb[23].mxu1  ;;  %1702 = vmatmul.mubr.bf16.gmra.mrb[48].mxu0 %v1461_v41  ;;  %v7600_v51 = vld [vmem:[%s10552_s0 + $0x2d0] ss:$8 sps:$4 sm:$0xff]   ;;  %v909_v2 = vmax.f32 %v877_v38, 0.0  ;;  %v1441_v63 = vmax.f32 %v1409_v53, 0.0 }
 0x171   :  { %v880_v33 = vadd.f32 %v8769_v55, %v822_v30  ;;  %v1412_v58 = vadd.f32 %v1366_v11, %v8769_v55  ;;  %1919 = vmatpush1.bf16.msra.mxu0 %v7544_v60  ;;  %v9028_v41 = vld [vmem:[%s10551_s1 + $0x90] ss:$8 sps:$4 sm:$0xff]   ;;  %v7552_v60 = vld [vmem:[%s10553_s3 + $0xa4] ss:$8 sps:$4 sm:$0xff]   ;;  %v910_v1 = vmax.f32 %v878_v32, 0.0  ;;  %v1442_v19 = vmax.f32 %v1410_v52, 0.0 }
 0x172   :  { %10598 = vst [vmem:[#allocation19_spill] sm:$0xff] %v9028_v41  ;;  %2481 = vmatpush1.bf16.msra.mxu1 %v9028_v41  ;;  %v911_v30 = vmax.f32 %v879_v31, 0.0  ;;  %v1443_v11 = vmax.f32 %v1411_v15, 0.0  ;;  %1920 = vmatprep.subr.bf16.mxu0 %v7549_v28  ;;  %v9051_v32 = vld [vmem:[%s10551_s1 + $0xa0] ss:$8 sps:$4 sm:$0xff]  }
 0x173   :  { %v912_v62 = vmax.f32 %v880_v33, 0.0  ;;  %v1444_v56 = vmax.f32 %v1412_v58, 0.0  ;;  %2482 = vmatprep.subr.bf16.mxu1 %v9038_v12  ;;  %2336 = vmatmul.mubr.bf16.gmra.mrb[52].mxu1 %v7600_v51  ;;  %v7550_v33 = vld [vmem:[%s10553_s3 + $0xa0] ss:$8 sps:$4 sm:$0xff]   ;;  %10600 = vst [vmem:[#allocation21_spill] sm:$0xff] %v9051_v32 }
 0x174   :  { %v9041_v38 = vpack.c.bf16 %v911_v30, %v909_v2  ;;  %v1463_v53 = vpack.c.bf16 %v1443_v11, %v1441_v63  ;;  %v9062_v58 = vld [vmem:[%s10551_s1 + $0xb4] ss:$8 sps:$4 sm:$0xff]  }
 0x175   :  { %v9043_v28 = vpack.c.bf16 %v912_v62, %v910_v1  ;;  %v1464_v31 = vpack.c.bf16 %v1444_v56, %v1442_v19  ;;  %v826_v15 = vpop.f32.mrb[24].mxu0  ;;  %v1370_v37 = vpop.f32.mrb[24].mxu1  ;;  %1921 = vmatpush1.bf16.msra.mxu0 %v7547_v29  ;;  %v7555_v19 = vld [vmem:[%s10553_s3 + $0xb4] ss:$8 sps:$4 sm:$0xff]   ;;  %10601 = vst [vmem:[#allocation22_spill] sm:$0xff] %v9062_v58 }
 0x176   :  { %2483 = vmatpush1.bf16.msra.mxu1 %v9051_v32  ;;  %v881_v52 = vadd.f32 %v8766_v54, %v826_v15  ;;  %v1413_v62 = vadd.f32 %v1370_v37, %v8766_v54  ;;  %v828_v1 = vpop.f32.mrb[25].mxu0  ;;  %v1372_v56 = vpop.f32.mrb[25].mxu1  ;;  %1922 = vmatprep.subr.bf16.mxu0 %v7552_v60  ;;  %v7604_v37 = vld [vmem:[%s10552_s0 + $0x2e4] ss:$8 sps:$4 sm:$0xff]  }
 0x177   :  { %2484 = vmatprep.subr.bf16.mxu1 %v9062_v58  ;;  %v882_v29 = vadd.f32 %v8769_v55, %v828_v1  ;;  %v1414_v51 = vadd.f32 %v1372_v56, %v8769_v55  ;;  %v830_v2 = vpop.f32.mrb[26].mxu0  ;;  %v1374_v63 = vpop.f32.mrb[26].mxu1  ;;  %1711 = vmatprep.mubr.bf16.mxu0 %v1464_v31  ;;  %v7553_v31 = vld [vmem:[%s10553_s3 + $0xb0] ss:$8 sps:$4 sm:$0xff]   ;;  %v7606_v56 = vld [vmem:[%s10552_s0 + $0x2e0] ss:$8 sps:$4 sm:$0xff]  }
 0x178   :  { %v883_v30 = vadd.f32 %v8766_v54, %v830_v2  ;;  %v1415_v11 = vadd.f32 %v1374_v63, %v8766_v54  ;;  %v832_v60 = vpop.f32.mrb[27].mxu0  ;;  %v1376_v15 = vpop.f32.mrb[27].mxu1  ;;  %1712 = vmatmul.mubr.bf16.gmra.mrb[52].mxu0 %v1463_v53  ;;  %v9083_v53 = vld [vmem:[%s10551_s1 + $0xb0] ss:$8 sps:$4 sm:$0xff]   ;;  %v913_v2 = vmax.f32 %v881_v52, 0.0  ;;  %v1445_v63 = vmax.f32 %v1413_v62, 0.0  ;;  %6295 = vmatprep.mubr.msk.bf16.mxu1 %vm378_vm0, %v7604_v37 }
 0x179   :  { %v884_v58 = vadd.f32 %v8769_v55, %v832_v60  ;;  %v1416_v1 = vadd.f32 %v1376_v15, %v8769_v55  ;;  %1923 = vmatpush1.bf16.msra.mxu0 %v7550_v33  ;;  %10602 = vst [vmem:[#allocation23_spill] sm:$0xff] %v9083_v53  ;;  %v7558_v33 = vld [vmem:[%s10553_s3 + $0xc4] ss:$8 sps:$4 sm:$0xff]   ;;  %v914_v32 = vmax.f32 %v882_v29, 0.0  ;;  %v1446_v12 = vmax.f32 %v1414_v51, 0.0 }
 0x17a   :  { %2485 = vmatpush1.bf16.msra.mxu1 %v9083_v53  ;;  %v915_v60 = vmax.f32 %v883_v30, 0.0  ;;  %v1447_v15 = vmax.f32 %v1415_v11, 0.0  ;;  %1924 = vmatprep.subr.bf16.mxu0 %v7555_v19 }
 0x17b   :  { %v916_v41 = vmax.f32 %v884_v58, 0.0  ;;  %v1448_v4 = vmax.f32 %v1416_v1, 0.0  ;;  %3199 = vmatprep.subr.bf16.mxu1 %v7947_v23  ;;  %2346 = vmatmul.mubr.bf16.gmra.mrb[56].mxu1 %v7606_v56  ;;  %v7556_v58 = vld [vmem:[%s10553_s3 + $0xc0] ss:$8 sps:$4 sm:$0xff]  }
 0x17c   :  { %v9093_v52 = vpack.c.bf16 %v915_v60, %v913_v2  ;;  %v1465_v62 = vpack.c.bf16 %v1447_v15, %v1445_v63  ;;  %v7610_v63 = vld [vmem:[%s10552_s0 + $0x2f4] ss:$8 sps:$4 sm:$0xff]  }
 0x17d   :  { %v9095_v19 = vpack.c.bf16 %v916_v41, %v914_v32  ;;  %v1466_v30 = vpack.c.bf16 %v1448_v4, %v1446_v12  ;;  %v836_v11 = vpop.f32.mrb[28].mxu0  ;;  %v1380_v53 = vpop.f32.mrb[28].mxu1  ;;  %1925 = vmatpush1.bf16.msra.mxu0 %v7553_v31  ;;  %v7561_v41 = vld [vmem:[%s10553_s3 + $0xd4] ss:$8 sps:$4 sm:$0xff]   ;;  %6296 = vmatprep.mubr.msk.bf16.mxu1 %vm378_vm0, %v7610_v63  ;;  %v7949_v63 = vld [vmem:[%s10551_s1 + $0xc4] ss:$8 sps:$4 sm:$0xff]  }
 0x17e   :  { %v885_v29 = vadd.f32 %v8766_v54, %v836_v11  ;;  %v1417_v51 = vadd.f32 %v1380_v53, %v8766_v54  ;;  %v838_v37 = vpop.f32.mrb[29].mxu0  ;;  %v1382_v23 = vpop.f32.mrb[29].mxu1  ;;  %1926 = vmatprep.subr.bf16.mxu0 %v7558_v33  ;;  %v7559_v33 = vld [vmem:[%s10553_s3 + $0xd0] ss:$8 sps:$4 sm:$0xff]  }
 0x17f   :  { %v886_v4 = vadd.f32 %v8769_v55, %v838_v37  ;;  %v1418_v12 = vadd.f32 %v1382_v23, %v8769_v55  ;;  %v840_v32 = vpop.f32.mrb[30].mxu0  ;;  %v1384_v1 = vpop.f32.mrb[30].mxu1  ;;  %1721 = vmatprep.mubr.bf16.mxu0 %v1466_v30  ;;  %v7564_v23 = vld [vmem:[%s10553_s3 + $0xe4] ss:$8 sps:$4 sm:$0xff]  }
 0x180   :  { %v887_v31 = vadd.f32 %v8766_v54, %v840_v32  ;;  %v1419_v56 = vadd.f32 %v1384_v1, %v8766_v54  ;;  %v842_v2 = vpop.f32.mrb[31].mxu0  ;;  %v1386_v53 = vpop.f32.mrb[31].mxu1  ;;  %1722 = vmatmul.mubr.bf16.gmra.mrb[56].mxu0 %v1465_v62  ;;  %v7612_v54 = vld [vmem:[%s10552_s0 + $0x2f0] ss:$8 sps:$4 sm:$0xff]   ;;  %v917_v30 = vmax.f32 %v885_v29, 0.0  ;;  %v1449_v11 = vmax.f32 %v1417_v51, 0.0 }
 0x181   :  { %v888_v60 = vadd.f32 %v8769_v55, %v842_v2  ;;  %v1420_v15 = vadd.f32 %v1386_v53, %v8769_v55  ;;  %1927 = vmatpush1.bf16.msra.mxu0 %v7556_v58  ;;  %v918_v55 = vmax.f32 %v886_v4, 0.0  ;;  %v1450_v58 = vmax.f32 %v1418_v12, 0.0  ;;  %v7562_v51 = vld [vmem:[%s10553_s3 + $0xe0] ss:$8 sps:$4 sm:$0xff]   ;;  %v7618_v12 = vld [vmem:[%s10552_s0 + $0x204] ss:$8 sps:$4 sm:$0xff]  }
 0x182   :  { %v919_v62 = vmax.f32 %v887_v31, 0.0  ;;  %v1451_v37 = vmax.f32 %v1419_v56, 0.0  ;;  %1928 = vmatprep.subr.bf16.mxu0 %v7561_v41  ;;  %v7567_v41 = vld [vmem:[%s10553_s3 + $0xf4] ss:$8 sps:$4 sm:$0xff]   ;;  %v7616_v4 = vld [vmem:[%s10552_s0 + $0x200] ss:$8 sps:$4 sm:$0xff]  }
 0x183   :  { %v920_v32 = vmax.f32 %v888_v60, 0.0  ;;  %v1452_v1 = vmax.f32 %v1420_v15, 0.0  ;;  %2356 = vmatmul.mubr.bf16.gmra.mrb[60].mxu1 %v7612_v54  ;;  %v7565_v31 = vld [vmem:[%s10553_s3 + $0xf0] ss:$8 sps:$4 sm:$0xff]   ;;  %v7948_v56 = vld [vmem:[%s10553_s3 + $0x100] ss:$8 sps:$4 sm:$0xff]  }
 0x184   :  { %v9124_v2 = vpack.c.bf16 %v919_v62, %v917_v30  ;;  %v1467_v53 = vpack.c.bf16 %v1451_v37, %v1449_v11  ;;  %6313 = vmatprep.mubr.msk.bf16.mxu1 %vm378_vm0, %v7618_v12  ;;  %v7622_v60 = vld [vmem:[%s10552_s0 + $0x214] ss:$8 sps:$4 sm:$0xff]   ;;  %v7624_v15 = vld [vmem:[%s10552_s0 + $0x210] ss:$8 sps:$4 sm:$0xff]   ;;  %v7956_v11 = vld [vmem:[%s10551_s1 + $0xe4] ss:$8 sps:$4 sm:$0xff]  }
 0x185   :  { %v9126_v36 = vpack.c.bf16 %v920_v32, %v918_v55  ;;  %v1468_v29 = vpack.c.bf16 %v1452_v1, %v1450_v58  ;;  %1929 = vmatpush1.bf16.msra.mxu0 %v7559_v33  ;;  %v7951_v33 = vld [vmem:[%s10551_s1 + $0xc0] ss:$8 sps:$4 sm:$0xff]   ;;  %v7952_v54 = vld [vmem:[%s10551_s1 + $0xd4] ss:$8 sps:$4 sm:$0xff]   ;;  %v7955_v30 = vld [vmem:[%s10551_s1 + $0xd0] ss:$8 sps:$4 sm:$0xff]  }
 0x186   :  { %1930 = vmatprep.subr.bf16.mxu0 %v7564_v23  ;;  %v7957_v62 = vld [vmem:[%s10553_s3 + $0x120] ss:$8 sps:$4 sm:$0xff]   ;;  %v7628_v37 = vld [vmem:[%s10552_s0 + $0x224] ss:$8 sps:$4 sm:$0xff]   ;;  %v7958_v55 = vld [vmem:[%s10553_s3 + $0x134] ss:$8 sps:$4 sm:$0xff]  }
 0x187   :  { %1731 = vmatprep.mubr.bf16.mxu0 %v1468_v29  ;;  %v7630_v23 = vld [vmem:[%s10552_s0 + $0x220] ss:$8 sps:$4 sm:$0xff]   ;;  %v7961_v32 = vld [vmem:[%s10553_s3 + $0x130] ss:$8 sps:$4 sm:$0xff]   ;;  %v7634_v29 = vld [vmem:[%s10552_s0 + $0x234] ss:$8 sps:$4 sm:$0xff]  }
 0x188   :  { %1732 = vmatmul.mubr.bf16.gmra.mrb[60].mxu0 %v1467_v53  ;;  %v7959_v58 = vld [vmem:[%s10551_s1 + $0xe0] ss:$8 sps:$4 sm:$0xff]   ;;  %v7963_v1 = vld [vmem:[%s10551_s1 + $0xf0] ss:$8 sps:$4 sm:$0xff]   ;;  %v7964_v53 = vld [vmem:[%s10551_s1 + $0x104] ss:$8 sps:$4 sm:$0xff]  }
 0x189   :  { %1931 = vmatpush1.bf16.msra.mxu0 %v7562_v51  ;;  %1934 = vmatprep.mubr.bf16.mxu0 %v8788_v26  ;;  %v7950_v26 = vld [vmem:[%s10553_s3 + $0x114] ss:$8 sps:$4 sm:$0xff]   ;;  %v7636_v51 = vld [vmem:[%s10552_s0 + $0x230] ss:$8 sps:$4 sm:$0xff]   ;;  %v10606_v12 = vld [vmem:[#allocation10_spill] sm:$0xff] }
 0x18a   :  { %1932 = vmatprep.subr.bf16.mxu0 %v7567_v41  ;;  %v7965_v41 = vld [vmem:[%s10551_s1 + $0x100] ss:$8 sps:$4 sm:$0xff]  }
 0x18b   :  { %2495 = vmatmul.mubr.bf16.vlgmr.msra.gmra.mrb[32].mxu1 %v7616_v4  ;;  %v10604_v4 = vld [vmem:[#allocation8_spill] sm:$0xff] }
 0x18c   :  { %3200 = vmatpush1.bf16.msra.mxu1 %v7948_v56  ;;  %6314 = vmatprep.mubr.msk.bf16.mxu1 %vm378_vm0, %v7622_v60  ;;  %v7595_v56 = vld [vmem:[%s10552_s0 + $0x3c4] ss:$8 sps:$4 sm:$0xff]  }
 0x18d   :  { %1933 = vmatpush1.bf16.msra.mxu0 %v7565_v31  ;;  %3201 = vmatprep.subr.bf16.mxu1 %v7950_v26  ;;  %v10607_v31 = vld [vmem:[#allocation11_spill] sm:$0xff]  ;;  %v10609_v26 = vld [vmem:[#allocation13_spill] sm:$0xff]  ;;  %v10610_v60 = vld [vmem:[#allocation14_spill] sm:$0xff] }
 0x18e   :  { %2797 = vmatprep.subr.bf16.mxu0 %v7949_v63  ;;  %v10608_v63 = vld [vmem:[#allocation12_spill] sm:$0xff] }
 0x190   :  { %1935 = vmatmul.mubr.bf16.vlgmr.msra.gmra.mrb[32].mxu0 %v8786_v42  ;;  %v7953_v42 = vld [vmem:[%s10553_s3 + $0x110] ss:$8 sps:$4 sm:$0xff]  }
 0x191   :  { %1944 = vmatprep.mubr.bf16.mxu0 %v8823_v49  ;;  %2798 = vmatpush1.bf16.msra.mxu0 %v7951_v33  ;;  %v7954_v49 = vld [vmem:[%s10553_s3 + $0x124] ss:$8 sps:$4 sm:$0xff]   ;;  %v7601_v33 = vld [vmem:[%s10552_s0 + $0x3d4] ss:$8 sps:$4 sm:$0xff]  }
 0x192   :  { %2799 = vmatprep.subr.bf16.mxu0 %v7952_v54  ;;  %3202 = vmatpush1.bf16.msra.mxu1 %v7953_v42  ;;  %v10611_v54 = vld [vmem:[#allocation15_spill] sm:$0xff]  ;;  %v10612_v42 = vld [vmem:[#allocation16_spill] sm:$0xff] }
 0x193   :  { %2505 = vmatmul.mubr.bf16.gmra.mrb[36].mxu1 %v7624_v15  ;;  %3203 = vmatprep.subr.bf16.mxu1 %v7954_v49  ;;  %v7597_v15 = vld [vmem:[%s10552_s0 + $0x3c0] ss:$8 sps:$4 sm:$0xff]  }
 0x194   :  { %6315 = vmatprep.mubr.msk.bf16.mxu1 %vm378_vm0, %v7628_v37  ;;  %v10613_v49 = vld [vmem:[#allocation17_spill] sm:$0xff]  ;;  %v10615_v37 = vld [vmem:[#allocation19_spill] sm:$0xff] }
 0x195   :  { %2800 = vmatpush1.bf16.msra.mxu0 %v7955_v30  ;;  %v10614_v30 = vld [vmem:[#allocation18_spill] sm:$0xff] }
 0x196   :  { %2801 = vmatprep.subr.bf16.mxu0 %v7956_v11  ;;  %3204 = vmatpush1.bf16.msra.mxu1 %v7957_v62  ;;  %v7603_v11 = vld [vmem:[%s10552_s0 + $0x3d0] ss:$8 sps:$4 sm:$0xff]   ;;  %v7607_v62 = vld [vmem:[%s10552_s0 + $0x3e4] ss:$8 sps:$4 sm:$0xff]  }
 0x197   :  { %3205 = vmatprep.subr.bf16.mxu1 %v7958_v55  ;;  %v10617_v55 = vld [vmem:[#allocation21_spill] sm:$0xff] }
 0x198   :  { %1945 = vmatmul.mubr.bf16.gmra.mrb[36].mxu0 %v8821_v44  ;;  %v7960_v44 = vld [vmem:[%s10551_s1 + $0xf4] ss:$8 sps:$4 sm:$0xff]  }
 0x199   :  { %1954 = vmatprep.mubr.bf16.mxu0 %v8878_v59  ;;  %2802 = vmatpush1.bf16.msra.mxu0 %v7959_v58  ;;  %v7962_v59 = vld [vmem:[%s10553_s3 + $0x144] ss:$8 sps:$4 sm:$0xff]  }
 0x19a   :  { %2803 = vmatprep.subr.bf16.mxu0 %v7960_v44  ;;  %3206 = vmatpush1.bf16.msra.mxu1 %v7961_v32  ;;  %v10618_v58 = vld [vmem:[#allocation22_spill] sm:$0xff]  ;;  %v7613_v32 = vld [vmem:[%s10552_s0 + $0x3f4] ss:$8 sps:$4 sm:$0xff]  }
 0x19b   :  { %2515 = vmatmul.mubr.bf16.gmra.mrb[40].mxu1 %v7630_v23  ;;  %3207 = vmatprep.subr.bf16.mxu1 %v7962_v59  ;;  %v10616_v23 = vld [vmem:[#allocation20_spill] sm:$0xff]  ;;  %v7609_v44 = vld [vmem:[%s10552_s0 + $0x3e0] ss:$8 sps:$4 sm:$0xff]   ;;  %v10619_v59 = vld [vmem:[#allocation23_spill] sm:$0xff] }
 0x19c   :  { %6316 = vmatprep.mubr.msk.bf16.mxu1 %vm378_vm0, %v7634_v29  ;;  %v7619_v29 = vld [vmem:[%s10552_s0 + $0x300] ss:$8 sps:$4 sm:$0xff]  }
 0x19d   :  { %2804 = vmatpush1.bf16.msra.mxu0 %v7963_v1  ;;  %v7615_v1 = vld [vmem:[%s10552_s0 + $0x3f0] ss:$8 sps:$4 sm:$0xff]  }
 0x19e   :  { %2805 = vmatprep.subr.bf16.mxu0 %v7964_v53  ;;  %3208 = vmatpush1.bf16.msra.mxu1 %v8535_v5  ;;  %v7966_v5 = vld [vmem:[%s10551_s1 + $0x114] ss:$8 sps:$4 sm:$0xff]   ;;  %v7621_v53 = vld [vmem:[%s10552_s0 + $0x304] ss:$8 sps:$4 sm:$0xff]  }
 0x19f   :  { %3209 = vmatprep.subr.bf16.mxu1 %v8541_v6  ;;  %v7967_v6 = vld [vmem:[%s10551_s1 + $0x110] ss:$8 sps:$4 sm:$0xff]  }
 0x1a0   :  { %1955 = vmatmul.mubr.bf16.gmra.mrb[40].mxu0 %v8876_v34  ;;  %v7968_v34 = vld [vmem:[%s10551_s1 + $0x124] ss:$8 sps:$4 sm:$0xff]  }
 0x1a1   :  { %1964 = vmatprep.mubr.bf16.mxu0 %v8933_v9  ;;  %2806 = vmatpush1.bf16.msra.mxu0 %v7965_v41  ;;  %v7969_v9 = vld [vmem:[%s10551_s1 + $0x120] ss:$8 sps:$4 sm:$0xff]   ;;  %v7627_v41 = vld [vmem:[%s10552_s0 + $0x310] ss:$8 sps:$4 sm:$0xff]  }
 0x1a2   :  { %2807 = vmatprep.subr.bf16.mxu0 %v7966_v5  ;;  %3210 = vmatpush1.bf16.msra.mxu1 %v8550_v7  ;;  %v7640_v7 = vld [vmem:[%s10552_s0 + $0x244] ss:$8 sps:$4 sm:$0xff]  }
 0x1a3   :  { %2525 = vmatmul.mubr.bf16.gmra.mrb[44].mxu1 %v7636_v51  ;;  %3211 = vmatprep.subr.bf16.mxu1 %v8557_v8  ;;  %v7642_v8 = vld [vmem:[%s10552_s0 + $0x240] ss:$8 sps:$4 sm:$0xff]   ;;  %v7625_v51 = vld [vmem:[%s10552_s0 + $0x314] ss:$8 sps:$4 sm:$0xff]   ;;  %v7631_v5 = vld [vmem:[%s10552_s0 + $0x324] ss:$8 sps:$4 sm:$0xff]  }
 0x1a4   :  { %6317 = vmatprep.mubr.msk.bf16.mxu1 %vm378_vm0, %v7640_v7  ;;  %v7639_v7 = vld [vmem:[%s10552_s0 + $0x330] ss:$8 sps:$4 sm:$0xff]  }
 0x1a5   :  { %2808 = vmatpush1.bf16.msra.mxu0 %v7967_v6  ;;  %v7633_v6 = vld [vmem:[%s10552_s0 + $0x320] ss:$8 sps:$4 sm:$0xff]  }
 0x1a6   :  { %2809 = vmatprep.subr.bf16.mxu0 %v7968_v34  ;;  %3212 = vmatpush1.bf16.msra.mxu1 %v8576_v10  ;;  %v7970_v10 = vld [vmem:[%s10551_s1 + $0x134] ss:$8 sps:$4 sm:$0xff]  }
 0x1a7   :  { %3213 = vmatprep.subr.bf16.mxu1 %v8583_v27  ;;  %v7971_v27 = vld [vmem:[%s10551_s1 + $0x130] ss:$8 sps:$4 sm:$0xff]   ;;  %v7637_v34 = vld [vmem:[%s10552_s0 + $0x334] ss:$8 sps:$4 sm:$0xff]  }
 0x1a8   :  { %1965 = vmatmul.mubr.bf16.gmra.mrb[44].mxu0 %v8931_v61  ;;  %v7972_v61 = vld [vmem:[%s10551_s1 + $0x144] ss:$8 sps:$4 sm:$0xff]  }
 0x1a9   :  { %1974 = vmatprep.mubr.bf16.mxu0 %v8988_v50  ;;  %2810 = vmatpush1.bf16.msra.mxu0 %v7969_v9  ;;  %v7973_v50 = vld [vmem:[%s10551_s1 + $0x140] ss:$8 sps:$4 sm:$0xff]  }
 0x1aa   :  { %2811 = vmatprep.subr.bf16.mxu0 %v7970_v10  ;;  %3214 = vmatpush1.bf16.msra.mxu1 %v8592_v13  ;;  %v7646_v13 = vld [vmem:[%s10552_s0 + $0x254] ss:$8 sps:$4 sm:$0xff]   ;;  %v7645_v9 = vld [vmem:[%s10552_s0 + $0x340] ss:$8 sps:$4 sm:$0xff]  }
 0x1ab   :  { %2535 = vmatmul.mubr.bf16.gmra.mrb[48].mxu1 %v7642_v8  ;;  %3215 = vmatprep.subr.bf16.mxu1 %v8599_v14  ;;  %v7648_v14 = vld [vmem:[%s10552_s0 + $0x250] ss:$8 sps:$4 sm:$0xff]   ;;  %v7643_v8 = vld [vmem:[%s10552_s0 + $0x344] ss:$8 sps:$4 sm:$0xff]   ;;  %v7649_v10 = vld [vmem:[%s10552_s0 + $0x354] ss:$8 sps:$4 sm:$0xff]  }
 0x1ac   :  { %6318 = vmatprep.mubr.msk.bf16.mxu1 %vm378_vm0, %v7646_v13  ;;  %v7657_v13 = vld [vmem:[%s10552_s0 + $0x360] ss:$8 sps:$4 sm:$0xff]  }
 0x1ad   :  { %2812 = vmatpush1.bf16.msra.mxu0 %v7971_v27  ;;  %v7651_v27 = vld [vmem:[%s10552_s0 + $0x350] ss:$8 sps:$4 sm:$0xff]  }
 0x1ae   :  { %2813 = vmatprep.subr.bf16.mxu0 %v7972_v61  ;;  %3216 = vmatpush1.bf16.msra.mxu1 %v8618_v16  ;;  %v7974_v16 = vld [vmem:[%s10551_s1 + $0x154] ss:$8 sps:$4 sm:$0xff]   ;;  %v7655_v61 = vld [vmem:[%s10552_s0 + $0x364] ss:$8 sps:$4 sm:$0xff]  }
 0x1af   :  { %3217 = vmatprep.subr.bf16.mxu1 %v8625_v35  ;;  %v7975_v35 = vld [vmem:[%s10551_s1 + $0x150] ss:$8 sps:$4 sm:$0xff]  }
 0x1b0   :  { %1975 = vmatmul.mubr.bf16.gmra.mrb[48].mxu0 %v8986_v40  ;;  %v7976_v40 = vld [vmem:[%s10551_s1 + $0x164] ss:$8 sps:$4 sm:$0xff]  }
 0x1b1   :  { %1984 = vmatprep.mubr.bf16.mxu0 %v9043_v28  ;;  %2814 = vmatpush1.bf16.msra.mxu0 %v7973_v50  ;;  %v7977_v28 = vld [vmem:[%s10551_s1 + $0x160] ss:$8 sps:$4 sm:$0xff]   ;;  %v7663_v50 = vld [vmem:[%s10552_s0 + $0x370] ss:$8 sps:$4 sm:$0xff]  }
 0x1b2   :  { %2815 = vmatprep.subr.bf16.mxu0 %v7974_v16  ;;  %3218 = vmatpush1.bf16.msra.mxu1 %v8634_v17  ;;  %v7652_v17 = vld [vmem:[%s10552_s0 + $0x264] ss:$8 sps:$4 sm:$0xff]   ;;  %v2575_v16 = vld [vmem:[%s10554_s2] sm:$0x3] }
 0x1b3   :  { %2545 = vmatmul.mubr.bf16.gmra.mrb[52].mxu1 %v7648_v14  ;;  %3219 = vmatprep.subr.bf16.mxu1 %v8641_v18  ;;  %v7654_v18 = vld [vmem:[%s10552_s0 + $0x260] ss:$8 sps:$4 sm:$0xff]   ;;  %v7661_v14 = vld [vmem:[%s10552_s0 + $0x374] ss:$8 sps:$4 sm:$0xff]  }
 0x1b4   :  { %6319 = vmatprep.mubr.msk.bf16.mxu1 %vm378_vm0, %v7652_v17  ;;  %v2015_v17 = vld [vmem:[%s10555_s4] sm:$0x3] }
 0x1b5   :  { %2816 = vmatpush1.bf16.msra.mxu0 %v7975_v35  ;;  %v10620_v35 = vld [vmem:[#allocation5_spill] sm:$0xff] }
 0x1b6   :  { %2817 = vmatprep.subr.bf16.mxu0 %v7976_v40  ;;  %3220 = vmatpush1.bf16.msra.mxu1 %v8660_v20  ;;  %v7978_v20 = vld [vmem:[%s10551_s1 + $0x174] ss:$8 sps:$4 sm:$0xff]   ;;  %v9479_v40 = vrot.slane %v2575_v16, %v10620_v35 }
 0x1b7   :  { %3221 = vmatprep.subr.bf16.mxu1 %v8667_v39  ;;  %v7979_v39 = vld [vmem:[%s10551_s1 + $0x170] ss:$8 sps:$4 sm:$0xff]  }
 0x1b8   :  { %1985 = vmatmul.mubr.bf16.gmra.mrb[52].mxu0 %v9041_v38  ;;  %v7980_v38 = vld [vmem:[%s10551_s1 + $0x4] ss:$8 sps:$4 sm:$0xff]  }
 0x1b9   :  { %1994 = vmatprep.mubr.bf16.mxu0 %v9095_v19  ;;  %2818 = vmatpush1.bf16.msra.mxu0 %v7977_v28  ;;  %v10603_v19 = vld [vmem:[#allocation7_spill] sm:$0xff] }
 0x1ba   :  { %2819 = vmatprep.subr.bf16.mxu0 %v7978_v20  ;;  %3222 = vmatpush1.bf16.msra.mxu1 %v8676_v21  ;;  %v7658_v21 = vld [vmem:[%s10552_s0 + $0x274] ss:$8 sps:$4 sm:$0xff]  }
 0x1bb   :  { %2555 = vmatmul.mubr.bf16.gmra.mrb[56].mxu1 %v7654_v18  ;;  %3223 = vmatprep.subr.bf16.mxu1 %v8683_v22  ;;  %v7660_v22 = vld [vmem:[%s10552_s0 + $0x270] ss:$8 sps:$4 sm:$0xff]   ;;  %v10621_v18 = vld [vmem:[#allocation6_spill] sm:$0xff] }
 0x1bc   :  { %6320 = vmatprep.mubr.msk.bf16.mxu1 %vm378_vm0, %v7658_v21  ;;  %v9485_v28 = vrot.slane %v2575_v16, %v10621_v18 }
 0x1bd   :  { %2820 = vmatpush1.bf16.msra.mxu0 %v7979_v39  ;;  %v9488_v39 = vrot.slane %v2015_v17, %v10620_v35 }
 0x1be   :  { %3006 = vmatprep.subr.bf16.mxu0 %v7980_v38  ;;  %3224 = vmatpush1.bf16.msra.mxu1 %v8702_v24  ;;  %v7573_v24 = vld [vmem:[%s10552_s0 + $0x384] ss:$8 sps:$4 sm:$0xff]  }
 0x1bf   :  { %3225 = vmatprep.subr.bf16.mxu1 %v8709_v43  ;;  %v7571_v43 = vld [vmem:[%s10552_s0 + $0x380] ss:$8 sps:$4 sm:$0xff]  }
 0x1c0   :  { %1995 = vmatmul.mubr.bf16.gmra.mrb[56].mxu0 %v9093_v52  ;;  %v7585_v52 = vld [vmem:[%s10552_s0 + $0x3a0] ss:$8 sps:$4 sm:$0xff]  }
 0x1c1   :  { %2004 = vmatprep.mubr.bf16.mxu0 %v9126_v36  ;;  %v7984_v36 = vld [vmem:[%s10551_s1 + $0x24] ss:$8 sps:$4 sm:$0xff]  }
 0x1c2   :  { %3226 = vmatpush1.bf16.msra.mxu1 %v8718_v25  ;;  %v7577_v25 = vld [vmem:[%s10552_s0 + $0x394] ss:$8 sps:$4 sm:$0xff]  }
 0x1c3   :  { %2565 = vmatmul.mubr.bf16.gmra.mrb[60].mxu1 %v7660_v22  ;;  %3227 = vmatprep.subr.bf16.mxu1 %v8731_v45  ;;  %v7981_v45 = vld [vmem:[%s10551_s1] ss:$8 sps:$4 sm:$0xff]   ;;  %v9492_v22 = vrot.slane %v2015_v17, %v10621_v18 }
 0x1c6   :  { %3228 = vmatpush1.bf16.msra.mxu1 %v8736_v46  ;;  %v7982_v46 = vld [vmem:[%s10551_s1 + $0x14] ss:$8 sps:$4 sm:$0xff]  }
 0x1c7   :  { %3229 = vmatprep.subr.bf16.mxu1 %v8743_v0  ;;  %v7579_v0 = vld [vmem:[%s10552_s0 + $0x390] ss:$8 sps:$4 sm:$0xff]  }
 0x1c8   :  { %2005 = vmatmul.mubr.bf16.gmra.mrb[60].mxu0 %v9124_v2  ;;  %v7589_v2 = vld [vmem:[%s10552_s0 + $0x3b4] ss:$8 sps:$4 sm:$0xff]  }
 0x1c9   :  { %6369 = vmatprep.mubr.msk.bf16.mxu0 %vm378_vm0, %v7573_v24 }
 0x1ca   :  { %3230 = vmatpush1.bf16.msra.mxu1 %v8748_v47  ;;  %v7983_v47 = vld [vmem:[%s10551_s1 + $0x10] ss:$8 sps:$4 sm:$0xff]  }
 0x1cb   :  { %3312 = vmatprep.subr.bf16.mxu1 %v8755_v48  ;;  %v7583_v48 = vld [vmem:[%s10552_s0 + $0x3a4] ss:$8 sps:$4 sm:$0xff]  }
 0x1d0   :  { %2830 = vmatmul.mubr.bf16.vlgmr.msra.gmra.mrb[64].mxu0 %v7571_v43 }
 0x1d1   :  { %3007 = vmatpush1.bf16.msra.mxu0 %v7981_v45  ;;  %6370 = vmatprep.mubr.msk.bf16.mxu0 %vm378_vm0, %v7577_v25 }
 0x1d2   :  { %3008 = vmatprep.subr.bf16.mxu0 %v7982_v46 }
 0x1d5   :  { %3009 = vmatpush1.bf16.msra.mxu0 %v7983_v47 }
 0x1d6   :  { %3010 = vmatprep.subr.bf16.mxu0 %v7984_v36 }
 0x1d8   :  { %2840 = vmatmul.mubr.bf16.gmra.mrb[68].mxu0 %v7579_v0 }
 0x1d9   :  { %3011 = vmatpush1.bf16.msra.mxu0 %v8831_v57  ;;  %6371 = vmatprep.mubr.msk.bf16.mxu0 %vm378_vm0, %v7583_v48  ;;  %v10605_v57 = vld [vmem:[#allocation9_spill] sm:$0xff] }
 0x1da   :  { %3012 = vmatprep.subr.bf16.mxu0 %v8842_v3  ;;  %v7591_v3 = vld [vmem:[%s10552_s0 + $0x3b0] ss:$8 sps:$4 sm:$0xff]  }
 0x1dd   :  { %3013 = vmatpush1.bf16.msra.mxu0 %v10603_v19 }
 0x1de   :  { %3014 = vmatprep.subr.bf16.mxu0 %v10604_v4 }
 0x1e0   :  { %2850 = vmatmul.mubr.bf16.gmra.mrb[72].mxu0 %v7585_v52 }
 0x1e1   :  { %6372 = vmatprep.mubr.msk.bf16.mxu0 %vm378_vm0, %v7589_v2  ;;  %3015 = vmatpush1.bf16.msra.mxu0 %v10605_v57 }
 0x1e2   :  { %3016 = vmatprep.subr.bf16.mxu0 %v10606_v12 }
 0x1e5   :  { %3017 = vmatpush1.bf16.msra.mxu0 %v10607_v31 }
 0x1e6   :  { %3018 = vmatprep.subr.bf16.mxu0 %v10608_v63 }
 0x1e8   :  { %2860 = vmatmul.mubr.bf16.gmra.mrb[76].mxu0 %v7591_v3 }
 0x1e9   :  { %6373 = vmatprep.mubr.msk.bf16.mxu0 %vm378_vm0, %v7595_v56  ;;  %3019 = vmatpush1.bf16.msra.mxu0 %v10609_v26 }
 0x1ea   :  { %3020 = vmatprep.subr.bf16.mxu0 %v10610_v60 }
 0x1ed   :  { %3021 = vmatpush1.bf16.msra.mxu0 %v10611_v54 }
 0x1ee   :  { %3022 = vmatprep.subr.bf16.mxu0 %v10612_v42 }
 0x1f0   :  { %2870 = vmatmul.mubr.bf16.gmra.mrb[80].mxu0 %v7597_v15 }
 0x1f1   :  { %6374 = vmatprep.mubr.msk.bf16.mxu0 %vm378_vm0, %v7601_v33  ;;  %3023 = vmatpush1.bf16.msra.mxu0 %v10613_v49 }
 0x1f2   :  { %3024 = vmatprep.subr.bf16.mxu0 %v10614_v30 }
 0x1f5   :  { %3025 = vmatpush1.bf16.msra.mxu0 %v10615_v37 }
 0x1f6   :  { %3026 = vmatprep.subr.bf16.mxu0 %v10616_v23 }
 0x1f8   :  { %2880 = vmatmul.mubr.bf16.gmra.mrb[84].mxu0 %v7603_v11 }
 0x1f9   :  { %6375 = vmatprep.mubr.msk.bf16.mxu0 %vm378_vm0, %v7607_v62  ;;  %3027 = vmatpush1.bf16.msra.mxu0 %v10617_v55 }
 0x1fa   :  { %3028 = vmatprep.subr.bf16.mxu0 %v10618_v58 }
 0x1fd   :  { %3029 = vmatpush1.bf16.msra.mxu0 %v10619_v59 }
 0x200   :  { %2890 = vmatmul.mubr.bf16.gmra.mrb[88].mxu0 %v7609_v44 }
 0x201   :  { %6376 = vmatprep.mubr.msk.bf16.mxu0 %vm378_vm0, %v7613_v32 }
 0x208   :  { %2900 = vmatmul.mubr.bf16.gmra.mrb[92].mxu0 %v7615_v1 }
 0x209   :  { %6393 = vmatprep.mubr.msk.bf16.mxu0 %vm378_vm0, %v7621_v53 }
 0x210   :  { %3039 = vmatmul.mubr.bf16.vlgmr.msra.gmra.mrb[64].mxu0 %v7619_v29 }
 0x211   :  { %6394 = vmatprep.mubr.msk.bf16.mxu0 %vm378_vm0, %v7625_v51 }
 0x218   :  { %3049 = vmatmul.mubr.bf16.gmra.mrb[68].mxu0 %v7627_v41 }
 0x219   :  { %6395 = vmatprep.mubr.msk.bf16.mxu0 %vm378_vm0, %v7631_v5 }
 0x220   :  { %3059 = vmatmul.mubr.bf16.gmra.mrb[72].mxu0 %v7633_v6 }
 0x221   :  { %6396 = vmatprep.mubr.msk.bf16.mxu0 %vm378_vm0, %v7637_v34 }
 0x228   :  { %3069 = vmatmul.mubr.bf16.gmra.mrb[76].mxu0 %v7639_v7 }
 0x229   :  { %6397 = vmatprep.mubr.msk.bf16.mxu0 %vm378_vm0, %v7643_v8 }
 0x230   :  { %3079 = vmatmul.mubr.bf16.gmra.mrb[80].mxu0 %v7645_v9 }
 0x231   :  { %6398 = vmatprep.mubr.msk.bf16.mxu0 %vm378_vm0, %v7649_v10 }
 0x238   :  { %3089 = vmatmul.mubr.bf16.gmra.mrb[84].mxu0 %v7651_v27 }
 0x239   :  { %6399 = vmatprep.mubr.msk.bf16.mxu0 %vm378_vm0, %v7655_v61 }
 0x240   :  { %3099 = vmatmul.mubr.bf16.gmra.mrb[88].mxu0 %v7657_v13 }
 0x241   :  { %6400 = vmatprep.mubr.msk.bf16.mxu0 %vm378_vm0, %v7661_v14 }
 0x248   :  { %3109 = vmatmul.mubr.bf16.gmra.mrb[92].mxu0 %v7663_v50 }
 0x25e   :  { %v2496_v20 = vpop.f32.mrb[32].mxu1 }
 0x25f   :  { %v2587_v38 = vadd.f32 %v9479_v40, %v2496_v20  ;;  %v2498_v21 = vpop.f32.mrb[33].mxu1 }
 0x260   :  { %v2588_v24 = vadd.f32 %v9485_v28, %v2498_v21  ;;  %v2500_v43 = vpop.f32.mrb[34].mxu1 }
 0x261   :  { %v2619_v25 = vmax.f32 %v2587_v38, 0.0  ;;  %v2589_v45 = vadd.f32 %v9479_v40, %v2500_v43  ;;  %v2502_v0 = vpop.f32.mrb[35].mxu1 }
 0x262   :  { %v2620_v36 = vmax.f32 %v2588_v24, 0.0  ;;  %v2590_v19 = vadd.f32 %v9485_v28, %v2502_v0 }
 0x263   :  { %v1936_v46 = vpop.f32.mrb[32].mxu0  ;;  %v2621_v52 = vmax.f32 %v2589_v45, 0.0 }
 0x264   :  { %v2027_v47 = vadd.f32 %v9488_v39, %v1936_v46  ;;  %v1938_v48 = vpop.f32.mrb[33].mxu0  ;;  %v2622_v31 = vmax.f32 %v2590_v19, 0.0 }
 0x265   :  { %v2028_v2 = vadd.f32 %v9492_v22, %v1938_v48  ;;  %v1940_v4 = vpop.f32.mrb[34].mxu0  ;;  %v9500_v3 = vpack.c.bf16 %v2621_v52, %v2619_v25 }
 0x266   :  { %v2029_v57 = vadd.f32 %v9488_v39, %v1940_v4  ;;  %v1942_v12 = vpop.f32.mrb[35].mxu0  ;;  %v2059_v63 = vmax.f32 %v2027_v47, 0.0  ;;  %v9503_v60 = vpack.c.bf16 %v2622_v31, %v2620_v36  ;;  %v2506_v15 = vpop.f32.mrb[36].mxu1 }
 0x267   :  { %v2030_v56 = vadd.f32 %v9492_v22, %v1942_v12  ;;  %v2060_v33 = vmax.f32 %v2028_v2, 0.0  ;;  %v2508_v42 = vpop.f32.mrb[37].mxu1  ;;  %v2591_v37 = vadd.f32 %v9479_v40, %v2506_v15 }
 0x268   :  { %v2061_v26 = vmax.f32 %v2029_v57, 0.0  ;;  %v2510_v30 = vpop.f32.mrb[38].mxu1  ;;  %v2592_v23 = vadd.f32 %v9485_v28, %v2508_v42 }
 0x269   :  { %v2062_v54 = vmax.f32 %v2030_v56, 0.0  ;;  %v2593_v55 = vadd.f32 %v9479_v40, %v2510_v30  ;;  %v2512_v58 = vpop.f32.mrb[39].mxu1  ;;  %v2623_v29 = vmax.f32 %v2591_v37, 0.0 }
 0x26a   :  { %v9505_v49 = vpack.c.bf16 %v2061_v26, %v2059_v63  ;;  %v2594_v59 = vadd.f32 %v9485_v28, %v2512_v58  ;;  %v2624_v51 = vmax.f32 %v2592_v23, 0.0 }
 0x26b   :  { %v9507_v11 = vpack.c.bf16 %v2062_v54, %v2060_v33  ;;  %v1946_v62 = vpop.f32.mrb[36].mxu0  ;;  %v2625_v41 = vmax.f32 %v2593_v55, 0.0 }
 0x26c   :  { %v2031_v44 = vadd.f32 %v9488_v39, %v1946_v62  ;;  %v1948_v32 = vpop.f32.mrb[37].mxu0  ;;  %v2626_v34 = vmax.f32 %v2594_v59, 0.0 }
 0x26d   :  { %v2032_v1 = vadd.f32 %v9492_v22, %v1948_v32  ;;  %v1950_v53 = vpop.f32.mrb[38].mxu0  ;;  %v9517_v8 = vpack.c.bf16 %v2625_v41, %v2623_v29 }
 0x26e   :  { %v2033_v5 = vadd.f32 %v9488_v39, %v1950_v53  ;;  %v1952_v6 = vpop.f32.mrb[39].mxu0  ;;  %v2063_v9 = vmax.f32 %v2031_v44, 0.0  ;;  %v9519_v27 = vpack.c.bf16 %v2626_v34, %v2624_v51  ;;  %v2516_v61 = vpop.f32.mrb[40].mxu1 }
 0x26f   :  { %v2034_v7 = vadd.f32 %v9492_v22, %v1952_v6  ;;  %v2064_v13 = vmax.f32 %v2032_v1, 0.0  ;;  %v2518_v50 = vpop.f32.mrb[41].mxu1  ;;  %v2595_v21 = vadd.f32 %v9479_v40, %v2516_v61 }
 0x270   :  { %v2065_v10 = vmax.f32 %v2033_v5, 0.0  ;;  %v2520_v17 = vpop.f32.mrb[42].mxu1  ;;  %v2596_v24 = vadd.f32 %v9485_v28, %v2518_v50 }
 0x271   :  { %v2066_v14 = vmax.f32 %v2034_v7, 0.0  ;;  %v2597_v43 = vadd.f32 %v9479_v40, %v2520_v17  ;;  %v2522_v25 = vpop.f32.mrb[43].mxu1  ;;  %v2627_v36 = vmax.f32 %v2595_v21, 0.0 }
 0x272   :  { %v9521_v16 = vpack.c.bf16 %v2065_v10, %v2063_v9  ;;  %v2598_v0 = vadd.f32 %v9485_v28, %v2522_v25  ;;  %v2628_v52 = vmax.f32 %v2596_v24, 0.0 }
 0x273   :  { %v9523_v20 = vpack.c.bf16 %v2066_v14, %v2064_v13  ;;  %v1956_v38 = vpop.f32.mrb[40].mxu0  ;;  %v2629_v19 = vmax.f32 %v2597_v43, 0.0 }
 0x274   :  { %v2035_v45 = vadd.f32 %v9488_v39, %v1956_v38  ;;  %v1958_v46 = vpop.f32.mrb[41].mxu0  ;;  %v2630_v57 = vmax.f32 %v2598_v0, 0.0 }
 0x275   :  { %v2036_v47 = vadd.f32 %v9492_v22, %v1958_v46  ;;  %v1960_v48 = vpop.f32.mrb[42].mxu0  ;;  %v9533_v31 = vpack.c.bf16 %v2629_v19, %v2627_v36 }
 0x276   :  { %v2037_v2 = vadd.f32 %v9488_v39, %v1960_v48  ;;  %v1962_v4 = vpop.f32.mrb[43].mxu0  ;;  %v2067_v56 = vmax.f32 %v2035_v45, 0.0  ;;  %v9535_v26 = vpack.c.bf16 %v2630_v57, %v2628_v52  ;;  %v2526_v15 = vpop.f32.mrb[44].mxu1 }
 0x277   :  { %v2038_v12 = vadd.f32 %v9492_v22, %v1962_v4  ;;  %v2068_v33 = vmax.f32 %v2036_v47, 0.0  ;;  %v2528_v42 = vpop.f32.mrb[45].mxu1  ;;  %v2599_v55 = vadd.f32 %v9479_v40, %v2526_v15 }
 0x278   :  { %v2069_v63 = vmax.f32 %v2037_v2, 0.0  ;;  %v2530_v62 = vpop.f32.mrb[46].mxu1  ;;  %v2600_v58 = vadd.f32 %v9485_v28, %v2528_v42 }
 0x279   :  { %v2070_v54 = vmax.f32 %v2038_v12, 0.0  ;;  %v2601_v44 = vadd.f32 %v9479_v40, %v2530_v62  ;;  %v2532_v32 = vpop.f32.mrb[47].mxu1  ;;  %v2631_v41 = vmax.f32 %v2599_v55, 0.0 }
 0x27a   :  { %v9537_v30 = vpack.c.bf16 %v2069_v63, %v2067_v56  ;;  %v2602_v53 = vadd.f32 %v9485_v28, %v2532_v32  ;;  %v2632_v5 = vmax.f32 %v2600_v58, 0.0 }
 0x27b   :  { %v9539_v37 = vpack.c.bf16 %v2070_v54, %v2068_v33  ;;  %v1966_v23 = vpop.f32.mrb[44].mxu0  ;;  %v2633_v6 = vmax.f32 %v2601_v44, 0.0 }
 0x27c   :  { %v2039_v59 = vadd.f32 %v9488_v39, %v1966_v23  ;;  %v1968_v1 = vpop.f32.mrb[45].mxu0  ;;  %v2634_v9 = vmax.f32 %v2602_v53, 0.0 }
 0x27d   :  { %v2040_v29 = vadd.f32 %v9492_v22, %v1968_v1  ;;  %v1970_v51 = vpop.f32.mrb[46].mxu0  ;;  %v9549_v61 = vpack.c.bf16 %v2633_v6, %v2631_v41 }
 0x27e   :  { %v2041_v34 = vadd.f32 %v9488_v39, %v1970_v51  ;;  %v1972_v7 = vpop.f32.mrb[47].mxu0  ;;  %v2071_v13 = vmax.f32 %v2039_v59, 0.0  ;;  %v9551_v50 = vpack.c.bf16 %v2634_v9, %v2632_v5  ;;  %v2536_v17 = vpop.f32.mrb[48].mxu1 }
 0x27f   :  { %v2042_v10 = vadd.f32 %v9492_v22, %v1972_v7  ;;  %v2072_v38 = vmax.f32 %v2040_v29, 0.0  ;;  %v2538_v24 = vpop.f32.mrb[49].mxu1  ;;  %v2603_v0 = vadd.f32 %v9479_v40, %v2536_v17 }
 0x280   :  { %v2073_v14 = vmax.f32 %v2041_v34, 0.0  ;;  %v2540_v25 = vpop.f32.mrb[50].mxu1  ;;  %v2604_v47 = vadd.f32 %v9485_v28, %v2538_v24 }
 0x281   :  { %v2074_v21 = vmax.f32 %v2042_v10, 0.0  ;;  %v2605_v48 = vadd.f32 %v9479_v40, %v2540_v25  ;;  %v2542_v36 = vpop.f32.mrb[51].mxu1  ;;  %v2635_v12 = vmax.f32 %v2603_v0, 0.0 }
 0x282   :  { %v9553_v43 = vpack.c.bf16 %v2073_v14, %v2071_v13  ;;  %v2606_v2 = vadd.f32 %v9485_v28, %v2542_v36  ;;  %v2636_v56 = vmax.f32 %v2604_v47, 0.0 }
 0x283   :  { %v9555_v45 = vpack.c.bf16 %v2074_v21, %v2072_v38  ;;  %v1976_v46 = vpop.f32.mrb[48].mxu0  ;;  %v2637_v63 = vmax.f32 %v2605_v48, 0.0 }
 0x284   :  { %v2043_v52 = vadd.f32 %v9488_v39, %v1976_v46  ;;  %v1978_v19 = vpop.f32.mrb[49].mxu0  ;;  %v2638_v54 = vmax.f32 %v2606_v2, 0.0 }
 0x285   :  { %v2044_v4 = vadd.f32 %v9492_v22, %v1978_v19  ;;  %v1980_v57 = vpop.f32.mrb[50].mxu0  ;;  %v9565_v62 = vpack.c.bf16 %v2637_v63, %v2635_v12 }
 0x286   :  { %v2045_v15 = vadd.f32 %v9488_v39, %v1980_v57  ;;  %v1982_v33 = vpop.f32.mrb[51].mxu0  ;;  %v2075_v23 = vmax.f32 %v2043_v52, 0.0  ;;  %v9567_v58 = vpack.c.bf16 %v2638_v54, %v2636_v56  ;;  %v2546_v44 = vpop.f32.mrb[52].mxu1 }
 0x287   :  { %v2046_v42 = vadd.f32 %v9492_v22, %v1982_v33  ;;  %v2076_v32 = vmax.f32 %v2044_v4, 0.0  ;;  %v2548_v1 = vpop.f32.mrb[53].mxu1  ;;  %v2607_v5 = vadd.f32 %v9479_v40, %v2546_v44 }
 0x288   :  { %v2077_v55 = vmax.f32 %v2045_v15, 0.0  ;;  %v2550_v29 = vpop.f32.mrb[54].mxu1  ;;  %v2608_v6 = vadd.f32 %v9485_v28, %v2548_v1 }
 0x289   :  { %v2078_v59 = vmax.f32 %v2046_v42, 0.0  ;;  %v2609_v34 = vadd.f32 %v9479_v40, %v2550_v29  ;;  %v2552_v7 = vpop.f32.mrb[55].mxu1  ;;  %v2639_v38 = vmax.f32 %v2607_v5, 0.0 }
 0x28a   :  { %v9569_v53 = vpack.c.bf16 %v2077_v55, %v2075_v23  ;;  %v2610_v13 = vadd.f32 %v9485_v28, %v2552_v7  ;;  %v2640_v21 = vmax.f32 %v2608_v6, 0.0 }
 0x28b   :  { %v9571_v51 = vpack.c.bf16 %v2078_v59, %v2076_v32  ;;  %v1986_v41 = vpop.f32.mrb[52].mxu0  ;;  %v2641_v24 = vmax.f32 %v2609_v34, 0.0 }
 0x28c   :  { %v2047_v9 = vadd.f32 %v9488_v39, %v1986_v41  ;;  %v1988_v10 = vpop.f32.mrb[53].mxu0  ;;  %v2642_v0 = vmax.f32 %v2610_v13, 0.0 }
 0x28d   :  { %v2048_v14 = vadd.f32 %v9492_v22, %v1988_v10  ;;  %v1990_v17 = vpop.f32.mrb[54].mxu0  ;;  %v9581_v48 = vpack.c.bf16 %v2641_v24, %v2639_v38 }
 0x28e   :  { %v2049_v25 = vadd.f32 %v9488_v39, %v1990_v17  ;;  %v1992_v46 = vpop.f32.mrb[55].mxu0  ;;  %v2079_v36 = vmax.f32 %v2047_v9, 0.0  ;;  %v9583_v19 = vpack.c.bf16 %v2642_v0, %v2640_v21  ;;  %v2556_v2 = vpop.f32.mrb[56].mxu1 }
 0x28f   :  { %v2050_v47 = vadd.f32 %v9492_v22, %v1992_v46  ;;  %v2080_v4 = vmax.f32 %v2048_v14, 0.0  ;;  %v2558_v12 = vpop.f32.mrb[57].mxu1  ;;  %v2611_v54 = vadd.f32 %v9479_v40, %v2556_v2 }
 0x290   :  { %v2081_v52 = vmax.f32 %v2049_v25, 0.0  ;;  %v2560_v63 = vpop.f32.mrb[58].mxu1  ;;  %v2612_v42 = vadd.f32 %v9485_v28, %v2558_v12 }
 0x291   :  { %v2082_v57 = vmax.f32 %v2050_v47, 0.0  ;;  %v2613_v23 = vadd.f32 %v9479_v40, %v2560_v63  ;;  %v2562_v55 = vpop.f32.mrb[59].mxu1  ;;  %v2643_v41 = vmax.f32 %v2611_v54, 0.0 }
 0x292   :  { %v9585_v56 = vpack.c.bf16 %v2081_v52, %v2079_v36  ;;  %v2614_v59 = vadd.f32 %v9485_v28, %v2562_v55  ;;  %v2644_v5 = vmax.f32 %v2612_v42, 0.0 }
 0x293   :  { %v9587_v15 = vpack.c.bf16 %v2082_v57, %v2080_v4  ;;  %v1996_v33 = vpop.f32.mrb[56].mxu0  ;;  %v2645_v6 = vmax.f32 %v2613_v23, 0.0 }
 0x294   :  { %v2051_v44 = vadd.f32 %v9488_v39, %v1996_v33  ;;  %v1998_v32 = vpop.f32.mrb[57].mxu0  ;;  %v2646_v9 = vmax.f32 %v2614_v59, 0.0 }
 0x295   :  { %v2052_v1 = vadd.f32 %v9492_v22, %v1998_v32  ;;  %v2000_v29 = vpop.f32.mrb[58].mxu0  ;;  %v9597_v13 = vpack.c.bf16 %v2645_v6, %v2643_v41 }
 0x296   :  { %v2053_v34 = vadd.f32 %v9488_v39, %v2000_v29  ;;  %v2002_v7 = vpop.f32.mrb[59].mxu0  ;;  %v2083_v14 = vmax.f32 %v2051_v44, 0.0  ;;  %v9599_v38 = vpack.c.bf16 %v2646_v9, %v2644_v5  ;;  %v2566_v21 = vpop.f32.mrb[60].mxu1 }
 0x297   :  { %v2054_v10 = vadd.f32 %v9492_v22, %v2002_v7  ;;  %v2084_v24 = vmax.f32 %v2052_v1, 0.0  ;;  %v2568_v46 = vpop.f32.mrb[61].mxu1  ;;  %v2615_v2 = vadd.f32 %v9479_v40, %v2566_v21 }
 0x298   :  { %v2085_v17 = vmax.f32 %v2053_v34, 0.0  ;;  %v2570_v47 = vpop.f32.mrb[62].mxu1  ;;  %v2616_v4 = vadd.f32 %v9485_v28, %v2568_v46 }
 0x299   :  { %v2086_v25 = vmax.f32 %v2054_v10, 0.0  ;;  %v2617_v57 = vadd.f32 %v9479_v40, %v2570_v47  ;;  %v2572_v12 = vpop.f32.mrb[63].mxu1  ;;  %v2647_v55 = vmax.f32 %v2615_v2, 0.0  ;;  %v7664_v2 = vld [vmem:[%s10556_s5 + $0x100] ss:$8 sps:$4 sm:$0xff]  }
 0x29a   :  { %v9601_v0 = vpack.c.bf16 %v2085_v17, %v2083_v14  ;;  %v2618_v54 = vadd.f32 %v9485_v28, %v2572_v12  ;;  %v2648_v44 = vmax.f32 %v2616_v4, 0.0  ;;  %v7666_v12 = vld [vmem:[%s10556_s5 + $0x104] ss:$8 sps:$4 sm:$0xff]  }
 0x29b   :  { %v9603_v36 = vpack.c.bf16 %v2086_v25, %v2084_v24  ;;  %v2006_v52 = vpop.f32.mrb[60].mxu0  ;;  %v2649_v32 = vmax.f32 %v2617_v57, 0.0  ;;  %3786 = vmatprep.subr.bf16.mxu0 %v7666_v12  ;;  %v7673_v12 = vld [vmem:[%s10556_s5 + $0x130] ss:$8 sps:$4 sm:$0xff]  }
 0x29c   :  { %v2055_v63 = vadd.f32 %v9488_v39, %v2006_v52  ;;  %v2008_v33 = vpop.f32.mrb[61].mxu0  ;;  %v2650_v29 = vmax.f32 %v2618_v54, 0.0  ;;  %v7669_v54 = vld [vmem:[%s10556_s5 + $0x114] ss:$8 sps:$4 sm:$0xff]   ;;  %3787 = vmatpush1.bf16.msra.mxu0 %v7664_v2 }
 0x29d   :  { %v2056_v42 = vadd.f32 %v9492_v22, %v2008_v33  ;;  %v2010_v23 = vpop.f32.mrb[62].mxu0  ;;  %v9613_v5 = vpack.c.bf16 %v2649_v32, %v2647_v55  ;;  %3788 = vmatprep.subr.bf16.mxu0 %v7669_v54  ;;  %v7988_v54 = vld [vmem:[%s10553_s3 + $0x24] ss:$8 sps:$4 sm:$0xff]  }
 0x29e   :  { %v2057_v59 = vadd.f32 %v9488_v39, %v2010_v23  ;;  %v2012_v1 = vpop.f32.mrb[63].mxu0  ;;  %v2087_v6 = vmax.f32 %v2055_v63, 0.0  ;;  %v9615_v7 = vpack.c.bf16 %v2650_v29, %v2648_v44  ;;  %v7667_v44 = vld [vmem:[%s10556_s5 + $0x110] ss:$8 sps:$4 sm:$0xff]  }
 0x29f   :  { %v2058_v41 = vadd.f32 %v9492_v22, %v2012_v1  ;;  %v2088_v9 = vmax.f32 %v2056_v42, 0.0  ;;  %v7672_v1 = vld [vmem:[%s10556_s5 + $0x124] ss:$8 sps:$4 sm:$0xff]  }
 0x2a0   :  { %v2089_v34 = vmax.f32 %v2057_v59, 0.0  ;;  %3789 = vmatpush1.bf16.msra.mxu0 %v7667_v44 }
 0x2a1   :  { %v2090_v10 = vmax.f32 %v2058_v41, 0.0  ;;  %3790 = vmatprep.subr.bf16.mxu0 %v7672_v1 }
 0x2a2   :  { %v9617_v14 = vpack.c.bf16 %v2089_v34, %v2087_v6 }
 0x2a3   :  { %v9619_v17 = vpack.c.bf16 %v2090_v10, %v2088_v9  ;;  %v7985_v10 = vld [vmem:[%s10553_s3] ss:$8 sps:$4 sm:$0xff]  }
 0x2e3   :  { %v3040_v21 = vpop.f32.mrb[64].mxu0 }
 0x2e4   :  { %v3119_v24 = vadd.f32 %v3040_v21, %v9479_v40  ;;  %v3042_v39 = vpop.f32.mrb[65].mxu0  ;;  %v7670_v21 = vld [vmem:[%s10556_s5 + $0x120] ss:$8 sps:$4 sm:$0xff]  }
 0x2e5   :  { %v3120_v25 = vadd.f32 %v3042_v39, %v9485_v28  ;;  %v3044_v46 = vpop.f32.mrb[66].mxu0  ;;  %3791 = vmatpush1.bf16.msra.mxu0 %v7670_v21 }
 0x2e6   :  { %v3121_v22 = vadd.f32 %v3044_v46, %v9479_v40  ;;  %v3046_v47 = vpop.f32.mrb[67].mxu0  ;;  %v3151_v4 = vmax.f32 %v3119_v24, 0.0  ;;  %v7675_v46 = vld [vmem:[%s10556_s5 + $0x134] ss:$8 sps:$4 sm:$0xff]  }
 0x2e7   :  { %v3122_v52 = vadd.f32 %v3046_v47, %v9485_v28  ;;  %v3152_v63 = vmax.f32 %v3120_v25, 0.0  ;;  %v7986_v25 = vld [vmem:[%s10553_s3 + $0x14] ss:$8 sps:$4 sm:$0xff]   ;;  %3792 = vmatprep.subr.bf16.mxu0 %v7675_v46 }
 0x2e8   :  { %v3153_v57 = vmax.f32 %v3121_v22, 0.0 }
 0x2e9   :  { %v3154_v33 = vmax.f32 %v3122_v52, 0.0  ;;  %3793 = vmatpush1.bf16.msra.mxu0 %v7673_v12 }
 0x2ea   :  { %v3183_v42 = vpack.c.bf16 %v3153_v57, %v3151_v4  ;;  %v7987_v57 = vld [vmem:[%s10553_s3 + $0x10] ss:$8 sps:$4 sm:$0xff]  }
 0x2eb   :  { %v3184_v23 = vpack.c.bf16 %v3154_v33, %v3152_v63  ;;  %v3050_v55 = vpop.f32.mrb[68].mxu0 }
 0x2ec   :  { %v3123_v32 = vadd.f32 %v3050_v55, %v9479_v40  ;;  %v3052_v59 = vpop.f32.mrb[69].mxu0 }
 0x2ed   :  { %v3124_v29 = vadd.f32 %v3052_v59, %v9485_v28  ;;  %v3054_v41 = vpop.f32.mrb[70].mxu0  ;;  %3231 = vmatprep.mubr.bf16.mxu1 %v3184_v23  ;;  %v7676_v59 = vld [vmem:[%s10556_s5 + $0x140] ss:$8 sps:$4 sm:$0xff]  }
 0x2ee   :  { %v3125_v6 = vadd.f32 %v3054_v41, %v9479_v40  ;;  %v3056_v34 = vpop.f32.mrb[71].mxu0  ;;  %3232 = vmatmul.mubr.bf16.vlgmr.msra.gmra.mrb[64].mxu1 %v3183_v42  ;;  %v3155_v24 = vmax.f32 %v3123_v32, 0.0  ;;  %v7678_v42 = vld [vmem:[%s10556_s5 + $0x144] ss:$8 sps:$4 sm:$0xff]   ;;  %v7681_v41 = vld [vmem:[%s10556_s5 + $0x154] ss:$8 sps:$4 sm:$0xff]  }
 0x2ef   :  { %v3126_v9 = vadd.f32 %v3056_v34, %v9485_v28  ;;  %3313 = vmatpush1.bf16.msra.mxu1 %v7985_v10  ;;  %v3156_v22 = vmax.f32 %v3124_v29, 0.0  ;;  %v7989_v29 = vld [vmem:[%s10553_s3 + $0x20] ss:$8 sps:$4 sm:$0xff]   ;;  %3794 = vmatprep.subr.bf16.mxu0 %v7678_v42  ;;  %v7687_v42 = vld [vmem:[%s10556_s5 + $0x174] ss:$8 sps:$4 sm:$0xff]  }
 0x2f0   :  { %v3157_v39 = vmax.f32 %v3125_v6, 0.0  ;;  %3314 = vmatprep.subr.bf16.mxu1 %v7986_v25  ;;  %v7684_v25 = vld [vmem:[%s10556_s5 + $0x164] ss:$8 sps:$4 sm:$0xff]   ;;  %3795 = vmatpush1.bf16.msra.mxu0 %v7676_v59  ;;  %v7994_v59 = vld [vmem:[%s10553_s3 + $0x54] ss:$8 sps:$4 sm:$0xff]  }
 0x2f1   :  { %v3158_v47 = vmax.f32 %v3126_v9, 0.0  ;;  %v7990_v9 = vld [vmem:[%s10553_s3 + $0x34] ss:$8 sps:$4 sm:$0xff]   ;;  %3796 = vmatprep.subr.bf16.mxu0 %v7681_v41  ;;  %v7685_v41 = vld [vmem:[%s10556_s5 + $0x170] ss:$8 sps:$4 sm:$0xff]  }
 0x2f2   :  { %v3185_v52 = vpack.c.bf16 %v3157_v39, %v3155_v24  ;;  %v7679_v24 = vld [vmem:[%s10556_s5 + $0x150] ss:$8 sps:$4 sm:$0xff]  }
 0x2f3   :  { %v3186_v2 = vpack.c.bf16 %v3158_v47, %v3156_v22  ;;  %v3060_v4 = vpop.f32.mrb[72].mxu0  ;;  %3315 = vmatpush1.bf16.msra.mxu1 %v7987_v57  ;;  %v7991_v47 = vld [vmem:[%s10553_s3 + $0x30] ss:$8 sps:$4 sm:$0xff]  }
 0x2f4   :  { %v3127_v63 = vadd.f32 %v3060_v4, %v9479_v40  ;;  %v3062_v33 = vpop.f32.mrb[73].mxu0  ;;  %3316 = vmatprep.subr.bf16.mxu1 %v7988_v54  ;;  %v7992_v4 = vld [vmem:[%s10553_s3 + $0x44] ss:$8 sps:$4 sm:$0xff]   ;;  %3797 = vmatpush1.bf16.msra.mxu0 %v7679_v24 }
 0x2f5   :  { %v3128_v23 = vadd.f32 %v3062_v33, %v9485_v28  ;;  %v3064_v55 = vpop.f32.mrb[74].mxu0  ;;  %3241 = vmatprep.mubr.bf16.mxu1 %v3186_v2  ;;  %3798 = vmatprep.subr.bf16.mxu0 %v7684_v25  ;;  %v7996_v25 = vld [vmem:[%s10553_s3 + $0x64] ss:$8 sps:$4 sm:$0xff]  }
 0x2f6   :  { %v3129_v44 = vadd.f32 %v3064_v55, %v9479_v40  ;;  %v3066_v32 = vpop.f32.mrb[75].mxu0  ;;  %3242 = vmatmul.mubr.bf16.gmra.mrb[68].mxu1 %v3185_v52  ;;  %v3159_v6 = vmax.f32 %v3127_v63, 0.0  ;;  %v7682_v63 = vld [vmem:[%s10556_s5 + $0x160] ss:$8 sps:$4 sm:$0xff]  }
 0x2f7   :  { %v3130_v1 = vadd.f32 %v3066_v32, %v9485_v28  ;;  %3317 = vmatpush1.bf16.msra.mxu1 %v7989_v29  ;;  %v3160_v10 = vmax.f32 %v3128_v23, 0.0  ;;  %v7993_v55 = vld [vmem:[%s10553_s3 + $0x40] ss:$8 sps:$4 sm:$0xff]  }
 0x2f8   :  { %v3161_v34 = vmax.f32 %v3129_v44, 0.0  ;;  %3318 = vmatprep.subr.bf16.mxu1 %v7990_v9  ;;  %3799 = vmatpush1.bf16.msra.mxu0 %v7682_v63 }
 0x2f9   :  { %v3162_v21 = vmax.f32 %v3130_v1, 0.0  ;;  %3800 = vmatprep.subr.bf16.mxu0 %v7687_v42 }
 0x2fa   :  { %v3187_v39 = vpack.c.bf16 %v3161_v34, %v3159_v6  ;;  %v7690_v34 = vld [vmem:[%s10556_s5 + $0x184] ss:$8 sps:$4 sm:$0xff]  }
 0x2fb   :  { %v3188_v46 = vpack.c.bf16 %v3162_v21, %v3160_v10  ;;  %v3070_v22 = vpop.f32.mrb[76].mxu0  ;;  %3319 = vmatpush1.bf16.msra.mxu1 %v7991_v47  ;;  %v7995_v21 = vld [vmem:[%s10553_s3 + $0x50] ss:$8 sps:$4 sm:$0xff]   ;;  %v7688_v47 = vld [vmem:[%s10556_s5 + $0x180] ss:$8 sps:$4 sm:$0xff]  }
 0x2fc   :  { %v3131_v52 = vadd.f32 %v3070_v22, %v9479_v40  ;;  %v3072_v2 = vpop.f32.mrb[77].mxu0  ;;  %3320 = vmatprep.subr.bf16.mxu1 %v7992_v4  ;;  %v7693_v4 = vld [vmem:[%s10556_s5 + $0x194] ss:$8 sps:$4 sm:$0xff]   ;;  %3801 = vmatpush1.bf16.msra.mxu0 %v7685_v41 }
 0x2fd   :  { %v3132_v57 = vadd.f32 %v3072_v2, %v9485_v28  ;;  %v3074_v12 = vpop.f32.mrb[78].mxu0  ;;  %3251 = vmatprep.mubr.bf16.mxu1 %v3188_v46  ;;  %3802 = vmatprep.subr.bf16.mxu0 %v7690_v34  ;;  %v8000_v34 = vld [vmem:[%s10553_s3 + $0x84] ss:$8 sps:$4 sm:$0xff]  }
 0x2fe   :  { %v3133_v33 = vadd.f32 %v3074_v12, %v9479_v40  ;;  %v3076_v54 = vpop.f32.mrb[79].mxu0  ;;  %3252 = vmatmul.mubr.bf16.gmra.mrb[72].mxu1 %v3187_v39  ;;  %v3163_v44 = vmax.f32 %v3131_v52, 0.0  ;;  %v7997_v12 = vld [vmem:[%s10553_s3 + $0x60] ss:$8 sps:$4 sm:$0xff]  }
 0x2ff   :  { %v3134_v23 = vadd.f32 %v3076_v54, %v9485_v28  ;;  %3321 = vmatpush1.bf16.msra.mxu1 %v7993_v55  ;;  %v3164_v1 = vmax.f32 %v3132_v57, 0.0  ;;  %v7998_v54 = vld [vmem:[%s10553_s3 + $0x74] ss:$8 sps:$4 sm:$0xff]   ;;  %v7691_v55 = vld [vmem:[%s10556_s5 + $0x190] ss:$8 sps:$4 sm:$0xff]  }
 0x300   :  { %v3165_v32 = vmax.f32 %v3133_v33, 0.0  ;;  %3322 = vmatprep.subr.bf16.mxu1 %v7994_v59  ;;  %3803 = vmatpush1.bf16.msra.mxu0 %v7688_v47 }
 0x301   :  { %v3166_v29 = vmax.f32 %v3134_v23, 0.0  ;;  %3804 = vmatprep.subr.bf16.mxu0 %v7693_v4 }
 0x302   :  { %v3189_v6 = vpack.c.bf16 %v3165_v32, %v3163_v44  ;;  %v7696_v32 = vld [vmem:[%s10556_s5 + $0x1a4] ss:$8 sps:$4 sm:$0xff]  }
 0x303   :  { %v3190_v9 = vpack.c.bf16 %v3166_v29, %v3164_v1  ;;  %v3080_v10 = vpop.f32.mrb[80].mxu0  ;;  %3323 = vmatpush1.bf16.msra.mxu1 %v7995_v21  ;;  %v7999_v29 = vld [vmem:[%s10553_s3 + $0x70] ss:$8 sps:$4 sm:$0xff]  }
 0x304   :  { %v3135_v24 = vadd.f32 %v3080_v10, %v9479_v40  ;;  %v3082_v39 = vpop.f32.mrb[81].mxu0  ;;  %3324 = vmatprep.subr.bf16.mxu1 %v7996_v25  ;;  %v8001_v25 = vld [vmem:[%s10553_s3 + $0x80] ss:$8 sps:$4 sm:$0xff]   ;;  %3805 = vmatpush1.bf16.msra.mxu0 %v7691_v55 }
 0x305   :  { %v3136_v46 = vadd.f32 %v3082_v39, %v9485_v28  ;;  %v3084_v22 = vpop.f32.mrb[82].mxu0  ;;  %3261 = vmatprep.mubr.bf16.mxu1 %v3190_v9  ;;  %3806 = vmatprep.subr.bf16.mxu0 %v7696_v32 }
 0x306   :  { %v3137_v52 = vadd.f32 %v3084_v22, %v9479_v40  ;;  %v3086_v2 = vpop.f32.mrb[83].mxu0  ;;  %3262 = vmatmul.mubr.bf16.gmra.mrb[76].mxu1 %v3189_v6  ;;  %v3167_v63 = vmax.f32 %v3135_v24, 0.0 }
 0x307   :  { %v3138_v57 = vadd.f32 %v3086_v2, %v9485_v28  ;;  %3325 = vmatpush1.bf16.msra.mxu1 %v7997_v12  ;;  %v3168_v42 = vmax.f32 %v3136_v46, 0.0  ;;  %v7694_v46 = vld [vmem:[%s10556_s5 + $0x1a0] ss:$8 sps:$4 sm:$0xff]   ;;  %v7699_v2 = vld [vmem:[%s10556_s5 + $0x1b4] ss:$8 sps:$4 sm:$0xff]  }
 0x308   :  { %v3169_v33 = vmax.f32 %v3137_v52, 0.0  ;;  %3326 = vmatprep.subr.bf16.mxu1 %v7998_v54  ;;  %v8002_v52 = vld [vmem:[%s10553_s3 + $0x94] ss:$8 sps:$4 sm:$0xff]   ;;  %v8003_v54 = vld [vmem:[%s10553_s3 + $0x90] ss:$8 sps:$4 sm:$0xff]   ;;  %3807 = vmatpush1.bf16.msra.mxu0 %v7694_v46 }
 0x309   :  { %v3170_v23 = vmax.f32 %v3138_v57, 0.0  ;;  %3808 = vmatprep.subr.bf16.mxu0 %v7699_v2  ;;  %v8008_v2 = vld [vmem:[%s10553_s3 + $0xc4] ss:$8 sps:$4 sm:$0xff]  }
 0x30a   :  { %v3191_v44 = vpack.c.bf16 %v3169_v33, %v3167_v63 }
 0x30b   :  { %v3192_v59 = vpack.c.bf16 %v3170_v23, %v3168_v42  ;;  %v3090_v1 = vpop.f32.mrb[84].mxu0  ;;  %3327 = vmatpush1.bf16.msra.mxu1 %v7999_v29  ;;  %v7697_v42 = vld [vmem:[%s10556_s5 + $0x1b0] ss:$8 sps:$4 sm:$0xff]  }
 0x30c   :  { %v3139_v41 = vadd.f32 %v3090_v1, %v9479_v40  ;;  %v3092_v6 = vpop.f32.mrb[85].mxu0  ;;  %3328 = vmatprep.subr.bf16.mxu1 %v8000_v34  ;;  %3809 = vmatpush1.bf16.msra.mxu0 %v7697_v42 }
 0x30d   :  { %v3140_v9 = vadd.f32 %v3092_v6, %v9485_v28  ;;  %v3094_v10 = vpop.f32.mrb[86].mxu0  ;;  %3271 = vmatprep.mubr.bf16.mxu1 %v3192_v59  ;;  %v8005_v6 = vld [vmem:[%s10553_s3 + $0xa0] ss:$8 sps:$4 sm:$0xff]  }
 0x30e   :  { %v3141_v21 = vadd.f32 %v3094_v10, %v9479_v40  ;;  %v3096_v24 = vpop.f32.mrb[87].mxu0  ;;  %3272 = vmatmul.mubr.bf16.gmra.mrb[80].mxu1 %v3191_v44  ;;  %v3171_v22 = vmax.f32 %v3139_v41, 0.0  ;;  %v8004_v44 = vld [vmem:[%s10553_s3 + $0xa4] ss:$8 sps:$4 sm:$0xff]   ;;  %v8006_v10 = vld [vmem:[%s10553_s3 + $0xb4] ss:$8 sps:$4 sm:$0xff]  }
 0x30f   :  { %v3142_v39 = vadd.f32 %v3096_v24, %v9485_v28  ;;  %3329 = vmatpush1.bf16.msra.mxu1 %v8001_v25  ;;  %v3172_v4 = vmax.f32 %v3140_v9, 0.0 }
 0x310   :  { %v3173_v47 = vmax.f32 %v3141_v21, 0.0  ;;  %3330 = vmatprep.subr.bf16.mxu1 %v8002_v52 }
 0x311   :  { %v3174_v57 = vmax.f32 %v3142_v39, 0.0 }
 0x312   :  { %v3193_v12 = vpack.c.bf16 %v3173_v47, %v3171_v22  ;;  %v8007_v22 = vld [vmem:[%s10553_s3 + $0xb0] ss:$8 sps:$4 sm:$0xff]  }
 0x313   :  { %v3194_v63 = vpack.c.bf16 %v3174_v57, %v3172_v4  ;;  %v3100_v33 = vpop.f32.mrb[88].mxu0  ;;  %3331 = vmatpush1.bf16.msra.mxu1 %v8003_v54  ;;  %v8009_v54 = vld [vmem:[%s10553_s3 + $0xc0] ss:$8 sps:$4 sm:$0xff]  }
 0x314   :  { %v3143_v23 = vadd.f32 %v3100_v33, %v9479_v40  ;;  %v3102_v55 = vpop.f32.mrb[89].mxu0  ;;  %3332 = vmatprep.subr.bf16.mxu1 %v8004_v44 }
 0x315   :  { %v3144_v32 = vadd.f32 %v3102_v55, %v9485_v28  ;;  %v3104_v59 = vpop.f32.mrb[90].mxu0  ;;  %3281 = vmatprep.mubr.bf16.mxu1 %v3194_v63  ;;  %v8010_v55 = vld [vmem:[%s10553_s3 + $0xd4] ss:$8 sps:$4 sm:$0xff]  }
 0x316   :  { %v3145_v1 = vadd.f32 %v3104_v59, %v9479_v40  ;;  %v3106_v29 = vpop.f32.mrb[91].mxu0  ;;  %3282 = vmatmul.mubr.bf16.gmra.mrb[84].mxu1 %v3193_v12  ;;  %v3175_v34 = vmax.f32 %v3143_v23, 0.0 }
 0x317   :  { %v3146_v41 = vadd.f32 %v3106_v29, %v9485_v28  ;;  %3333 = vmatpush1.bf16.msra.mxu1 %v8005_v6  ;;  %v3176_v21 = vmax.f32 %v3144_v32, 0.0  ;;  %v8013_v29 = vld [vmem:[%s10553_s3 + $0xe0] ss:$8 sps:$4 sm:$0xff]   ;;  %v8015_v6 = vld [vmem:[%s10553_s3 + $0xf0] ss:$8 sps:$4 sm:$0xff]  }
 0x318   :  { %v3177_v9 = vmax.f32 %v3145_v1, 0.0  ;;  %3334 = vmatprep.subr.bf16.mxu1 %v8006_v10  ;;  %v8012_v1 = vld [vmem:[%s10553_s3 + $0xe4] ss:$8 sps:$4 sm:$0xff]  }
 0x319   :  { %v3178_v24 = vmax.f32 %v3146_v41, 0.0  ;;  %v8014_v41 = vld [vmem:[%s10553_s3 + $0xf4] ss:$8 sps:$4 sm:$0xff]  }
 0x31a   :  { %v3195_v39 = vpack.c.bf16 %v3177_v9, %v3175_v34 }
 0x31b   :  { %v3196_v25 = vpack.c.bf16 %v3178_v24, %v3176_v21  ;;  %v3110_v46 = vpop.f32.mrb[92].mxu0  ;;  %3335 = vmatpush1.bf16.msra.mxu1 %v8007_v22 }
 0x31c   :  { %v3147_v47 = vadd.f32 %v3110_v46, %v9479_v40  ;;  %v3112_v52 = vpop.f32.mrb[93].mxu0  ;;  %3336 = vmatprep.subr.bf16.mxu1 %v8008_v2 }
 0x31d   :  { %v3148_v4 = vadd.f32 %v3112_v52, %v9485_v28  ;;  %v3114_v57 = vpop.f32.mrb[94].mxu0  ;;  %3291 = vmatprep.mubr.bf16.mxu1 %v3196_v25 }
 0x31e   :  { %v3149_v12 = vadd.f32 %v3114_v57, %v9479_v40  ;;  %v3116_v63 = vpop.f32.mrb[95].mxu0  ;;  %3292 = vmatmul.mubr.bf16.gmra.mrb[88].mxu1 %v3195_v39  ;;  %v3179_v42 = vmax.f32 %v3147_v47, 0.0 }
 0x31f   :  { %v3150_v33 = vadd.f32 %v3116_v63, %v9485_v28  ;;  %3337 = vmatpush1.bf16.msra.mxu1 %v8009_v54  ;;  %v3180_v44 = vmax.f32 %v3148_v4, 0.0  ;;  %v8011_v28 = vld [vmem:[%s10553_s3 + $0xd0] ss:$8 sps:$4 sm:$0xff]   ;;  %v7712_v63 = vld [vmem:[%s10556_s5] ss:$8 sps:$4 sm:$0xff]  }
 0x320   :  { %v3181_v23 = vmax.f32 %v3149_v12, 0.0  ;;  %3338 = vmatprep.subr.bf16.mxu1 %v8010_v55 }
 0x321   :  { %v3182_v32 = vmax.f32 %v3150_v33, 0.0 }
 0x322   :  { %v3197_v59 = vpack.c.bf16 %v3181_v23, %v3179_v42  ;;  %v7717_v42 = vld [vmem:[%s10556_s5 + $0x14] ss:$8 sps:$4 sm:$0xff]  }
 0x323   :  { %v3198_v40 = vpack.c.bf16 %v3182_v32, %v3180_v44  ;;  %3339 = vmatpush1.bf16.msra.mxu1 %v8011_v28 }
 0x324   :  { %3340 = vmatprep.subr.bf16.mxu1 %v8012_v1 }
 0x325   :  { %3301 = vmatprep.mubr.bf16.mxu1 %v3198_v40  ;;  %v7715_v40 = vld [vmem:[%s10556_s5 + $0x10] ss:$8 sps:$4 sm:$0xff]  }
 0x326   :  { %3302 = vmatmul.mubr.bf16.gmra.mrb[92].mxu1 %v3197_v59 }
 0x327   :  { %3341 = vmatpush1.bf16.msra.mxu1 %v8013_v29  ;;  %3344 = vmatprep.mubr.bf16.mxu1 %v9503_v60  ;;  %v7700_v60 = vld [vmem:[%s10556_s5 + $0x1c0] ss:$8 sps:$4 sm:$0xff]   ;;  %v7720_v29 = vld [vmem:[%s10556_s5 + $0x24] ss:$8 sps:$4 sm:$0xff]  }
 0x328   :  { %3342 = vmatprep.subr.bf16.mxu1 %v8014_v41 }
 0x32b   :  { %3343 = vmatpush1.bf16.msra.mxu1 %v8015_v6 }
 0x32e   :  { %3345 = vmatmul.mubr.bf16.vlgmr.msra.gmra.mrb[64].mxu1 %v9500_v3  ;;  %v7702_v3 = vld [vmem:[%s10556_s5 + $0x1c4] ss:$8 sps:$4 sm:$0xff]  }
 0x32f   :  { %3354 = vmatprep.mubr.bf16.mxu1 %v9519_v27  ;;  %3810 = vmatprep.subr.bf16.mxu0 %v7702_v3  ;;  %v7705_v27 = vld [vmem:[%s10556_s5 + $0x1d4] ss:$8 sps:$4 sm:$0xff]  }
 0x330   :  { %3811 = vmatpush1.bf16.msra.mxu0 %v7700_v60 }
 0x331   :  { %3812 = vmatprep.subr.bf16.mxu0 %v7705_v27  ;;  %v7718_v27 = vld [vmem:[%s10556_s5 + $0x20] ss:$8 sps:$4 sm:$0xff]  }
 0x336   :  { %3355 = vmatmul.mubr.bf16.gmra.mrb[68].mxu1 %v9517_v8  ;;  %v7703_v8 = vld [vmem:[%s10556_s5 + $0x1d0] ss:$8 sps:$4 sm:$0xff]  }
 0x337   :  { %3364 = vmatprep.mubr.bf16.mxu1 %v9535_v26  ;;  %3813 = vmatpush1.bf16.msra.mxu0 %v7703_v8  ;;  %v7706_v26 = vld [vmem:[%s10556_s5 + $0x1e0] ss:$8 sps:$4 sm:$0xff]  }
 0x33e   :  { %3365 = vmatmul.mubr.bf16.gmra.mrb[72].mxu1 %v9533_v31  ;;  %v7708_v31 = vld [vmem:[%s10556_s5 + $0x1e4] ss:$8 sps:$4 sm:$0xff]  }
 0x33f   :  { %3374 = vmatprep.mubr.bf16.mxu1 %v9551_v50  ;;  %3814 = vmatprep.subr.bf16.mxu0 %v7708_v31  ;;  %v7709_v50 = vld [vmem:[%s10556_s5 + $0x1f0] ss:$8 sps:$4 sm:$0xff]  }
 0x340   :  { %3815 = vmatpush1.bf16.msra.mxu0 %v7706_v26 }
 0x346   :  { %3375 = vmatmul.mubr.bf16.gmra.mrb[76].mxu1 %v9549_v61  ;;  %v7711_v61 = vld [vmem:[%s10556_s5 + $0x1f4] ss:$8 sps:$4 sm:$0xff]  }
 0x347   :  { %3384 = vmatprep.mubr.bf16.mxu1 %v9567_v58  ;;  %3816 = vmatprep.subr.bf16.mxu0 %v7711_v61  ;;  %v7723_v61 = vld [vmem:[%s10556_s5 + $0x34] ss:$8 sps:$4 sm:$0xff]  }
 0x348   :  { %3817 = vmatpush1.bf16.msra.mxu0 %v7709_v50 }
 0x34e   :  { %3385 = vmatmul.mubr.bf16.gmra.mrb[80].mxu1 %v9565_v62  ;;  %v7714_v62 = vld [vmem:[%s10556_s5 + $0x4] ss:$8 sps:$4 sm:$0xff]  }
 0x34f   :  { %3394 = vmatprep.mubr.bf16.mxu1 %v9583_v19  ;;  %4049 = vmatprep.subr.bf16.mxu0 %v7714_v62 }
 0x356   :  { %3395 = vmatmul.mubr.bf16.gmra.mrb[84].mxu1 %v9581_v48 }
 0x357   :  { %3404 = vmatprep.mubr.bf16.mxu1 %v9599_v38 }
 0x35e   :  { %3405 = vmatmul.mubr.bf16.gmra.mrb[88].mxu1 %v9597_v13  ;;  %v3425_v13 = vld [vmem:[%s10555_s4] sm:$0x3] }
 0x35f   :  { %3414 = vmatprep.mubr.bf16.mxu1 %v9615_v7  ;;  %v9868_v7 = vrot.slane %v3425_v13, %v10621_v18 }
 0x366   :  { %3415 = vmatmul.mubr.bf16.gmra.mrb[96].mxu1 %v9613_v5  ;;  %v9865_v5 = vrot.slane %v3425_v13, %v10620_v35  ;;  %v7721_v13 = vld [vmem:[%s10556_s5 + $0x30] ss:$8 sps:$4 sm:$0xff]  }
 0x3f9   :  { %v3303_v58 = vpop.f32.mrb[92].mxu1 }
 0x3fa   :  { %v3305_v48 = vpop.f32.mrb[93].mxu1 }
 0x3fb   :  { %v3307_v19 = vpop.f32.mrb[94].mxu1 }
 0x3fc   :  { %v3309_v38 = vpop.f32.mrb[95].mxu1 }
 0x401   :  { %v3346_v34 = vpop.f32.mrb[64].mxu1 }
 0x402   :  { %v3437_v9 = vadd.f32 %v9865_v5, %v3346_v34  ;;  %v3348_v10 = vpop.f32.mrb[65].mxu1 }
 0x403   :  { %v3438_v21 = vadd.f32 %v9868_v7, %v3348_v10  ;;  %v3350_v24 = vpop.f32.mrb[66].mxu1 }
 0x404   :  { %v3439_v39 = vadd.f32 %v9865_v5, %v3350_v24  ;;  %v3352_v25 = vpop.f32.mrb[67].mxu1  ;;  %v3469_v22 = vmax.f32 %v3437_v9, 0.0  ;;  %v7726_v9 = vld [vmem:[%s10556_s5 + $0x44] ss:$8 sps:$4 sm:$0xff]  }
 0x405   :  { %v3440_v46 = vadd.f32 %v9868_v7, %v3352_v25  ;;  %v3470_v52 = vmax.f32 %v3438_v21, 0.0 }
 0x406   :  { %v3471_v47 = vmax.f32 %v3439_v39, 0.0 }
 0x407   :  { %v3472_v2 = vmax.f32 %v3440_v46, 0.0  ;;  %v7724_v46 = vld [vmem:[%s10556_s5 + $0x40] ss:$8 sps:$4 sm:$0xff]  }
 0x408   :  { %v3501_v4 = vpack.c.bf16 %v3471_v47, %v3469_v22 }
 0x409   :  { %v3502_v57 = vpack.c.bf16 %v3472_v2, %v3470_v52  ;;  %v3356_v12 = vpop.f32.mrb[68].mxu1  ;;  %v7729_v52 = vld [vmem:[%s10556_s5 + $0x54] ss:$8 sps:$4 sm:$0xff]  }
 0x40a   :  { %v3441_v33 = vadd.f32 %v9865_v5, %v3356_v12  ;;  %v3358_v54 = vpop.f32.mrb[69].mxu1 }
 0x40b   :  { %v3442_v23 = vadd.f32 %v9868_v7, %v3358_v54  ;;  %v3360_v55 = vpop.f32.mrb[70].mxu1  ;;  %3818 = vmatprep.mubr.bf16.mxu0 %v3502_v57 }
 0x40c   :  { %v3443_v44 = vadd.f32 %v9865_v5, %v3360_v55  ;;  %v3362_v32 = vpop.f32.mrb[71].mxu1  ;;  %3819 = vmatmul.mubr.bf16.vlgmr.msra.gmra.mrb[96].mxu0 %v3501_v4  ;;  %v3473_v28 = vmax.f32 %v3441_v33, 0.0  ;;  %v7727_v33 = vld [vmem:[%s10556_s5 + $0x50] ss:$8 sps:$4 sm:$0xff]  }
 0x40d   :  { %v3444_v59 = vadd.f32 %v9868_v7, %v3362_v32  ;;  %4050 = vmatpush1.bf16.msra.mxu0 %v7712_v63  ;;  %v3474_v41 = vmax.f32 %v3442_v23, 0.0  ;;  %v7732_v23 = vld [vmem:[%s10556_s5 + $0x64] ss:$8 sps:$4 sm:$0xff]  }
 0x40e   :  { %v3475_v1 = vmax.f32 %v3443_v44, 0.0  ;;  %4051 = vmatprep.subr.bf16.mxu0 %v7717_v42 }
 0x40f   :  { %v3476_v6 = vmax.f32 %v3444_v59, 0.0 }
 0x410   :  { %v3503_v3 = vpack.c.bf16 %v3475_v1, %v3473_v28  ;;  %v7730_v28 = vld [vmem:[%s10556_s5 + $0x60] ss:$8 sps:$4 sm:$0xff]  }
 0x411   :  { %v3504_v60 = vpack.c.bf16 %v3476_v6, %v3474_v41  ;;  %4052 = vmatpush1.bf16.msra.mxu0 %v7715_v40  ;;  %v3366_v8 = vpop.f32.mrb[72].mxu1  ;;  %v7735_v41 = vld [vmem:[%s10556_s5 + $0x74] ss:$8 sps:$4 sm:$0xff]  }
 0x412   :  { %v3445_v31 = vadd.f32 %v9865_v5, %v3366_v8  ;;  %v3368_v26 = vpop.f32.mrb[73].mxu1  ;;  %4053 = vmatprep.subr.bf16.mxu0 %v7720_v29 }
 0x413   :  { %v3446_v50 = vadd.f32 %v9868_v7, %v3368_v26  ;;  %v3370_v62 = vpop.f32.mrb[74].mxu1  ;;  %3828 = vmatprep.mubr.bf16.mxu0 %v3504_v60 }
 0x414   :  { %v3447_v58 = vadd.f32 %v9865_v5, %v3370_v62  ;;  %v3372_v48 = vpop.f32.mrb[75].mxu1  ;;  %3829 = vmatmul.mubr.bf16.gmra.mrb[100].mxu0 %v3503_v3  ;;  %v3477_v38 = vmax.f32 %v3445_v31, 0.0  ;;  %v7733_v31 = vld [vmem:[%s10556_s5 + $0x70] ss:$8 sps:$4 sm:$0xff]  }
 0x415   :  { %v3448_v19 = vadd.f32 %v9868_v7, %v3372_v48  ;;  %4054 = vmatpush1.bf16.msra.mxu0 %v7718_v27  ;;  %v3478_v10 = vmax.f32 %v3446_v50, 0.0  ;;  %v7738_v50 = vld [vmem:[%s10556_s5 + $0x84] ss:$8 sps:$4 sm:$0xff]  }
 0x416   :  { %v3479_v34 = vmax.f32 %v3447_v58, 0.0  ;;  %4055 = vmatprep.subr.bf16.mxu0 %v7723_v61 }
 0x417   :  { %v3480_v21 = vmax.f32 %v3448_v19, 0.0 }
 0x418   :  { %v3505_v24 = vpack.c.bf16 %v3479_v34, %v3477_v38  ;;  %v7736_v38 = vld [vmem:[%s10556_s5 + $0x80] ss:$8 sps:$4 sm:$0xff]  }
 0x419   :  { %v3506_v39 = vpack.c.bf16 %v3480_v21, %v3478_v10  ;;  %4056 = vmatpush1.bf16.msra.mxu0 %v7721_v13  ;;  %v3376_v25 = vpop.f32.mrb[76].mxu1  ;;  %v7741_v10 = vld [vmem:[%s10556_s5 + $0x94] ss:$8 sps:$4 sm:$0xff]  }
 0x41a   :  { %v3449_v22 = vadd.f32 %v9865_v5, %v3376_v25  ;;  %v3378_v47 = vpop.f32.mrb[77].mxu1  ;;  %4057 = vmatprep.subr.bf16.mxu0 %v7726_v9 }
 0x41b   :  { %v3450_v2 = vadd.f32 %v9868_v7, %v3378_v47  ;;  %v3380_v4 = vpop.f32.mrb[78].mxu1  ;;  %3838 = vmatprep.mubr.bf16.mxu0 %v3506_v39 }
 0x41c   :  { %v3451_v57 = vadd.f32 %v9865_v5, %v3380_v4  ;;  %v3382_v12 = vpop.f32.mrb[79].mxu1  ;;  %3839 = vmatmul.mubr.bf16.gmra.mrb[104].mxu0 %v3505_v24  ;;  %v3481_v54 = vmax.f32 %v3449_v22, 0.0  ;;  %v7739_v22 = vld [vmem:[%s10556_s5 + $0x90] ss:$8 sps:$4 sm:$0xff]  }
 0x41d   :  { %v3452_v63 = vadd.f32 %v9868_v7, %v3382_v12  ;;  %4058 = vmatpush1.bf16.msra.mxu0 %v7724_v46  ;;  %v3482_v55 = vmax.f32 %v3450_v2, 0.0  ;;  %v7744_v2 = vld [vmem:[%s10556_s5 + $0xa4] ss:$8 sps:$4 sm:$0xff]  }
 0x41e   :  { %v3483_v42 = vmax.f32 %v3451_v57, 0.0  ;;  %4059 = vmatprep.subr.bf16.mxu0 %v7729_v52 }
 0x41f   :  { %v3484_v44 = vmax.f32 %v3452_v63, 0.0 }
 0x420   :  { %v3507_v32 = vpack.c.bf16 %v3483_v42, %v3481_v54  ;;  %v7742_v54 = vld [vmem:[%s10556_s5 + $0xa0] ss:$8 sps:$4 sm:$0xff]  }
 0x421   :  { %v3508_v59 = vpack.c.bf16 %v3484_v44, %v3482_v55  ;;  %4060 = vmatpush1.bf16.msra.mxu0 %v7727_v33  ;;  %v3386_v40 = vpop.f32.mrb[80].mxu1  ;;  %v7747_v55 = vld [vmem:[%s10556_s5 + $0xb4] ss:$8 sps:$4 sm:$0xff]  }
 0x422   :  { %v3453_v1 = vadd.f32 %v9865_v5, %v3386_v40  ;;  %v3388_v29 = vpop.f32.mrb[81].mxu1  ;;  %4061 = vmatprep.subr.bf16.mxu0 %v7732_v23 }
 0x423   :  { %v3454_v6 = vadd.f32 %v9868_v7, %v3388_v29  ;;  %v3390_v3 = vpop.f32.mrb[82].mxu1  ;;  %3848 = vmatprep.mubr.bf16.mxu0 %v3508_v59 }
 0x424   :  { %v3455_v60 = vadd.f32 %v9865_v5, %v3390_v3  ;;  %v3392_v8 = vpop.f32.mrb[83].mxu1  ;;  %3849 = vmatmul.mubr.bf16.gmra.mrb[108].mxu0 %v3507_v32  ;;  %v3485_v26 = vmax.f32 %v3453_v1, 0.0  ;;  %v7745_v1 = vld [vmem:[%s10556_s5 + $0xb0] ss:$8 sps:$4 sm:$0xff]  }
 0x425   :  { %v3456_v27 = vadd.f32 %v9868_v7, %v3392_v8  ;;  %4062 = vmatpush1.bf16.msra.mxu0 %v7730_v28  ;;  %v3486_v62 = vmax.f32 %v3454_v6, 0.0  ;;  %v7750_v6 = vld [vmem:[%s10556_s5 + $0xc4] ss:$8 sps:$4 sm:$0xff]  }
 0x426   :  { %v3487_v61 = vmax.f32 %v3455_v60, 0.0  ;;  %4063 = vmatprep.subr.bf16.mxu0 %v7735_v41 }
 0x427   :  { %v3488_v58 = vmax.f32 %v3456_v27, 0.0 }
 0x428   :  { %v3509_v48 = vpack.c.bf16 %v3487_v61, %v3485_v26  ;;  %v7753_v26 = vld [vmem:[%s10556_s5 + $0xd4] ss:$8 sps:$4 sm:$0xff]  }
 0x429   :  { %v3510_v19 = vpack.c.bf16 %v3488_v58, %v3486_v62  ;;  %4064 = vmatpush1.bf16.msra.mxu0 %v7733_v31  ;;  %v3396_v13 = vpop.f32.mrb[84].mxu1  ;;  %v7751_v62 = vld [vmem:[%s10556_s5 + $0xd0] ss:$8 sps:$4 sm:$0xff]   ;;  %v7756_v58 = vld [vmem:[%s10556_s5 + $0xe4] ss:$8 sps:$4 sm:$0xff]  }
 0x42a   :  { %v3457_v34 = vadd.f32 %v9865_v5, %v3396_v13  ;;  %v3398_v9 = vpop.f32.mrb[85].mxu1  ;;  %4065 = vmatprep.subr.bf16.mxu0 %v7738_v50  ;;  %v7754_v13 = vld [vmem:[%s10556_s5 + $0xe0] ss:$8 sps:$4 sm:$0xff]  }
 0x42b   :  { %v3458_v21 = vadd.f32 %v9868_v7, %v3398_v9  ;;  %v3400_v24 = vpop.f32.mrb[86].mxu1  ;;  %3858 = vmatprep.mubr.bf16.mxu0 %v3510_v19  ;;  %v7809_v19 = vld [vmem:[%s10557_s7 + $0x80] sm:$0xff]   ;;  %v7759_v9 = vld [vmem:[%s10556_s5 + $0xf4] ss:$8 sps:$4 sm:$0xff]  }
 0x42c   :  { %v3459_v39 = vadd.f32 %v9865_v5, %v3400_v24  ;;  %v3402_v25 = vpop.f32.mrb[87].mxu1  ;;  %3859 = vmatmul.mubr.bf16.gmra.mrb[112].mxu0 %v3509_v48  ;;  %v3489_v47 = vmax.f32 %v3457_v34, 0.0  ;;  %v7808_v48 = vld [vmem:[%s10557_s7 + $0xc0] sm:$0xff]   ;;  %v7812_v34 = vld [vmem:[%s10557_s7 + $0xd0] sm:$0xff]   ;;  %v7814_v24 = vld [vmem:[%s10557_s7 + $0xd8] sm:$0xff]  }
 0x42d   :  { %v3460_v46 = vadd.f32 %v9868_v7, %v3402_v25  ;;  %4066 = vmatpush1.bf16.msra.mxu0 %v7736_v38  ;;  %v3490_v4 = vmax.f32 %v3458_v21, 0.0  ;;  %6875 = vmatprep.subr.bf16.mxu1 %v7808_v48  ;;  %v7810_v38 = vld [vmem:[%s10557_s7 + $0xc8] sm:$0xff]   ;;  %v7813_v21 = vld [vmem:[%s10557_s7 + $0x90] sm:$0xff]  }
 0x42e   :  { %v3491_v52 = vmax.f32 %v3459_v39, 0.0  ;;  %4067 = vmatprep.subr.bf16.mxu0 %v7741_v10  ;;  %6876 = vmatpush3.bf16.msra.mxu1 %v7809_v19  ;;  %v7757_v10 = vld [vmem:[%s10556_s5 + $0xf0] ss:$8 sps:$4 sm:$0xff]   ;;  %v7762_v39 = vld [vmem:[%s10556_s5 + $0x204] ss:$8 sps:$4 sm:$0xff]  }
 0x42f   :  { %v3492_v57 = vmax.f32 %v3460_v46, 0.0  ;;  %6877 = vmatprep.subr.bf16.mxu1 %v7810_v38  ;;  %v7760_v25 = vld [vmem:[%s10556_s5 + $0x200] ss:$8 sps:$4 sm:$0xff]   ;;  %v7815_v46 = vld [vmem:[%s10557_s7 + $0x98] sm:$0xff]   ;;  %v7855_v38 = vld [vmem:[%s10557_s7 + $0x330] sm:$0xff]  }
 0x430   :  { %v3511_v12 = vpack.c.bf16 %v3491_v52, %v3489_v47  ;;  %v7816_v47 = vld [vmem:[%s10557_s7 + $0xe0] sm:$0xff]   ;;  %v7850_v48 = vld [vmem:[%s10557_s7 + $0x368] sm:$0xff]  }
 0x431   :  { %v3512_v63 = vpack.c.bf16 %v3492_v57, %v3490_v4  ;;  %4068 = vmatpush1.bf16.msra.mxu0 %v7739_v22  ;;  %v3406_v33 = vpop.f32.mrb[88].mxu1  ;;  %v7765_v22 = vld [vmem:[%s10556_s5 + $0x214] ss:$8 sps:$4 sm:$0xff]   ;;  %v7817_v52 = vld [vmem:[%s10557_s7 + $0xa0] sm:$0xff]   ;;  %v7818_v4 = vld [vmem:[%s10557_s7 + $0xe8] sm:$0xff]  }
 0x432   :  { %v3461_v42 = vadd.f32 %v9865_v5, %v3406_v33  ;;  %v3408_v23 = vpop.f32.mrb[89].mxu1  ;;  %4069 = vmatprep.subr.bf16.mxu0 %v7744_v2  ;;  %v7763_v2 = vld [vmem:[%s10556_s5 + $0x210] ss:$8 sps:$4 sm:$0xff]   ;;  %v7768_v57 = vld [vmem:[%s10556_s5 + $0x224] ss:$8 sps:$4 sm:$0xff]  }
 0x433   :  { %v3462_v44 = vadd.f32 %v9868_v7, %v3408_v23  ;;  %v3410_v32 = vpop.f32.mrb[90].mxu1  ;;  %3868 = vmatprep.mubr.bf16.mxu0 %v3512_v63  ;;  %v7766_v63 = vld [vmem:[%s10556_s5 + $0x220] ss:$8 sps:$4 sm:$0xff]   ;;  %v7769_v33 = vld [vmem:[%s10556_s5 + $0x230] ss:$8 sps:$4 sm:$0xff]  }
 0x434   :  { %v3463_v59 = vadd.f32 %v9865_v5, %v3410_v32  ;;  %v3412_v40 = vpop.f32.mrb[91].mxu1  ;;  %3869 = vmatmul.mubr.bf16.gmra.mrb[116].mxu0 %v3511_v12  ;;  %v3493_v29 = vmax.f32 %v3461_v42, 0.0  ;;  %v7819_v12 = vld [vmem:[%s10557_s7 + $0xa8] sm:$0xff]   ;;  %v7777_v23 = vld [vmem:[%s10556_s5 + $0x254] ss:$8 sps:$4 sm:$0xff]  }
 0x435   :  { %v3464_v28 = vadd.f32 %v9868_v7, %v3412_v40  ;;  %4070 = vmatpush1.bf16.msra.mxu0 %v7742_v54  ;;  %v3494_v3 = vmax.f32 %v3462_v44, 0.0  ;;  %v7748_v7 = vld [vmem:[%s10556_s5 + $0xc0] ss:$8 sps:$4 sm:$0xff]   ;;  %v7774_v54 = vld [vmem:[%s10556_s5 + $0x244] ss:$8 sps:$4 sm:$0xff]  }
 0x436   :  { %v3495_v41 = vmax.f32 %v3463_v59, 0.0  ;;  %4071 = vmatprep.subr.bf16.mxu0 %v7747_v55  ;;  %v7772_v42 = vld [vmem:[%s10556_s5 + $0x240] ss:$8 sps:$4 sm:$0xff]   ;;  %v7775_v55 = vld [vmem:[%s10556_s5 + $0x250] ss:$8 sps:$4 sm:$0xff]  }
 0x437   :  { %v3496_v60 = vmax.f32 %v3464_v28, 0.0  ;;  %v7780_v44 = vld [vmem:[%s10556_s5 + $0x264] ss:$8 sps:$4 sm:$0xff]   ;;  %v7778_v32 = vld [vmem:[%s10556_s5 + $0x260] ss:$8 sps:$4 sm:$0xff]  }
 0x438   :  { %v3513_v8 = vpack.c.bf16 %v3495_v41, %v3493_v29  ;;  %v7783_v59 = vld [vmem:[%s10556_s5 + $0x274] ss:$8 sps:$4 sm:$0xff]   ;;  %v7781_v40 = vld [vmem:[%s10556_s5 + $0x270] ss:$8 sps:$4 sm:$0xff]   ;;  %v7786_v28 = vld [vmem:[%s10556_s5 + $0x284] ss:$8 sps:$4 sm:$0xff]  }
 0x439   :  { %v3514_v5 = vpack.c.bf16 %v3496_v60, %v3494_v3  ;;  %4072 = vmatpush1.bf16.msra.mxu0 %v7745_v1  ;;  %v3416_v27 = vpop.f32.mrb[96].mxu1  ;;  %v7784_v1 = vld [vmem:[%s10556_s5 + $0x280] ss:$8 sps:$4 sm:$0xff]   ;;  %v7789_v29 = vld [vmem:[%s10556_s5 + $0x294] ss:$8 sps:$4 sm:$0xff]  }
 0x43a   :  { %v3418_v31 = vpop.f32.mrb[97].mxu1  ;;  %4073 = vmatprep.subr.bf16.mxu0 %v7750_v6  ;;  %v7787_v41 = vld [vmem:[%s10556_s5 + $0x290] ss:$8 sps:$4 sm:$0xff]   ;;  %v7792_v6 = vld [vmem:[%s10556_s5 + $0x2a4] ss:$8 sps:$4 sm:$0xff]  }
 0x43b   :  { %v3420_v61 = vpop.f32.mrb[98].mxu1  ;;  %3878 = vmatprep.mubr.bf16.mxu0 %v3514_v5  ;;  %v7790_v3 = vld [vmem:[%s10556_s5 + $0x2a0] ss:$8 sps:$4 sm:$0xff]   ;;  %v7795_v60 = vld [vmem:[%s10556_s5 + $0x2b4] ss:$8 sps:$4 sm:$0xff]  }
 0x43c   :  { %v3422_v50 = vpop.f32.mrb[99].mxu1  ;;  %3879 = vmatmul.mubr.bf16.gmra.mrb[120].mxu0 %v3513_v8  ;;  %v7793_v8 = vld [vmem:[%s10556_s5 + $0x2b0] ss:$8 sps:$4 sm:$0xff]   ;;  %v7798_v5 = vld [vmem:[%s10556_s5 + $0x2c4] ss:$8 sps:$4 sm:$0xff]  }
 0x43d   :  { %4074 = vmatpush1.bf16.msra.mxu0 %v7748_v7  ;;  %4081 = vmatprep.mubr.bf16.mxu0 %v9507_v11  ;;  %v7811_v11 = vld [vmem:[%s10557_s7 + $0x88] sm:$0xff]   ;;  %v7801_v7 = vld [vmem:[%s10556_s5 + $0x2d4] ss:$8 sps:$4 sm:$0xff]   ;;  %v7799_v31 = vld [vmem:[%s10556_s5 + $0x2d0] ss:$8 sps:$4 sm:$0xff]  }
 0x43e   :  { %4075 = vmatprep.subr.bf16.mxu0 %v7753_v26  ;;  %6878 = vmatpush3.bf16.msra.mxu1 %v7811_v11  ;;  %v7796_v27 = vld [vmem:[%s10556_s5 + $0x2c0] ss:$8 sps:$4 sm:$0xff]   ;;  %v7804_v26 = vld [vmem:[%s10556_s5 + $0x2e4] ss:$8 sps:$4 sm:$0xff]   ;;  %v7807_v50 = vld [vmem:[%s10556_s5 + $0x2f4] ss:$8 sps:$4 sm:$0xff]  }
 0x43f   :  { %6879 = vmatprep.subr.bf16.mxu1 %v7812_v34  ;;  %v7802_v61 = vld [vmem:[%s10556_s5 + $0x2e0] ss:$8 sps:$4 sm:$0xff]   ;;  %v7858_v11 = vld [vmem:[%s10557_s7 + $0x378] sm:$0xff]  }
 0x440   :  { %v7851_v19 = vld [vmem:[%s10557_s7 + $0x328] sm:$0xff]   ;;  %v7859_v34 = vld [vmem:[%s10557_s7 + $0x338] sm:$0xff]  }
 0x441   :  { %4076 = vmatpush1.bf16.msra.mxu0 %v7751_v62  ;;  %v7805_v62 = vld [vmem:[%s10556_s5 + $0x2f0] ss:$8 sps:$4 sm:$0xff]  }
 0x442   :  { %4077 = vmatprep.subr.bf16.mxu0 %v7756_v58  ;;  %6880 = vmatpush3.bf16.msra.mxu1 %v7813_v21  ;;  %v7847_v58 = vld [vmem:[%s10557_s7 + $0x320] sm:$0xff]  }
 0x443   :  { %6881 = vmatprep.subr.bf16.mxu1 %v7814_v24 }
 0x445   :  { %4078 = vmatpush1.bf16.msra.mxu0 %v7754_v13  ;;  %v7854_v13 = vld [vmem:[%s10557_s7 + $0x370] sm:$0xff]  }
 0x446   :  { %4079 = vmatprep.subr.bf16.mxu0 %v7759_v9  ;;  %6882 = vmatpush3.bf16.msra.mxu1 %v7815_v46  ;;  %v4490_v9 = vld [vmem:[%s10558_s6] sm:$0x3] }
 0x447   :  { %6883 = vmatprep.subr.bf16.mxu1 %v7816_v47  ;;  %v10221_v21 = vrot.slane %v4490_v9, %v10621_v18 }
 0x449   :  { %4080 = vmatpush1.bf16.msra.mxu0 %v7757_v10  ;;  %v10218_v10 = vrot.slane %v4490_v9, %v10620_v35 }
 0x44a   :  { %4359 = vmatprep.subr.bf16.mxu0 %v7762_v39  ;;  %6884 = vmatpush3.bf16.msra.mxu1 %v7817_v52 }
 0x44b   :  { %6885 = vmatprep.subr.bf16.mxu1 %v7818_v4 }
 0x44c   :  { %4082 = vmatmul.mubr.bf16.vlgmr.msra.gmra.mrb[96].mxu0 %v9505_v49  ;;  %v7771_v49 = vld [vmem:[%s10556_s5 + $0x234] ss:$8 sps:$4 sm:$0xff]  }
 0x44d   :  { %4091 = vmatprep.mubr.bf16.mxu0 %v9523_v20  ;;  %4360 = vmatpush1.bf16.msra.mxu0 %v7760_v25 }
 0x44e   :  { %4361 = vmatprep.subr.bf16.mxu0 %v7765_v22  ;;  %6886 = vmatpush3.bf16.msra.mxu1 %v7819_v12 }
 0x451   :  { %4362 = vmatpush1.bf16.msra.mxu0 %v7763_v2 }
 0x452   :  { %4363 = vmatprep.subr.bf16.mxu0 %v7768_v57 }
 0x454   :  { %4092 = vmatmul.mubr.bf16.gmra.mrb[100].mxu0 %v9521_v16 }
 0x455   :  { %4101 = vmatprep.mubr.bf16.mxu0 %v9539_v37  ;;  %4364 = vmatpush1.bf16.msra.mxu0 %v7766_v63 }
 0x456   :  { %4365 = vmatprep.subr.bf16.mxu0 %v7771_v49 }
 0x459   :  { %4366 = vmatpush1.bf16.msra.mxu0 %v7769_v33 }
 0x45a   :  { %4367 = vmatprep.subr.bf16.mxu0 %v7774_v54 }
 0x45c   :  { %4102 = vmatmul.mubr.bf16.gmra.mrb[104].mxu0 %v9537_v30 }
 0x45d   :  { %4111 = vmatprep.mubr.bf16.mxu0 %v9555_v45  ;;  %4368 = vmatpush1.bf16.msra.mxu0 %v7772_v42 }
 0x45e   :  { %4369 = vmatprep.subr.bf16.mxu0 %v7777_v23 }
 0x461   :  { %4370 = vmatpush1.bf16.msra.mxu0 %v7775_v55 }
 0x462   :  { %4371 = vmatprep.subr.bf16.mxu0 %v7780_v44 }
 0x464   :  { %4112 = vmatmul.mubr.bf16.gmra.mrb[108].mxu0 %v9553_v43 }
 0x465   :  { %4121 = vmatprep.mubr.bf16.mxu0 %v9571_v51  ;;  %4372 = vmatpush1.bf16.msra.mxu0 %v7778_v32 }
 0x466   :  { %4373 = vmatprep.subr.bf16.mxu0 %v7783_v59 }
 0x469   :  { %4374 = vmatpush1.bf16.msra.mxu0 %v7781_v40 }
 0x46a   :  { %4375 = vmatprep.subr.bf16.mxu0 %v7786_v28 }
 0x46c   :  { %4122 = vmatmul.mubr.bf16.gmra.mrb[112].mxu0 %v9569_v53 }
 0x46d   :  { %4131 = vmatprep.mubr.bf16.mxu0 %v9587_v15  ;;  %4376 = vmatpush1.bf16.msra.mxu0 %v7784_v1 }
 0x46e   :  { %4377 = vmatprep.subr.bf16.mxu0 %v7789_v29 }
 0x471   :  { %4378 = vmatpush1.bf16.msra.mxu0 %v7787_v41 }
 0x472   :  { %4379 = vmatprep.subr.bf16.mxu0 %v7792_v6 }
 0x474   :  { %4132 = vmatmul.mubr.bf16.gmra.mrb[116].mxu0 %v9585_v56 }
 0x475   :  { %4141 = vmatprep.mubr.bf16.mxu0 %v9603_v36  ;;  %4380 = vmatpush1.bf16.msra.mxu0 %v7790_v3  ;;  %v7825_v3 = vld [vmem:[%s10557_s7] sm:$0xff]  }
 0x476   :  { %4381 = vmatprep.subr.bf16.mxu0 %v7795_v60 }
 0x479   :  { %4382 = vmatpush1.bf16.msra.mxu0 %v7793_v8 }
 0x47a   :  { %4383 = vmatprep.subr.bf16.mxu0 %v7798_v5  ;;  %v7826_v5 = vld [vmem:[%s10557_s7 + $0x48] sm:$0xff]  }
 0x47c   :  { %4142 = vmatmul.mubr.bf16.gmra.mrb[120].mxu0 %v9601_v0 }
 0x47d   :  { %4384 = vmatpush1.bf16.msra.mxu0 %v7796_v27  ;;  %4391 = vmatprep.mubr.bf16.mxu0 %v9523_v20  ;;  %v7821_v20 = vld [vmem:[%s10557_s7 + $0xb0] sm:$0xff]  }
 0x47e   :  { %4385 = vmatprep.subr.bf16.mxu0 %v7801_v7 }
 0x481   :  { %4386 = vmatpush1.bf16.msra.mxu0 %v7799_v31 }
 0x482   :  { %4387 = vmatprep.subr.bf16.mxu0 %v7804_v26 }
 0x485   :  { %4388 = vmatpush1.bf16.msra.mxu0 %v7802_v61 }
 0x486   :  { %4389 = vmatprep.subr.bf16.mxu0 %v7807_v50  ;;  %v7827_v50 = vld [vmem:[%s10557_s7 + $0x8] sm:$0xff]  }
 0x489   :  { %4390 = vmatpush1.bf16.msra.mxu0 %v7805_v62 }
 0x48c   :  { %4392 = vmatmul.mubr.bf16.vlgmr.msra.gmra.mrb[96].mxu0 %v9521_v16  ;;  %v7820_v16 = vld [vmem:[%s10557_s7 + $0xf0] sm:$0xff]  }
 0x48d   :  { %4401 = vmatprep.mubr.bf16.mxu0 %v9539_v37  ;;  %6887 = vmatprep.subr.bf16.mxu1 %v7820_v16  ;;  %v7823_v37 = vld [vmem:[%s10557_s7 + $0xb8] sm:$0xff]  }
 0x48e   :  { %6888 = vmatpush3.bf16.msra.mxu1 %v7821_v20  ;;  %v7828_v20 = vld [vmem:[%s10557_s7 + $0x50] sm:$0xff]  }
 0x494   :  { %4402 = vmatmul.mubr.bf16.gmra.mrb[100].mxu0 %v9537_v30  ;;  %v7822_v30 = vld [vmem:[%s10557_s7 + $0xf8] sm:$0xff]  }
 0x495   :  { %4411 = vmatprep.mubr.bf16.mxu0 %v9555_v45  ;;  %6889 = vmatprep.subr.bf16.mxu1 %v7822_v30  ;;  %v7830_v45 = vld [vmem:[%s10557_s7 + $0x340] sm:$0xff]  }
 0x496   :  { %6890 = vmatpush3.bf16.msra.mxu1 %v7823_v37  ;;  %7007 = vmatprep.subr.bf16.mxu0 %v7830_v45 }
 0x49c   :  { %4412 = vmatmul.mubr.bf16.gmra.mrb[104].mxu0 %v9553_v43  ;;  %v7824_v43 = vld [vmem:[%s10557_s7 + $0x40] sm:$0xff]  }
 0x49d   :  { %4421 = vmatprep.mubr.bf16.mxu0 %v9571_v51  ;;  %6897 = vmatprep.subr.bf16.mxu1 %v7824_v43  ;;  %v7834_v51 = vld [vmem:[%s10557_s7 + $0x348] sm:$0xff]  }
 0x4a4   :  { %4422 = vmatmul.mubr.bf16.gmra.mrb[108].mxu0 %v9569_v53  ;;  %v7831_v53 = vld [vmem:[%s10557_s7 + $0x300] sm:$0xff]  }
 0x4a5   :  { %4431 = vmatprep.mubr.bf16.mxu0 %v9587_v15  ;;  %7008 = vmatpush3.bf16.msra.mxu0 %v7831_v53  ;;  %v7838_v15 = vld [vmem:[%s10557_s7 + $0x350] sm:$0xff]  }
 0x4a6   :  { %7009 = vmatprep.subr.bf16.mxu0 %v7834_v51  ;;  %v7829_v51 = vld [vmem:[%s10557_s7 + $0x10] sm:$0xff]  }
 0x4ac   :  { %4432 = vmatmul.mubr.bf16.gmra.mrb[112].mxu0 %v9585_v56  ;;  %v7835_v56 = vld [vmem:[%s10557_s7 + $0x308] sm:$0xff]  }
 0x4ad   :  { %4441 = vmatprep.mubr.bf16.mxu0 %v9603_v36  ;;  %7010 = vmatpush3.bf16.msra.mxu0 %v7835_v56  ;;  %v7842_v36 = vld [vmem:[%s10557_s7 + $0x358] sm:$0xff]  }
 0x4ae   :  { %7011 = vmatprep.subr.bf16.mxu0 %v7838_v15 }
 0x4b4   :  { %4442 = vmatmul.mubr.bf16.gmra.mrb[116].mxu0 %v9601_v0  ;;  %v7839_v0 = vld [vmem:[%s10557_s7 + $0x310] sm:$0xff]  }
 0x4b5   :  { %4451 = vmatprep.mubr.bf16.mxu0 %v9619_v17  ;;  %7012 = vmatpush3.bf16.msra.mxu0 %v7839_v0  ;;  %v7846_v17 = vld [vmem:[%s10557_s7 + $0x360] sm:$0xff]   ;;  %v7832_v0 = vld [vmem:[%s10557_s7 + $0x58] sm:$0xff]  }
 0x4b6   :  { %7013 = vmatprep.subr.bf16.mxu0 %v7842_v36 }
 0x4bc   :  { %4452 = vmatmul.mubr.bf16.gmra.mrb[120].mxu0 %v9617_v14  ;;  %v7843_v14 = vld [vmem:[%s10557_s7 + $0x318] sm:$0xff]  }
 0x4bd   :  { %7014 = vmatpush3.bf16.msra.mxu0 %v7843_v14 }
 0x4be   :  { %7015 = vmatprep.subr.bf16.mxu0 %v7846_v17 }
 0x4c1   :  { %7016 = vmatpush3.bf16.msra.mxu0 %v7847_v58 }
 0x4c2   :  { %7017 = vmatprep.subr.bf16.mxu0 %v7850_v48 }
 0x4c5   :  { %7018 = vmatpush3.bf16.msra.mxu0 %v7851_v19  ;;  %v7833_v19 = vld [vmem:[%s10557_s7 + $0x18] sm:$0xff]  }
 0x4c6   :  { %7019 = vmatprep.subr.bf16.mxu0 %v7854_v13 }
 0x4c9   :  { %7020 = vmatpush3.bf16.msra.mxu0 %v7855_v38 }
 0x4ca   :  { %7021 = vmatprep.subr.bf16.mxu0 %v7858_v11  ;;  %v7836_v11 = vld [vmem:[%s10557_s7 + $0x60] sm:$0xff]  }
 0x4cd   :  { %7022 = vmatpush3.bf16.msra.mxu0 %v7859_v34 }
 0x55f   :  { %v4393_v24 = vpop.f32.mrb[96].mxu0 }
 0x560   :  { %v4502_v39 = vadd.f32 %v10218_v10, %v4393_v24  ;;  %v4395_v25 = vpop.f32.mrb[97].mxu0 }
 0x561   :  { %v4503_v46 = vadd.f32 %v10221_v21, %v4395_v25  ;;  %v4397_v22 = vpop.f32.mrb[98].mxu0 }
 0x562   :  { %v4504_v47 = vadd.f32 %v10218_v10, %v4397_v22  ;;  %v4399_v52 = vpop.f32.mrb[99].mxu0  ;;  %v4530_v4 = vmax.f32 %v4502_v39, 0.0 }
 0x563   :  { %v4505_v2 = vadd.f32 %v10221_v21, %v4399_v52  ;;  %v4531_v12 = vmax.f32 %v4503_v46, 0.0  ;;  %v7837_v46 = vld [vmem:[%s10557_s7 + $0x20] sm:$0xff]   ;;  %v7840_v52 = vld [vmem:[%s10557_s7 + $0x68] sm:$0xff]  }
 0x564   :  { %v4532_v57 = vmax.f32 %v4504_v47, 0.0 }
 0x565   :  { %v4533_v35 = vmax.f32 %v4505_v2, 0.0 }
 0x566   :  { %v10227_v63 = vpack.c.bf16 %v4532_v57, %v4530_v4 }
 0x567   :  { %v4559_v18 = vpack.c.bf16 %v4533_v35, %v4531_v12  ;;  %v4403_v49 = vpop.f32.mrb[100].mxu0 }
 0x568   :  { %v4506_v33 = vadd.f32 %v10218_v10, %v4403_v49  ;;  %v4405_v54 = vpop.f32.mrb[101].mxu0 }
 0x569   :  { %v4507_v42 = vadd.f32 %v10221_v21, %v4405_v54  ;;  %v4407_v23 = vpop.f32.mrb[102].mxu0  ;;  %v7844_v54 = vld [vmem:[%s10557_s7 + $0x70] sm:$0xff]  }
 0x56a   :  { %v4508_v55 = vadd.f32 %v10218_v10, %v4407_v23  ;;  %v4409_v44 = vpop.f32.mrb[103].mxu0  ;;  %v4534_v59 = vmax.f32 %v4506_v33, 0.0 }
 0x56b   :  { %v4509_v32 = vadd.f32 %v10221_v21, %v4409_v44  ;;  %v4535_v28 = vmax.f32 %v4507_v42, 0.0 }
 0x56c   :  { %v4536_v40 = vmax.f32 %v4508_v55, 0.0 }
 0x56d   :  { %v4537_v1 = vmax.f32 %v4509_v32, 0.0 }
 0x56e   :  { %v4560_v29 = vpack.c.bf16 %v4536_v40, %v4534_v59  ;;  %v7845_v59 = vld [vmem:[%s10557_s7 + $0x30] sm:$0xff]  }
 0x56f   :  { %v4561_v41 = vpack.c.bf16 %v4537_v1, %v4535_v28  ;;  %v4413_v6 = vpop.f32.mrb[104].mxu0  ;;  %v7848_v1 = vld [vmem:[%s10557_s7 + $0x78] sm:$0xff]  }
 0x570   :  { %v4510_v60 = vadd.f32 %v10218_v10, %v4413_v6  ;;  %v4415_v8 = vpop.f32.mrb[105].mxu0 }
 0x571   :  { %v4511_v27 = vadd.f32 %v10221_v21, %v4415_v8  ;;  %v4417_v7 = vpop.f32.mrb[106].mxu0  ;;  %4783 = vmatprep.mubr.bf16.mxu1 %v4561_v41  ;;  %v7849_v8 = vld [vmem:[%s10557_s7 + $0x38] sm:$0xff]  }
 0x572   :  { %v4512_v31 = vadd.f32 %v10218_v10, %v4417_v7  ;;  %v4419_v26 = vpop.f32.mrb[107].mxu0  ;;  %4784 = vmatmul.mubr.bf16.vlgmr.msra.gmra.mrb[100].mxu1 %v4560_v29  ;;  %v4538_v62 = vmax.f32 %v4510_v60, 0.0  ;;  %v7852_v7 = vld [vmem:[%s10557_s7 + $0x140] sm:$0xff]  }
 0x573   :  { %v4513_v61 = vadd.f32 %v10221_v21, %v4419_v26  ;;  %6898 = vmatpush3.bf16.msra.mxu1 %v7825_v3  ;;  %4920 = vmatprep.mubr.bf16.mxu1 %v4559_v18  ;;  %v4539_v30 = vmax.f32 %v4511_v27, 0.0  ;;  %v7841_v18 = vld [vmem:[%s10557_s7 + $0x28] sm:$0xff]  }
 0x574   :  { %v4540_v16 = vmax.f32 %v4512_v31, 0.0  ;;  %6899 = vmatprep.subr.bf16.mxu1 %v7826_v5 }
 0x575   :  { %v4541_v37 = vmax.f32 %v4513_v61, 0.0 }
 0x576   :  { %v10249_v43 = vpack.c.bf16 %v4540_v16, %v4538_v62  ;;  %v7853_v16 = vld [vmem:[%s10557_s7 + $0x100] sm:$0xff]  }
 0x577   :  { %v10251_v45 = vpack.c.bf16 %v4541_v37, %v4539_v30  ;;  %6900 = vmatpush3.bf16.msra.mxu1 %v7827_v50  ;;  %v4423_v53 = vpop.f32.mrb[108].mxu0  ;;  %v7856_v37 = vld [vmem:[%s10557_s7 + $0x148] sm:$0xff]  }
 0x578   :  { %v4514_v56 = vadd.f32 %v10218_v10, %v4423_v53  ;;  %v4425_v15 = vpop.f32.mrb[109].mxu0  ;;  %6901 = vmatprep.subr.bf16.mxu1 %v7828_v20 }
 0x579   :  { %v4515_v36 = vadd.f32 %v10221_v21, %v4425_v15  ;;  %v4427_v14 = vpop.f32.mrb[110].mxu0 }
 0x57a   :  { %v4516_v17 = vadd.f32 %v10218_v10, %v4427_v14  ;;  %v4429_v58 = vpop.f32.mrb[111].mxu0  ;;  %v4542_v13 = vmax.f32 %v4514_v56, 0.0 }
 0x57b   :  { %v4517_v48 = vadd.f32 %v10221_v21, %v4429_v58  ;;  %6902 = vmatpush3.bf16.msra.mxu1 %v7829_v51  ;;  %v4543_v34 = vmax.f32 %v4515_v36, 0.0  ;;  %v7857_v36 = vld [vmem:[%s10557_s7 + $0x108] sm:$0xff]   ;;  %v7860_v58 = vld [vmem:[%s10557_s7 + $0x150] sm:$0xff]  }
 0x57c   :  { %v4544_v38 = vmax.f32 %v4516_v17, 0.0  ;;  %6903 = vmatprep.subr.bf16.mxu1 %v7832_v0 }
 0x57d   :  { %v4545_v9 = vmax.f32 %v4517_v48, 0.0 }
 0x57e   :  { %v10269_v24 = vpack.c.bf16 %v4544_v38, %v4542_v13  ;;  %v7863_v13 = vld [vmem:[%s10557_s7 + $0x118] sm:$0xff]   ;;  %v7864_v38 = vld [vmem:[%s10557_s7 + $0x160] sm:$0xff]  }
 0x57f   :  { %v10271_v39 = vpack.c.bf16 %v4545_v9, %v4543_v34  ;;  %6904 = vmatpush3.bf16.msra.mxu1 %v7833_v19  ;;  %v4433_v25 = vpop.f32.mrb[112].mxu0  ;;  %v7866_v34 = vld [vmem:[%s10557_s7 + $0x168] sm:$0xff]  }
 0x580   :  { %v4518_v22 = vadd.f32 %v10218_v10, %v4433_v25  ;;  %v4435_v47 = vpop.f32.mrb[113].mxu0  ;;  %6905 = vmatprep.subr.bf16.mxu1 %v7836_v11  ;;  %v7865_v11 = vld [vmem:[%s10557_s7 + $0x120] sm:$0xff]   ;;  %v7867_v9 = vld [vmem:[%s10557_s7 + $0x128] sm:$0xff]   ;;  %v7868_v25 = vld [vmem:[%s10557_s7 + $0x170] sm:$0xff]  }
 0x581   :  { %v4519_v2 = vadd.f32 %v10221_v21, %v4435_v47  ;;  %v4437_v4 = vpop.f32.mrb[114].mxu0  ;;  %v7871_v47 = vld [vmem:[%s10557_s7 + $0x138] sm:$0xff]  }
 0x582   :  { %v4520_v57 = vadd.f32 %v10218_v10, %v4437_v4  ;;  %v4439_v12 = vpop.f32.mrb[115].mxu0  ;;  %v4546_v49 = vmax.f32 %v4518_v22, 0.0  ;;  %v7870_v22 = vld [vmem:[%s10557_s7 + $0x178] sm:$0xff]   ;;  %v7874_v4 = vld [vmem:[%s10557_s7 + $0x1c8] sm:$0xff]  }
 0x583   :  { %v4521_v35 = vadd.f32 %v10221_v21, %v4439_v12  ;;  %6906 = vmatpush3.bf16.msra.mxu1 %v7837_v46  ;;  %v4547_v42 = vmax.f32 %v4519_v2, 0.0  ;;  %v7869_v46 = vld [vmem:[%s10557_s7 + $0x130] sm:$0xff]   ;;  %v7873_v2 = vld [vmem:[%s10557_s7 + $0x180] sm:$0xff]  }
 0x584   :  { %v4548_v33 = vmax.f32 %v4520_v57, 0.0  ;;  %6907 = vmatprep.subr.bf16.mxu1 %v7840_v52  ;;  %v7872_v52 = vld [vmem:[%s10557_s7 + $0x1c0] sm:$0xff]   ;;  %v7875_v57 = vld [vmem:[%s10557_s7 + $0x188] sm:$0xff]   ;;  %v7876_v12 = vld [vmem:[%s10557_s7 + $0x1d0] sm:$0xff]  }
 0x585   :  { %v4549_v23 = vmax.f32 %v4521_v35, 0.0  ;;  %v7877_v35 = vld [vmem:[%s10557_s7 + $0x190] sm:$0xff]  }
 0x586   :  { %v10289_v55 = vpack.c.bf16 %v4548_v33, %v4546_v49  ;;  %v7881_v49 = vld [vmem:[%s10557_s7 + $0x1a0] sm:$0xff]   ;;  %v7882_v33 = vld [vmem:[%s10557_s7 + $0x1e8] sm:$0xff]  }
 0x587   :  { %v10291_v44 = vpack.c.bf16 %v4549_v23, %v4547_v42  ;;  %6908 = vmatpush3.bf16.msra.mxu1 %v7841_v18  ;;  %v4443_v32 = vpop.f32.mrb[116].mxu0  ;;  %v7880_v18 = vld [vmem:[%s10557_s7 + $0x1e0] sm:$0xff]   ;;  %v7884_v42 = vld [vmem:[%s10557_s7 + $0x1f0] sm:$0xff]  }
 0x588   :  { %v4522_v40 = vadd.f32 %v10218_v10, %v4443_v32  ;;  %v4445_v28 = vpop.f32.mrb[117].mxu0  ;;  %6909 = vmatprep.subr.bf16.mxu1 %v7844_v54  ;;  %v7883_v54 = vld [vmem:[%s10557_s7 + $0x1a8] sm:$0xff]   ;;  %v7885_v23 = vld [vmem:[%s10557_s7 + $0x1b0] sm:$0xff]   ;;  %v7886_v32 = vld [vmem:[%s10557_s7 + $0x1f8] sm:$0xff]  }
 0x589   :  { %v4523_v29 = vadd.f32 %v10221_v21, %v4445_v28  ;;  %v4447_v41 = vpop.f32.mrb[118].mxu0  ;;  %v7889_v28 = vld [vmem:[%s10557_s7 + $0x200] sm:$0xff]  }
 0x58a   :  { %v4524_v6 = vadd.f32 %v10218_v10, %v4447_v41  ;;  %v4449_v3 = vpop.f32.mrb[119].mxu0  ;;  %v4550_v5 = vmax.f32 %v4522_v40, 0.0  ;;  %v7888_v40 = vld [vmem:[%s10557_s7 + $0x240] sm:$0xff]   ;;  %v7892_v41 = vld [vmem:[%s10557_s7 + $0x250] sm:$0xff]  }
 0x58b   :  { %v4525_v60 = vadd.f32 %v10221_v21, %v4449_v3  ;;  %6910 = vmatpush3.bf16.msra.mxu1 %v7845_v59  ;;  %v4551_v31 = vmax.f32 %v4523_v29, 0.0  ;;  %v7887_v59 = vld [vmem:[%s10557_s7 + $0x1b8] sm:$0xff]   ;;  %v7891_v29 = vld [vmem:[%s10557_s7 + $0x208] sm:$0xff]   ;;  %v7896_v3 = vld [vmem:[%s10557_s7 + $0x260] sm:$0xff]  }
 0x58c   :  { %v4552_v27 = vmax.f32 %v4524_v6, 0.0  ;;  %6911 = vmatprep.subr.bf16.mxu1 %v7848_v1  ;;  %v7890_v1 = vld [vmem:[%s10557_s7 + $0x248] sm:$0xff]   ;;  %v7893_v6 = vld [vmem:[%s10557_s7 + $0x210] sm:$0xff]  }
 0x58d   :  { %v4553_v26 = vmax.f32 %v4525_v60, 0.0  ;;  %v7897_v60 = vld [vmem:[%s10557_s7 + $0x220] sm:$0xff]  }
 0x58e   :  { %v10309_v61 = vpack.c.bf16 %v4552_v27, %v4550_v5  ;;  %v7899_v5 = vld [vmem:[%s10557_s7 + $0x228] sm:$0xff]   ;;  %v7900_v27 = vld [vmem:[%s10557_s7 + $0x270] sm:$0xff]  }
 0x58f   :  { %v10311_v50 = vpack.c.bf16 %v4553_v26, %v4551_v31  ;;  %6912 = vmatpush3.bf16.msra.mxu1 %v7849_v8  ;;  %v4453_v62 = vpop.f32.mrb[120].mxu0  ;;  %v7898_v8 = vld [vmem:[%s10557_s7 + $0x268] sm:$0xff]   ;;  %v7902_v31 = vld [vmem:[%s10557_s7 + $0x278] sm:$0xff]  }
 0x590   :  { %v4526_v20 = vadd.f32 %v10218_v10, %v4453_v62  ;;  %v4455_v30 = vpop.f32.mrb[121].mxu0  ;;  %6919 = vmatprep.subr.bf16.mxu1 %v7852_v7  ;;  %v7901_v7 = vld [vmem:[%s10557_s7 + $0x230] sm:$0xff]   ;;  %v7903_v26 = vld [vmem:[%s10557_s7 + $0x238] sm:$0xff]   ;;  %v7904_v62 = vld [vmem:[%s10557_s7 + $0x2c0] sm:$0xff]  }
 0x591   :  { %v4527_v53 = vadd.f32 %v10221_v21, %v4455_v30  ;;  %v4457_v51 = vpop.f32.mrb[122].mxu0  ;;  %v7907_v30 = vld [vmem:[%s10557_s7 + $0x288] sm:$0xff]  }
 0x592   :  { %v4528_v56 = vadd.f32 %v10218_v10, %v4457_v51  ;;  %4921 = vmatmul.mubr.bf16.vlgmr.msra.gmra.mrb[104].mxu1 %v10227_v63  ;;  %v4459_v15 = vpop.f32.mrb[123].mxu0  ;;  %v4554_v14 = vmax.f32 %v4526_v20, 0.0  ;;  %v7906_v20 = vld [vmem:[%s10557_s7 + $0x2c8] sm:$0xff]   ;;  %v7912_v51 = vld [vmem:[%s10557_s7 + $0x2e0] sm:$0xff]  }
 0x593   :  { %v4529_v0 = vadd.f32 %v10221_v21, %v4459_v15  ;;  %6920 = vmatpush3.bf16.msra.mxu1 %v7853_v16  ;;  %5092 = vmatprep.mubr.bf16.mxu1 %v10251_v45  ;;  %v4555_v10 = vmax.f32 %v4527_v53, 0.0  ;;  %v7861_v21 = vld [vmem:[%s10557_s7 + $0x110] sm:$0xff]   ;;  %v7862_v45 = vld [vmem:[%s10557_s7 + $0x158] sm:$0xff]   ;;  %v7905_v16 = vld [vmem:[%s10557_s7 + $0x280] sm:$0xff]  }
 0x594   :  { %v4556_v17 = vmax.f32 %v4528_v56, 0.0  ;;  %6921 = vmatprep.subr.bf16.mxu1 %v7856_v37  ;;  %v7908_v37 = vld [vmem:[%s10557_s7 + $0x2d0] sm:$0xff]   ;;  %v7913_v56 = vld [vmem:[%s10557_s7 + $0x2a0] sm:$0xff]   ;;  %v7914_v15 = vld [vmem:[%s10557_s7 + $0x2e8] sm:$0xff]  }
 0x595   :  { %v4557_v48 = vmax.f32 %v4529_v0, 0.0  ;;  %v7909_v53 = vld [vmem:[%s10557_s7 + $0x290] sm:$0xff]   ;;  %v7915_v0 = vld [vmem:[%s10557_s7 + $0x2a8] sm:$0xff]  }
 0x596   :  { %v4570_v63 = vpack.c.bf16 %v4556_v17, %v4554_v14  ;;  %v7917_v14 = vld [vmem:[%s10557_s7 + $0x2b0] sm:$0xff]   ;;  %v7918_v17 = vld [vmem:[%s10557_s7 + $0x2f8] sm:$0xff]  }
 0x597   :  { %v4571_v19 = vpack.c.bf16 %v4557_v48, %v4555_v10  ;;  %6922 = vmatpush3.bf16.msra.mxu1 %v7857_v36  ;;  %v7916_v36 = vld [vmem:[%s10557_s7 + $0x2f0] sm:$0xff]  }
 0x598   :  { %6923 = vmatprep.subr.bf16.mxu1 %v7860_v58  ;;  %v7919_v58 = vld [vmem:[%s10557_s7 + $0x2b8] sm:$0xff]  }
 0x599   :  { %5788 = vmatprep.mubr.bf16.mxu0 %v4571_v19 }
 0x59a   :  { %5789 = vmatmul.mubr.bf16.vlgmr.msra.gmra.mrb[124].mxu0 %v4570_v63 }
 0x59b   :  { %6924 = vmatpush3.bf16.msra.mxu1 %v7861_v21 }
 0x59c   :  { %6925 = vmatprep.subr.bf16.mxu1 %v7862_v45 }
 0x59f   :  { %6926 = vmatpush3.bf16.msra.mxu1 %v7863_v13  ;;  %v8016_v13 = vmov 0.0  }
 0x5a0   :  { %6927 = vmatprep.subr.bf16.mxu1 %v7864_v38  ;;  %v7920_v38 = vld [vmem:[%s10559_s9] sm:$0xff]  }
 0x5a3   :  { %6928 = vmatpush3.bf16.msra.mxu1 %v7865_v11  ;;  %v7921_v11 = vld [vmem:[%s10559_s9 + $0x8] sm:$0xff]  }
 0x5a4   :  { %6929 = vmatprep.subr.bf16.mxu1 %v7866_v34  ;;  %v7923_v34 = vld [vmem:[%s10559_s9 + $0x18] sm:$0xff]  }
 0x5a7   :  { %6930 = vmatpush3.bf16.msra.mxu1 %v7867_v9  ;;  %v7924_v9 = vld [vmem:[%s10559_s9 + $0x20] sm:$0xff]  }
 0x5a8   :  { %6931 = vmatprep.subr.bf16.mxu1 %v7868_v25 }
 0x5ab   :  { %6932 = vmatpush3.bf16.msra.mxu1 %v7869_v46 }
 0x5ac   :  { %6933 = vmatprep.subr.bf16.mxu1 %v7870_v22 }
 0x5af   :  { %6934 = vmatpush3.bf16.msra.mxu1 %v7871_v47 }
 0x5b0   :  { %6941 = vmatprep.subr.bf16.mxu1 %v7872_v52 }
 0x5b2   :  { %5093 = vmatmul.mubr.bf16.vlgmr.msra.gmra.mrb[108].mxu1 %v10249_v43  ;;  %v7878_v43 = vld [vmem:[%s10557_s7 + $0x1d8] sm:$0xff]  }
 0x5b3   :  { %6942 = vmatpush3.bf16.msra.mxu1 %v7873_v2  ;;  %5266 = vmatprep.mubr.bf16.mxu1 %v10271_v39  ;;  %v7879_v39 = vld [vmem:[%s10557_s7 + $0x198] sm:$0xff]   ;;  %v7925_v2 = vld [vmem:[%s10559_s9 + $0x28] sm:$0xff]  }
 0x5b4   :  { %6943 = vmatprep.subr.bf16.mxu1 %v7874_v4 }
 0x5b7   :  { %6944 = vmatpush3.bf16.msra.mxu1 %v7875_v57 }
 0x5b8   :  { %6945 = vmatprep.subr.bf16.mxu1 %v7876_v12 }
 0x5bb   :  { %6946 = vmatpush3.bf16.msra.mxu1 %v7877_v35  ;;  %v7926_v35 = vld [vmem:[%s10559_s9 + $0x30] sm:$0xff]  }
 0x5bc   :  { %6947 = vmatprep.subr.bf16.mxu1 %v7878_v43 }
 0x5bf   :  { %6948 = vmatpush3.bf16.msra.mxu1 %v7879_v39 }
 0x5c0   :  { %6949 = vmatprep.subr.bf16.mxu1 %v7880_v18 }
 0x5c3   :  { %6950 = vmatpush3.bf16.msra.mxu1 %v7881_v49 }
 0x5c4   :  { %6951 = vmatprep.subr.bf16.mxu1 %v7882_v33 }
 0x5c7   :  { %6952 = vmatpush3.bf16.msra.mxu1 %v7883_v54  ;;  %v7927_v54 = vld [vmem:[%s10559_s9 + $0x38] sm:$0xff]  }
 0x5c8   :  { %6953 = vmatprep.subr.bf16.mxu1 %v7884_v42 }
 0x5cb   :  { %6954 = vmatpush3.bf16.msra.mxu1 %v7885_v23 }
 0x5cc   :  { %6955 = vmatprep.subr.bf16.mxu1 %v7886_v32 }
 0x5cf   :  { %6956 = vmatpush3.bf16.msra.mxu1 %v7887_v59 }
 0x5d0   :  { %6963 = vmatprep.subr.bf16.mxu1 %v7888_v40 }
 0x5d2   :  { %5267 = vmatmul.mubr.bf16.vlgmr.msra.gmra.mrb[112].mxu1 %v10269_v24  ;;  %v7894_v24 = vld [vmem:[%s10557_s7 + $0x258] sm:$0xff]  }
 0x5d3   :  { %6964 = vmatpush3.bf16.msra.mxu1 %v7889_v28  ;;  %5440 = vmatprep.mubr.bf16.mxu1 %v10291_v44  ;;  %v7895_v44 = vld [vmem:[%s10557_s7 + $0x218] sm:$0xff]  }
 0x5d4   :  { %6965 = vmatprep.subr.bf16.mxu1 %v7890_v1 }
 0x5d7   :  { %6966 = vmatpush3.bf16.msra.mxu1 %v7891_v29 }
 0x5d8   :  { %6967 = vmatprep.subr.bf16.mxu1 %v7892_v41 }
 0x5db   :  { %6968 = vmatpush3.bf16.msra.mxu1 %v7893_v6 }
 0x5dc   :  { %6969 = vmatprep.subr.bf16.mxu1 %v7894_v24 }
 0x5df   :  { %6970 = vmatpush3.bf16.msra.mxu1 %v7895_v44 }
 0x5e0   :  { %6971 = vmatprep.subr.bf16.mxu1 %v7896_v3 }
 0x5e3   :  { %6972 = vmatpush3.bf16.msra.mxu1 %v7897_v60 }
 0x5e4   :  { %6973 = vmatprep.subr.bf16.mxu1 %v7898_v8 }
 0x5e7   :  { %6974 = vmatpush3.bf16.msra.mxu1 %v7899_v5 }
 0x5e8   :  { %6975 = vmatprep.subr.bf16.mxu1 %v7900_v27 }
 0x5eb   :  { %6976 = vmatpush3.bf16.msra.mxu1 %v7901_v7 }
 0x5ec   :  { %6977 = vmatprep.subr.bf16.mxu1 %v7902_v31 }
 0x5ef   :  { %6978 = vmatpush3.bf16.msra.mxu1 %v7903_v26 }
 0x5f0   :  { %6985 = vmatprep.subr.bf16.mxu1 %v7904_v62 }
 0x5f2   :  { %5441 = vmatmul.mubr.bf16.vlgmr.msra.gmra.mrb[116].mxu1 %v10289_v55  ;;  %v7910_v55 = vld [vmem:[%s10557_s7 + $0x2d8] sm:$0xff]  }
 0x5f3   :  { %6986 = vmatpush3.bf16.msra.mxu1 %v7905_v16  ;;  %5614 = vmatprep.mubr.bf16.mxu1 %v10311_v50  ;;  %v7911_v50 = vld [vmem:[%s10557_s7 + $0x298] sm:$0xff]  }
 0x5f4   :  { %6987 = vmatprep.subr.bf16.mxu1 %v7906_v20 }
 0x5f7   :  { %6988 = vmatpush3.bf16.msra.mxu1 %v7907_v30 }
 0x5f8   :  { %6989 = vmatprep.subr.bf16.mxu1 %v7908_v37 }
 0x5fb   :  { %6990 = vmatpush3.bf16.msra.mxu1 %v7909_v53 }
 0x5fc   :  { %6991 = vmatprep.subr.bf16.mxu1 %v7910_v55 }
 0x5ff   :  { %6992 = vmatpush3.bf16.msra.mxu1 %v7911_v50 }
 0x600   :  { %6993 = vmatprep.subr.bf16.mxu1 %v7912_v51 }
 0x603   :  { %6994 = vmatpush3.bf16.msra.mxu1 %v7913_v56 }
 0x604   :  { %6995 = vmatprep.subr.bf16.mxu1 %v7914_v15 }
 0x607   :  { %6996 = vmatpush3.bf16.msra.mxu1 %v7915_v0 }
 0x608   :  { %6997 = vmatprep.subr.bf16.mxu1 %v7916_v36  ;;  %v6865_v36 = vld [vmem:[%s10560_s8] ss:$0 sm:$0xff] }
 0x60b   :  { %6998 = vmatpush3.bf16.msra.mxu1 %v7917_v14 }
 0x60c   :  { %6999 = vmatprep.subr.bf16.mxu1 %v7918_v17 }
 0x60f   :  { %7000 = vmatpush3.bf16.msra.mxu1 %v7919_v58 }
 0x610   :  { %7038 = vmatprep.subr.bf16.mxu1 %v8016_v13 }
 0x612   :  { %5615 = vmatmul.mubr.bf16.vlgmr.msra.gmra.mrb[120].mxu1 %v10309_v61  ;;  %v7922_v61 = vld [vmem:[%s10559_s9 + $0x10] sm:$0xff]  }
 0x613   :  { %7039 = vmatpush3.bf16.msra.mxu1 %v7920_v38  ;;  %7054 = vmatprep.mubr.msk.bf16.mxu1 %vm8017_vm1, %v8016_v13 }
 0x614   :  { %7040 = vmatprep.subr.bf16.mxu1 %v8016_v13 }
 0x617   :  { %7041 = vmatpush3.bf16.msra.mxu1 %v7921_v11 }
 0x618   :  { %7042 = vmatprep.subr.bf16.mxu1 %v8016_v13 }
 0x61b   :  { %7043 = vmatpush3.bf16.msra.mxu1 %v7922_v61 }
 0x61c   :  { %7044 = vmatprep.subr.bf16.mxu1 %v8016_v13 }
 0x61f   :  { %7045 = vmatpush3.bf16.msra.mxu1 %v7923_v34 }
 0x620   :  { %7046 = vmatprep.subr.bf16.mxu1 %v8016_v13 }
 0x623   :  { %7047 = vmatpush3.bf16.msra.mxu1 %v7924_v9 }
 0x624   :  { %7048 = vmatprep.subr.bf16.mxu1 %v8016_v13 }
 0x627   :  { %7049 = vmatpush3.bf16.msra.mxu1 %v7925_v2 }
 0x628   :  { %7050 = vmatprep.subr.bf16.mxu1 %v8016_v13 }
 0x62b   :  { %7051 = vmatpush3.bf16.msra.mxu1 %v7926_v35 }
 0x62c   :  { %7052 = vmatprep.subr.bf16.mxu1 %v8016_v13 }
 0x62f   :  { %7053 = vmatpush3.bf16.msra.mxu1 %v7927_v54 }
 0x645   :  { %v6891_v10 = vpop.f32.mrb[100].mxu1 }
 0x646   :  { %v6892_v48 = vpop.f32.mrb[101].mxu1 }
 0x647   :  { %v6893_v63 = vadd.f32 %v6892_v48, %v6891_v10  ;;  %v6894_v19 = vpop.f32.mrb[102].mxu1 }
 0x648   :  { %v6895_v21 = vpop.f32.mrb[103].mxu1 }
 0x649   :  { %v6896_v45 = vadd.f32 %v6895_v21, %v6894_v19 }
 0x665   :  { %v6913_v25 = vpop.f32.mrb[104].mxu1 }
 0x666   :  { %v6914_v46 = vpop.f32.mrb[105].mxu1 }
 0x667   :  { %v6915_v22 = vadd.f32 %v6914_v46, %v6913_v25  ;;  %v6916_v47 = vpop.f32.mrb[106].mxu1 }
 0x668   :  { %v6917_v52 = vpop.f32.mrb[107].mxu1 }
 0x669   :  { %v4923_v4 = vadd.f32 %v6915_v22, %v6893_v63  ;;  %v6918_v57 = vadd.f32 %v6917_v52, %v6916_v47 }
 0x66b   :  { %v4926_v12 = vadd.f32 %v6918_v57, %v6896_v45  ;;  %v6866_v45 = vld [vmem:[%s10561_s10] ss:$0 sm:$0xff] }
 0x66d   :  { %v7023_v43 = vpop.f32.mrb[124].mxu0 }
 0x66e   :  { %v7024_v39 = vpop.f32.mrb[125].mxu0 }
 0x66f   :  { %v7025_v18 = vadd.f32 %v7024_v39, %v7023_v43  ;;  %v7026_v49 = vpop.f32.mrb[126].mxu0 }
 0x670   :  { %v7027_v33 = vpop.f32.mrb[127].mxu0 }
 0x671   :  { %v7028_v42 = vadd.f32 %v7027_v33, %v7026_v49 }
 0x685   :  { %v6935_v23 = vpop.f32.mrb[108].mxu1 }
 0x686   :  { %v6936_v32 = vpop.f32.mrb[109].mxu1 }
 0x687   :  { %v6937_v59 = vadd.f32 %v6936_v32, %v6935_v23  ;;  %v6938_v40 = vpop.f32.mrb[110].mxu1 }
 0x688   :  { %v6939_v28 = vpop.f32.mrb[111].mxu1 }
 0x689   :  { %v5101_v1 = vadd.f32 %v6937_v59, %v4923_v4  ;;  %v6940_v29 = vadd.f32 %v6939_v28, %v6938_v40 }
 0x68b   :  { %v5102_v41 = vadd.f32 %v6940_v29, %v4926_v12 }
 0x6a5   :  { %v6957_v6 = vpop.f32.mrb[112].mxu1 }
 0x6a6   :  { %v6958_v24 = vpop.f32.mrb[113].mxu1 }
 0x6a7   :  { %v6959_v44 = vadd.f32 %v6958_v24, %v6957_v6  ;;  %v6960_v3 = vpop.f32.mrb[114].mxu1 }
 0x6a8   :  { %v6961_v60 = vpop.f32.mrb[115].mxu1 }
 0x6a9   :  { %v5275_v8 = vadd.f32 %v6959_v44, %v5101_v1  ;;  %v6962_v5 = vadd.f32 %v6961_v60, %v6960_v3 }
 0x6ab   :  { %v5276_v27 = vadd.f32 %v6962_v5, %v5102_v41 }
 0x6c5   :  { %v6979_v7 = vpop.f32.mrb[116].mxu1 }
 0x6c6   :  { %v6980_v31 = vpop.f32.mrb[117].mxu1 }
 0x6c7   :  { %v6981_v26 = vadd.f32 %v6980_v31, %v6979_v7  ;;  %v6982_v62 = vpop.f32.mrb[118].mxu1 }
 0x6c8   :  { %v6983_v16 = vpop.f32.mrb[119].mxu1 }
 0x6c9   :  { %v5449_v20 = vadd.f32 %v6981_v26, %v5275_v8  ;;  %v6984_v30 = vadd.f32 %v6983_v16, %v6982_v62 }
 0x6cb   :  { %v5450_v37 = vadd.f32 %v6984_v30, %v5276_v27 }
 0x6e5   :  { %v7001_v53 = vpop.f32.mrb[120].mxu1 }
 0x6e6   :  { %v7002_v55 = vpop.f32.mrb[121].mxu1 }
 0x6e7   :  { %v7003_v50 = vadd.f32 %v7002_v55, %v7001_v53  ;;  %v7004_v51 = vpop.f32.mrb[122].mxu1 }
 0x6e8   :  { %v7005_v56 = vpop.f32.mrb[123].mxu1 }
 0x6e9   :  { %v5623_v15 = vadd.f32 %v7003_v50, %v5449_v20  ;;  %v7006_v0 = vadd.f32 %v7005_v56, %v7004_v51 }
 0x6eb   :  { %v5797_v14 = vadd.f32 %v7025_v18, %v5623_v15  ;;  %v5624_v17 = vadd.f32 %v7006_v0, %v5450_v37 }
 0x6ed   :  { %v5806_v58 = vadd.f32 %v6865_v36, %v5797_v14  ;;  %v5798_v10 = vadd.f32 %v7028_v42, %v5624_v17 }
 0x6ef   :  { %v5807_v48 = vadd.f32 %v6865_v36, %v5798_v10  ;;  %v5808_v63 = vmax.f32 %v5806_v58, 0.0 }
 0x6f1   :  { %v5809_v19 = vmax.f32 %v5807_v48, 0.0 }
 0x6f3   :  { %v5810_v21 = vpack.c.bf16 %v5809_v19, %v5808_v63 }
 0x6f5   :  { %7055 = vmatmul.mubr.bf16.vlgmr.msra.gmra.mrb[124].mxu1 %v5810_v21 }
 0x7c8   :  { %v5916_v13 = vpop.f32.mrb[124].mxu1 }
 0x7c9   :  { %v5917_v38 = vadd.f32 %v6866_v45, %v5916_v13  ;;  %v7056_v11 = vpop.f32.mrb[125].mxu1 }
 0x7ca   :  { %v5919_v61 = vpop.f32.mrb[126].mxu1 }
 0x7cb   :  { %5923 = vst [vmem:[%s10562_s11] sm:$0xff] %v5917_v38  ;;  %v5920_v34 = vadd.f32 %v6866_v45, %v5919_v61  ;;  %v7057_v9 = vpop.f32.mrb[127].mxu1 }
 0x7cd   :  { %5924 = vst [vmem:[%s10562_s11 + $0x8] sm:$0xff] %v5920_v34 }

</bundles_post_ra>
